<compile_context>
chip_gen: v7x
topology: tpu7x:2x2x1
jax: 0.10.0
libtpu: 0.0.40
codegen_flags: <defaults>
</compile_context>

<pallas_src>
import jax
import jax.numpy as jnp
from jax.experimental import pallas as pl
from jax.experimental.pallas import tpu as pltpu

EMB_DIM = 300        # self.embedding_dim
NUM_FILTERS = 256    # self.num_filters
BBLK = 16            # batch elements folded into the matmul M dim per grid step


def _final_height(seq_len):
    """Statically trace the DPCNN height pyramid (matches the torch while-loop)."""
    h = seq_len - 2
    while h > 2:
        h = (h - 2) // 2 + 1
    return h


def _vmem_limit_bytes(seq_len, emb_dim, c_dim):
    """Rough per-block VMEM footprint with slack, clamped to [32 MiB, 64 MiB]."""
    emb_bytes = 2 * seq_len * BBLK * emb_dim * 2                     # bf16, 2 bufs
    w_bytes = 2 * 2 * (3 * emb_dim * c_dim + 3 * c_dim * c_dim + 2 * c_dim)
    act_bytes = 10 * seq_len * BBLK * c_dim * 4                      # f32 pyramid + temps
    est = emb_bytes + w_bytes + act_bytes + (4 << 20)
    return int(min(max(est, 32 << 20), 64 << 20))


# ---------------------------------------------------------------------------
# Fused Pallas kernel: one batch block (BBLK elements) -> final [BBLK, C] feats
# ---------------------------------------------------------------------------
def _dpcnn_kernel(emb_ref, wr_ref, br_ref, wc_ref, bc_ref, out_ref):
    # emb_ref: (L, BBLK, E) bf16   wr_ref: (3, E, C) bf16   br_ref: (1, C) f32
    #                              wc_ref: (3, C, C) bf16   bc_ref: (1, C) f32
    # out_ref: (BBLK, C) f32
    seq_len = emb_ref.shape[0]
    c_dim = out_ref.shape[1]

    # Tap weights: leading-axis indexing keeps every slice tile-aligned.
    wr0, wr1, wr2 = wr_ref[0], wr_ref[1], wr_ref[2]
    wc0, wc1, wc2 = wc_ref[0], wc_ref[1], wc_ref[2]
    # Hoisted bias broadcasts (JAX does not CSE broadcast_in_dim).
    br_b = jnp.broadcast_to(br_ref[...], (BBLK, c_dim))
    bc_b = jnp.broadcast_to(bc_ref[...], (BBLK, c_dim))
    zrow = jnp.zeros((1, BBLK, c_dim), jnp.float32)

    def conv3(x_pad, w0, w1, w2, bias_b):
        # x_pad: (Hout+2, BBLK, K) (f32 or bf16) -> (Hout, BBLK, C) f32.
        # Three shifted-slice matmuls accumulated in f32; no im2row concat.
        hout = x_pad.shape[0] - 2
        kdim = x_pad.shape[2]
        xb = x_pad.astype(jnp.bfloat16)          # no-op when already bf16
        y = jnp.dot(xb[0:hout].reshape(hout * BBLK, kdim), w0,
                    preferred_element_type=jnp.float32)
        y = y + jnp.dot(xb[1:hout + 1].reshape(hout * BBLK, kdim), w1,
                        preferred_element_type=jnp.float32)
        y = y + jnp.dot(xb[2:hout + 2].reshape(hout * BBLK, kdim), w2,
                        preferred_element_type=jnp.float32)
        return y.reshape(hout, BBLK, c_dim) + bias_b

    def pad1_relu(x):
        # ZeroPad2d((0,0,1,1)) then ReLU == ReLU then pad (relu(0) == 0).
        return jnp.concatenate([zrow, jnp.maximum(x, 0.0), zrow], axis=0)

    # conv_region: Conv2d(1, 256, (3, 300)), no padding; emb stays bf16.
    x = conv3(emb_ref[...], wr0, wr1, wr2, br_b)          # (L-2, BBLK, C) f32
    # padding1 -> relu -> conv, twice.
    x = conv3(pad1_relu(x), wc0, wc1, wc2, bc_b)
    x = conv3(pad1_relu(x), wc0, wc1, wc2, bc_b)

    h = seq_len - 2
    while h > 2:                                          # static pyramid
        hp = (h - 2) // 2 + 1
        # padding2 (one zero row at the bottom) + MaxPool2d((3,1), stride=2).
        xp = jnp.concatenate([x, zrow], axis=0)           # (h+1, BBLK, C)
        ab_pairs = xp[0:2 * hp].reshape(hp, 2, BBLK, c_dim)
        c_pairs = xp[1:2 * hp + 1].reshape(hp, 2, BBLK, c_dim)
        a = ab_pairs[:, 0]                                # rows 0, 2, ..., 2hp-2
        b = ab_pairs[:, 1]                                # rows 1, 3, ..., 2hp-1
        c = c_pairs[:, 1]                                 # rows 2, 4, ..., 2hp
        px = jnp.maximum(jnp.maximum(a, b), c)            # (hp, BBLK, C)
        y = conv3(pad1_relu(px), wc0, wc1, wc2, bc_b)     # pad1 -> relu -> conv
        y = conv3(pad1_relu(y), wc0, wc1, wc2, bc_b)      # pad1 -> relu -> conv
        x = y + px                                        # residual
        h = hp

    # h == 1 here (checked statically in the wrapper) -> squeeze the H dim.
    out_ref[...] = x[0]                                   # (BBLK, C)


def dpcnn_features(emb_lbe, w_region3, b_region, w_conv3, b_conv):
    """emb_lbe: [L, Bp, E] bf16 (Bp multiple of BBLK) -> [Bp, C] f32 features."""
    seq_len, b_padded, emb_dim = emb_lbe.shape
    c_dim = NUM_FILTERS
    n_blk = b_padded // BBLK
    return pl.pallas_call(
        _dpcnn_kernel,
        out_shape=jax.ShapeDtypeStruct((b_padded, c_dim), jnp.float32),
        grid=(n_blk,),
        in_specs=[
            pl.BlockSpec((seq_len, BBLK, emb_dim), lambda g: (0, g, 0)),
            pl.BlockSpec((3, emb_dim, c_dim), lambda g: (0, 0, 0)),
            pl.BlockSpec((1, c_dim), lambda g: (0, 0)),
            pl.BlockSpec((3, c_dim, c_dim), lambda g: (0, 0, 0)),
            pl.BlockSpec((1, c_dim), lambda g: (0, 0)),
        ],
        out_specs=pl.BlockSpec((BBLK, c_dim), lambda g: (g, 0)),
        compiler_params=pltpu.CompilerParams(
            dimension_semantics=("parallel",),
            vmem_limit_bytes=_vmem_limit_bytes(seq_len, emb_dim, c_dim)),
    )(emb_lbe, w_region3, b_region, w_conv3, b_conv)


# ---------------------------------------------------------------------------
# Forward pass (embedding gather, fc and loss in plain JAX — tiny / gather ops)
# ---------------------------------------------------------------------------
def _cross_entropy(logits, labels):
    logz = jax.nn.logsumexp(logits, axis=-1)
    picked = jnp.take_along_axis(logits, labels[:, None], axis=-1)[:, 0]
    return jnp.mean(logz - picked)


def dpcnn_forward(params, input_ids, attention_mask, label_ids, mode="train"):
    del attention_mask                       # unused in the reference forward
    batch, seq_len = input_ids.shape
    assert _final_height(seq_len) == 1, (
        "sequence length must reduce to H == 1 (as in torch .squeeze())")

    # Pad batch to a multiple of BBLK and to at least 2 blocks so the
    # "parallel" grid axis can split across both v7x TensorCores.
    b_padded = max(2 * BBLK, ((batch + BBLK - 1) // BBLK) * BBLK)
    pad_b = b_padded - batch
    ids = jnp.pad(input_ids, ((0, pad_b), (0, 0))) if pad_b else input_ids
    # Gather embeddings directly in the kernel's [L, Bp, E] layout, bf16.
    emb = jnp.take(params["embedding"], ids.T, axis=0).astype(jnp.bfloat16)
    feats = dpcnn_features(emb, params["w_region3"], params["b_region"],
                           params["w_conv3"], params["b_conv"])[:batch]
    # TODO(synk): dropout treated as identity (eval mode).
    logits = feats @ params["w_fc"] + params["b_fc"]
    loss = _cross_entropy(logits, label_ids)
    if mode == "train":
        return loss
    elif mode == "test_topk":
        return loss, logits, label_ids
    else:
        return loss, jnp.argmax(logits, axis=-1), label_ids


# ---------------------------------------------------------------------------
# Plain-JAX reference of the same network (for a correctness check)
# ---------------------------------------------------------------------------
def _reference_forward(params, input_ids, label_ids):
    emb = jnp.take(params["embedding"], input_ids, axis=0)
    emb = emb.astype(jnp.bfloat16).astype(jnp.float32)             # [B, L, E]
    w_r = params["w_region3"].astype(jnp.float32)                  # [3, E, C]
    w_c = params["w_conv3"].astype(jnp.float32)                    # [3, C, C]

    def conv3(x, w, b):                                            # x: [B, H+2, K]
        hout = x.shape[1] - 2
        acc = sum(jnp.einsum("bhk,kc->bhc", x[:, t:t + hout], w[t])
                  for t in range(3))
        return acc + b

    pad1 = lambda x: jnp.pad(x, ((0, 0), (1, 1), (0, 0)))
    pad2 = lambda x: jnp.pad(x, ((0, 0), (0, 1), (0, 0)))

    def maxpool(x):
        hp = (x.shape[1] - 3) // 2 + 1
        return jnp.maximum(jnp.maximum(x[:, 0:2 * hp:2], x[:, 1:2 * hp:2]),
                           x[:, 2:2 * hp + 1:2])

    x = conv3(emb, w_r, params["b_region"])
    x = conv3(jax.nn.relu(pad1(x)), w_c, params["b_conv"])
    x = conv3(jax.nn.relu(pad1(x)), w_c, params["b_conv"])
    while x.shape[1] > 2:
        px = maxpool(pad2(x))
        y = conv3(jax.nn.relu(pad1(px)), w_c, params["b_conv"])
        y = conv3(jax.nn.relu(pad1(y)), w_c, params["b_conv"])
        x = y + px
    feats = x[:, 0, :]
    logits = feats @ params["w_fc"] + params["b_fc"]
    return logits, _cross_entropy(logits, label_ids)


# ---------------------------------------------------------------------------
# Deterministic synthetic parameters + example inputs
# ---------------------------------------------------------------------------
def init_params(key, vocab_size, num_labels):
    ks = jax.random.split(key, 6)
    scale = 0.05
    # Tap layout [3, K, C]: torch conv_region weight [C,1,3,E] -> permute(2,3,0);
    # conv weight [C,C,3,1] -> permute(2,1,0).  Synthetic init stores directly.
    w_region = jax.random.normal(ks[1], (3, EMB_DIM, NUM_FILTERS), jnp.float32) * scale
    w_conv = jax.random.normal(ks[3], (3, NUM_FILTERS, NUM_FILTERS), jnp.float32) * scale
    return {
        "embedding": jax.random.normal(ks[0], (vocab_size, EMB_DIM), jnp.float32) * scale,
        "w_region3": w_region.astype(jnp.bfloat16),
        "b_region": jax.random.normal(ks[2], (1, NUM_FILTERS), jnp.float32) * scale,
        "w_conv3": w_conv.astype(jnp.bfloat16),
        "b_conv": jax.random.normal(ks[4], (1, NUM_FILTERS), jnp.float32) * scale,
        "w_fc": jax.random.normal(ks[5], (NUM_FILTERS, num_labels), jnp.float32) * scale,
        "b_fc": jnp.zeros((num_labels,), jnp.float32),
    }


if __name__ == "__main__":
    B, L = 2, 8            # L=8 reduces to H=1 through the pyramid
    VOCAB, NUM_LABELS = 50, 5

    key = jax.random.PRNGKey(0)
    k_par, k_ids, k_lab = jax.random.split(key, 3)

    params = init_params(k_par, VOCAB, NUM_LABELS)
    input_ids = jax.random.randint(k_ids, (B, L), 0, VOCAB, dtype=jnp.int32)
    attention_mask = jnp.ones((B, L), dtype=jnp.int32)
    label_ids = jax.random.randint(k_lab, (B,), 0, NUM_LABELS, dtype=jnp.int32)

    loss, preds, _ = dpcnn_forward(params, input_ids, attention_mask,
                                   label_ids, mode="eval")
    loss = jax.block_until_ready(loss)
    preds = jax.block_until_ready(preds)

    # Compare against a plain-JAX reference of the same network (bf16 matmul
    # inputs in the kernel -> loose tolerance).
    _, logits_k, _ = dpcnn_forward(params, input_ids, attention_mask,
                                   label_ids, mode="test_topk")
    logits_ref, loss_ref = _reference_forward(params, input_ids, label_ids)
    logits_k = jax.block_until_ready(logits_k)

    assert jnp.isfinite(loss), "loss is not finite"
    assert preds.shape == (B,)
    assert jnp.allclose(logits_k, logits_ref, atol=5e-2, rtol=5e-2), \
        "kernel logits deviate from reference"
    assert jnp.allclose(loss, loss_ref, atol=5e-2), "loss deviates from reference"
    print("KERNEL_OK")
</pallas_src>

<mosaic_0001>
module attributes {stable_mosaic.version = 11 : i64} {
  func.func @_dpcnn_kernel(%arg0: i32, %arg1: memref<8x16x300xbf16, #tpu.memory_space<vmem>>, %arg2: memref<3x300x256xbf16, #tpu.memory_space<vmem>>, %arg3: memref<1x256xf32, #tpu.memory_space<vmem>>, %arg4: memref<3x256x256xbf16, #tpu.memory_space<vmem>>, %arg5: memref<1x256xf32, #tpu.memory_space<vmem>>, %arg6: memref<16x256xf32, #tpu.memory_space<vmem>>) attributes {dimension_semantics = [#tpu.dimension_semantics<parallel>], iteration_bounds = array<i64: 2>, scalar_prefetch = 0 : i64, scratch_operands = 0 : i64, tpu.core_type = #tpu.core_type<tc>, window_params = [{transform_indices = @transform_0, window_bounds = array<i64: 8, 16, 300>}, {pipeline_mode = #tpu.pipeline_mode<synchronous>, transform_indices = @transform_1, window_bounds = array<i64: 3, 300, 256>}, {pipeline_mode = #tpu.pipeline_mode<synchronous>, transform_indices = @transform_2, window_bounds = array<i64: 1, 256>}, {pipeline_mode = #tpu.pipeline_mode<synchronous>, transform_indices = @transform_3, window_bounds = array<i64: 3, 256, 256>}, {pipeline_mode = #tpu.pipeline_mode<synchronous>, transform_indices = @transform_4, window_bounds = array<i64: 1, 256>}, {transform_indices = @transform_5, window_bounds = array<i64: 16, 256>}]} {
    %c0 = arith.constant 0 : index
    %c0_0 = arith.constant 0 : index
    %c0_1 = arith.constant 0 : index
    %0 = vector.load %arg2[%c0, %c0_0, %c0_1] : memref<3x300x256xbf16, #tpu.memory_space<vmem>>, vector<1x300x256xbf16>
    %1 = vector.shape_cast %0 : vector<1x300x256xbf16> to vector<300x256xbf16>
    %c1 = arith.constant 1 : index
    %c0_2 = arith.constant 0 : index
    %c0_3 = arith.constant 0 : index
    %2 = vector.load %arg2[%c1, %c0_2, %c0_3] : memref<3x300x256xbf16, #tpu.memory_space<vmem>>, vector<1x300x256xbf16>
    %3 = vector.shape_cast %2 : vector<1x300x256xbf16> to vector<300x256xbf16>
    %c2 = arith.constant 2 : index
    %c0_4 = arith.constant 0 : index
    %c0_5 = arith.constant 0 : index
    %4 = vector.load %arg2[%c2, %c0_4, %c0_5] : memref<3x300x256xbf16, #tpu.memory_space<vmem>>, vector<1x300x256xbf16>
    %5 = vector.shape_cast %4 : vector<1x300x256xbf16> to vector<300x256xbf16>
    %c0_6 = arith.constant 0 : index
    %c0_7 = arith.constant 0 : index
    %c0_8 = arith.constant 0 : index
    %6 = vector.load %arg4[%c0_6, %c0_7, %c0_8] : memref<3x256x256xbf16, #tpu.memory_space<vmem>>, vector<1x256x256xbf16>
    %7 = vector.shape_cast %6 : vector<1x256x256xbf16> to vector<256x256xbf16>
    %c1_9 = arith.constant 1 : index
    %c0_10 = arith.constant 0 : index
    %c0_11 = arith.constant 0 : index
    %8 = vector.load %arg4[%c1_9, %c0_10, %c0_11] : memref<3x256x256xbf16, #tpu.memory_space<vmem>>, vector<1x256x256xbf16>
    %9 = vector.shape_cast %8 : vector<1x256x256xbf16> to vector<256x256xbf16>
    %c2_12 = arith.constant 2 : index
    %c0_13 = arith.constant 0 : index
    %c0_14 = arith.constant 0 : index
    %10 = vector.load %arg4[%c2_12, %c0_13, %c0_14] : memref<3x256x256xbf16, #tpu.memory_space<vmem>>, vector<1x256x256xbf16>
    %11 = vector.shape_cast %10 : vector<1x256x256xbf16> to vector<256x256xbf16>
    %c0_15 = arith.constant 0 : index
    %c0_16 = arith.constant 0 : index
    %12 = vector.load %arg3[%c0_15, %c0_16] : memref<1x256xf32, #tpu.memory_space<vmem>>, vector<1x256xf32>
    %13 = vector.shape_cast %12 : vector<1x256xf32> to vector<1x256xf32>
    %14 = vector.broadcast %13 : vector<1x256xf32> to vector<16x256xf32>
    %c0_17 = arith.constant 0 : index
    %c0_18 = arith.constant 0 : index
    %15 = vector.load %arg5[%c0_17, %c0_18] : memref<1x256xf32, #tpu.memory_space<vmem>>, vector<1x256xf32>
    %16 = vector.shape_cast %15 : vector<1x256xf32> to vector<1x256xf32>
    %17 = vector.broadcast %16 : vector<1x256xf32> to vector<16x256xf32>
    %cst = arith.constant 0.000000e+00 : f32
    %18 = vector.broadcast %cst : f32 to vector<1x16x256xf32>
    %c0_19 = arith.constant 0 : index
    %c0_20 = arith.constant 0 : index
    %c0_21 = arith.constant 0 : index
    %19 = vector.load %arg1[%c0_19, %c0_20, %c0_21] : memref<8x16x300xbf16, #tpu.memory_space<vmem>>, vector<8x16x300xbf16>
    %20 = vector.extract_strided_slice %19 {offsets = [0, 0, 0], sizes = [6, 16, 300], strides = [1, 1, 1]} : vector<8x16x300xbf16> to vector<6x16x300xbf16>
    %21 = vector.shape_cast %20 : vector<6x16x300xbf16> to vector<96x300xbf16>
    %cst_22 = arith.constant dense<0.000000e+00> : vector<96x256xf32>
    %22 = tpu.matmul %21, %1, %cst_22 {dimension_numbers = #tpu.dot_dimension_numbers<[1], [0], [0], [1], [0, 0, 1, 1], [], []>} : vector<96x300xbf16>, vector<300x256xbf16>, vector<96x256xf32> -> vector<96x256xf32>
    %23 = vector.extract_strided_slice %19 {offsets = [1, 0, 0], sizes = [6, 16, 300], strides = [1, 1, 1]} : vector<8x16x300xbf16> to vector<6x16x300xbf16>
    %24 = vector.shape_cast %23 : vector<6x16x300xbf16> to vector<96x300xbf16>
    %cst_23 = arith.constant dense<0.000000e+00> : vector<96x256xf32>
    %25 = tpu.matmul %24, %3, %cst_23 {dimension_numbers = #tpu.dot_dimension_numbers<[1], [0], [0], [1], [0, 0, 1, 1], [], []>} : vector<96x300xbf16>, vector<300x256xbf16>, vector<96x256xf32> -> vector<96x256xf32>
    %26 = arith.addf %22, %25 : vector<96x256xf32>
    %27 = vector.extract_strided_slice %19 {offsets = [2, 0, 0], sizes = [6, 16, 300], strides = [1, 1, 1]} : vector<8x16x300xbf16> to vector<6x16x300xbf16>
    %28 = vector.shape_cast %27 : vector<6x16x300xbf16> to vector<96x300xbf16>
    %cst_24 = arith.constant dense<0.000000e+00> : vector<96x256xf32>
    %29 = tpu.matmul %28, %5, %cst_24 {dimension_numbers = #tpu.dot_dimension_numbers<[1], [0], [0], [1], [0, 0, 1, 1], [], []>} : vector<96x300xbf16>, vector<300x256xbf16>, vector<96x256xf32> -> vector<96x256xf32>
    %30 = arith.addf %26, %29 : vector<96x256xf32>
    %31 = vector.shape_cast %30 : vector<96x256xf32> to vector<6x16x256xf32>
    %32 = vector.shape_cast %14 : vector<16x256xf32> to vector<1x16x256xf32>
    %33 = vector.broadcast %32 : vector<1x16x256xf32> to vector<6x16x256xf32>
    %34 = arith.addf %31, %33 : vector<6x16x256xf32>
    %cst_25 = arith.constant 0.000000e+00 : f32
    %35 = vector.broadcast %cst_25 : f32 to vector<6x16x256xf32>
    %36 = arith.maximumf %34, %35 : vector<6x16x256xf32>
    %37 = tpu.concatenate %18, %36, %18 in 0 : vector<1x16x256xf32>, vector<6x16x256xf32>, vector<1x16x256xf32> -> vector<8x16x256xf32>
    %38 = arith.truncf %37 : vector<8x16x256xf32> to vector<8x16x256xbf16>
    %39 = vector.extract_strided_slice %38 {offsets = [0, 0, 0], sizes = [6, 16, 256], strides = [1, 1, 1]} : vector<8x16x256xbf16> to vector<6x16x256xbf16>
    %40 = vector.shape_cast %39 : vector<6x16x256xbf16> to vector<96x256xbf16>
    %cst_26 = arith.constant dense<0.000000e+00> : vector<96x256xf32>
    %41 = tpu.matmul %40, %7, %cst_26 {dimension_numbers = #tpu.dot_dimension_numbers<[1], [0], [0], [1], [0, 0, 1, 1], [], []>} : vector<96x256xbf16>, vector<256x256xbf16>, vector<96x256xf32> -> vector<96x256xf32>
    %42 = vector.extract_strided_slice %38 {offsets = [1, 0, 0], sizes = [6, 16, 256], strides = [1, 1, 1]} : vector<8x16x256xbf16> to vector<6x16x256xbf16>
    %43 = vector.shape_cast %42 : vector<6x16x256xbf16> to vector<96x256xbf16>
    %cst_27 = arith.constant dense<0.000000e+00> : vector<96x256xf32>
    %44 = tpu.matmul %43, %9, %cst_27 {dimension_numbers = #tpu.dot_dimension_numbers<[1], [0], [0], [1], [0, 0, 1, 1], [], []>} : vector<96x256xbf16>, vector<256x256xbf16>, vector<96x256xf32> -> vector<96x256xf32>
    %45 = arith.addf %41, %44 : vector<96x256xf32>
    %46 = vector.extract_strided_slice %38 {offsets = [2, 0, 0], sizes = [6, 16, 256], strides = [1, 1, 1]} : vector<8x16x256xbf16> to vector<6x16x256xbf16>
    %47 = vector.shape_cast %46 : vector<6x16x256xbf16> to vector<96x256xbf16>
    %cst_28 = arith.constant dense<0.000000e+00> : vector<96x256xf32>
    %48 = tpu.matmul %47, %11, %cst_28 {dimension_numbers = #tpu.dot_dimension_numbers<[1], [0], [0], [1], [0, 0, 1, 1], [], []>} : vector<96x256xbf16>, vector<256x256xbf16>, vector<96x256xf32> -> vector<96x256xf32>
    %49 = arith.addf %45, %48 : vector<96x256xf32>
    %50 = vector.shape_cast %49 : vector<96x256xf32> to vector<6x16x256xf32>
    %51 = vector.shape_cast %17 : vector<16x256xf32> to vector<1x16x256xf32>
    %52 = vector.broadcast %51 : vector<1x16x256xf32> to vector<6x16x256xf32>
    %53 = arith.addf %50, %52 : vector<6x16x256xf32>
    %cst_29 = arith.constant 0.000000e+00 : f32
    %54 = vector.broadcast %cst_29 : f32 to vector<6x16x256xf32>
    %55 = arith.maximumf %53, %54 : vector<6x16x256xf32>
    %56 = tpu.concatenate %18, %55, %18 in 0 : vector<1x16x256xf32>, vector<6x16x256xf32>, vector<1x16x256xf32> -> vector<8x16x256xf32>
    %57 = arith.truncf %56 : vector<8x16x256xf32> to vector<8x16x256xbf16>
    %58 = vector.extract_strided_slice %57 {offsets = [0, 0, 0], sizes = [6, 16, 256], strides = [1, 1, 1]} : vector<8x16x256xbf16> to vector<6x16x256xbf16>
    %59 = vector.shape_cast %58 : vector<6x16x256xbf16> to vector<96x256xbf16>
    %cst_30 = arith.constant dense<0.000000e+00> : vector<96x256xf32>
    %60 = tpu.matmul %59, %7, %cst_30 {dimension_numbers = #tpu.dot_dimension_numbers<[1], [0], [0], [1], [0, 0, 1, 1], [], []>} : vector<96x256xbf16>, vector<256x256xbf16>, vector<96x256xf32> -> vector<96x256xf32>
    %61 = vector.extract_strided_slice %57 {offsets = [1, 0, 0], sizes = [6, 16, 256], strides = [1, 1, 1]} : vector<8x16x256xbf16> to vector<6x16x256xbf16>
    %62 = vector.shape_cast %61 : vector<6x16x256xbf16> to vector<96x256xbf16>
    %cst_31 = arith.constant dense<0.000000e+00> : vector<96x256xf32>
    %63 = tpu.matmul %62, %9, %cst_31 {dimension_numbers = #tpu.dot_dimension_numbers<[1], [0], [0], [1], [0, 0, 1, 1], [], []>} : vector<96x256xbf16>, vector<256x256xbf16>, vector<96x256xf32> -> vector<96x256xf32>
    %64 = arith.addf %60, %63 : vector<96x256xf32>
    %65 = vector.extract_strided_slice %57 {offsets = [2, 0, 0], sizes = [6, 16, 256], strides = [1, 1, 1]} : vector<8x16x256xbf16> to vector<6x16x256xbf16>
    %66 = vector.shape_cast %65 : vector<6x16x256xbf16> to vector<96x256xbf16>
    %cst_32 = arith.constant dense<0.000000e+00> : vector<96x256xf32>
    %67 = tpu.matmul %66, %11, %cst_32 {dimension_numbers = #tpu.dot_dimension_numbers<[1], [0], [0], [1], [0, 0, 1, 1], [], []>} : vector<96x256xbf16>, vector<256x256xbf16>, vector<96x256xf32> -> vector<96x256xf32>
    %68 = arith.addf %64, %67 : vector<96x256xf32>
    %69 = vector.shape_cast %68 : vector<96x256xf32> to vector<6x16x256xf32>
    %70 = vector.shape_cast %17 : vector<16x256xf32> to vector<1x16x256xf32>
    %71 = vector.broadcast %70 : vector<1x16x256xf32> to vector<6x16x256xf32>
    %72 = arith.addf %69, %71 : vector<6x16x256xf32>
    %73 = tpu.concatenate %72, %18 in 0 : vector<6x16x256xf32>, vector<1x16x256xf32> -> vector<7x16x256xf32>
    %74 = vector.extract_strided_slice %73 {offsets = [0, 0, 0], sizes = [6, 16, 256], strides = [1, 1, 1]} : vector<7x16x256xf32> to vector<6x16x256xf32>
    %75 = vector.shape_cast %74 : vector<6x16x256xf32> to vector<3x2x16x256xf32>
    %76 = vector.extract_strided_slice %73 {offsets = [1, 0, 0], sizes = [6, 16, 256], strides = [1, 1, 1]} : vector<7x16x256xf32> to vector<6x16x256xf32>
    %77 = vector.shape_cast %76 : vector<6x16x256xf32> to vector<3x2x16x256xf32>
    %78 = vector.extract_strided_slice %75 {offsets = [0, 0, 0, 0], sizes = [3, 1, 16, 256], strides = [1, 1, 1, 1]} : vector<3x2x16x256xf32> to vector<3x1x16x256xf32>
    %79 = vector.shape_cast %78 : vector<3x1x16x256xf32> to vector<3x16x256xf32>
    %80 = vector.extract_strided_slice %75 {offsets = [0, 1, 0, 0], sizes = [3, 1, 16, 256], strides = [1, 1, 1, 1]} : vector<3x2x16x256xf32> to vector<3x1x16x256xf32>
    %81 = vector.shape_cast %80 : vector<3x1x16x256xf32> to vector<3x16x256xf32>
    %82 = vector.extract_strided_slice %77 {offsets = [0, 1, 0, 0], sizes = [3, 1, 16, 256], strides = [1, 1, 1, 1]} : vector<3x2x16x256xf32> to vector<3x1x16x256xf32>
    %83 = vector.shape_cast %82 : vector<3x1x16x256xf32> to vector<3x16x256xf32>
    %84 = arith.maximumf %79, %81 : vector<3x16x256xf32>
    %85 = arith.maximumf %84, %83 : vector<3x16x256xf32>
    %cst_33 = arith.constant 0.000000e+00 : f32
    %86 = vector.broadcast %cst_33 : f32 to vector<3x16x256xf32>
    %87 = arith.maximumf %85, %86 : vector<3x16x256xf32>
    %88 = tpu.concatenate %18, %87, %18 in 0 : vector<1x16x256xf32>, vector<3x16x256xf32>, vector<1x16x256xf32> -> vector<5x16x256xf32>
    %89 = arith.truncf %88 : vector<5x16x256xf32> to vector<5x16x256xbf16>
    %90 = vector.extract_strided_slice %89 {offsets = [0, 0, 0], sizes = [3, 16, 256], strides = [1, 1, 1]} : vector<5x16x256xbf16> to vector<3x16x256xbf16>
    %91 = vector.shape_cast %90 : vector<3x16x256xbf16> to vector<48x256xbf16>
    %cst_34 = arith.constant dense<0.000000e+00> : vector<48x256xf32>
    %92 = tpu.matmul %91, %7, %cst_34 {dimension_numbers = #tpu.dot_dimension_numbers<[1], [0], [0], [1], [0, 0, 1, 1], [], []>} : vector<48x256xbf16>, vector<256x256xbf16>, vector<48x256xf32> -> vector<48x256xf32>
    %93 = vector.extract_strided_slice %89 {offsets = [1, 0, 0], sizes = [3, 16, 256], strides = [1, 1, 1]} : vector<5x16x256xbf16> to vector<3x16x256xbf16>
    %94 = vector.shape_cast %93 : vector<3x16x256xbf16> to vector<48x256xbf16>
    %cst_35 = arith.constant dense<0.000000e+00> : vector<48x256xf32>
    %95 = tpu.matmul %94, %9, %cst_35 {dimension_numbers = #tpu.dot_dimension_numbers<[1], [0], [0], [1], [0, 0, 1, 1], [], []>} : vector<48x256xbf16>, vector<256x256xbf16>, vector<48x256xf32> -> vector<48x256xf32>
    %96 = arith.addf %92, %95 : vector<48x256xf32>
    %97 = vector.extract_strided_slice %89 {offsets = [2, 0, 0], sizes = [3, 16, 256], strides = [1, 1, 1]} : vector<5x16x256xbf16> to vector<3x16x256xbf16>
    %98 = vector.shape_cast %97 : vector<3x16x256xbf16> to vector<48x256xbf16>
    %cst_36 = arith.constant dense<0.000000e+00> : vector<48x256xf32>
    %99 = tpu.matmul %98, %11, %cst_36 {dimension_numbers = #tpu.dot_dimension_numbers<[1], [0], [0], [1], [0, 0, 1, 1], [], []>} : vector<48x256xbf16>, vector<256x256xbf16>, vector<48x256xf32> -> vector<48x256xf32>
    %100 = arith.addf %96, %99 : vector<48x256xf32>
    %101 = vector.shape_cast %100 : vector<48x256xf32> to vector<3x16x256xf32>
    %102 = vector.shape_cast %17 : vector<16x256xf32> to vector<1x16x256xf32>
    %103 = vector.broadcast %102 : vector<1x16x256xf32> to vector<3x16x256xf32>
    %104 = arith.addf %101, %103 : vector<3x16x256xf32>
    %cst_37 = arith.constant 0.000000e+00 : f32
    %105 = vector.broadcast %cst_37 : f32 to vector<3x16x256xf32>
    %106 = arith.maximumf %104, %105 : vector<3x16x256xf32>
    %107 = tpu.concatenate %18, %106, %18 in 0 : vector<1x16x256xf32>, vector<3x16x256xf32>, vector<1x16x256xf32> -> vector<5x16x256xf32>
    %108 = arith.truncf %107 : vector<5x16x256xf32> to vector<5x16x256xbf16>
    %109 = vector.extract_strided_slice %108 {offsets = [0, 0, 0], sizes = [3, 16, 256], strides = [1, 1, 1]} : vector<5x16x256xbf16> to vector<3x16x256xbf16>
    %110 = vector.shape_cast %109 : vector<3x16x256xbf16> to vector<48x256xbf16>
    %cst_38 = arith.constant dense<0.000000e+00> : vector<48x256xf32>
    %111 = tpu.matmul %110, %7, %cst_38 {dimension_numbers = #tpu.dot_dimension_numbers<[1], [0], [0], [1], [0, 0, 1, 1], [], []>} : vector<48x256xbf16>, vector<256x256xbf16>, vector<48x256xf32> -> vector<48x256xf32>
    %112 = vector.extract_strided_slice %108 {offsets = [1, 0, 0], sizes = [3, 16, 256], strides = [1, 1, 1]} : vector<5x16x256xbf16> to vector<3x16x256xbf16>
    %113 = vector.shape_cast %112 : vector<3x16x256xbf16> to vector<48x256xbf16>
    %cst_39 = arith.constant dense<0.000000e+00> : vector<48x256xf32>
    %114 = tpu.matmul %113, %9, %cst_39 {dimension_numbers = #tpu.dot_dimension_numbers<[1], [0], [0], [1], [0, 0, 1, 1], [], []>} : vector<48x256xbf16>, vector<256x256xbf16>, vector<48x256xf32> -> vector<48x256xf32>
    %115 = arith.addf %111, %114 : vector<48x256xf32>
    %116 = vector.extract_strided_slice %108 {offsets = [2, 0, 0], sizes = [3, 16, 256], strides = [1, 1, 1]} : vector<5x16x256xbf16> to vector<3x16x256xbf16>
    %117 = vector.shape_cast %116 : vector<3x16x256xbf16> to vector<48x256xbf16>
    %cst_40 = arith.constant dense<0.000000e+00> : vector<48x256xf32>
    %118 = tpu.matmul %117, %11, %cst_40 {dimension_numbers = #tpu.dot_dimension_numbers<[1], [0], [0], [1], [0, 0, 1, 1], [], []>} : vector<48x256xbf16>, vector<256x256xbf16>, vector<48x256xf32> -> vector<48x256xf32>
    %119 = arith.addf %115, %118 : vector<48x256xf32>
    %120 = vector.shape_cast %119 : vector<48x256xf32> to vector<3x16x256xf32>
    %121 = vector.shape_cast %17 : vector<16x256xf32> to vector<1x16x256xf32>
    %122 = vector.broadcast %121 : vector<1x16x256xf32> to vector<3x16x256xf32>
    %123 = arith.addf %120, %122 : vector<3x16x256xf32>
    %124 = arith.addf %123, %85 : vector<3x16x256xf32>
    %125 = tpu.concatenate %124, %18 in 0 : vector<3x16x256xf32>, vector<1x16x256xf32> -> vector<4x16x256xf32>
    %126 = vector.extract_strided_slice %125 {offsets = [0, 0, 0], sizes = [2, 16, 256], strides = [1, 1, 1]} : vector<4x16x256xf32> to vector<2x16x256xf32>
    %127 = vector.shape_cast %126 : vector<2x16x256xf32> to vector<1x2x16x256xf32>
    %128 = vector.extract_strided_slice %125 {offsets = [1, 0, 0], sizes = [2, 16, 256], strides = [1, 1, 1]} : vector<4x16x256xf32> to vector<2x16x256xf32>
    %129 = vector.shape_cast %128 : vector<2x16x256xf32> to vector<1x2x16x256xf32>
    %130 = vector.extract_strided_slice %127 {offsets = [0, 0, 0, 0], sizes = [1, 1, 16, 256], strides = [1, 1, 1, 1]} : vector<1x2x16x256xf32> to vector<1x1x16x256xf32>
    %131 = vector.shape_cast %130 : vector<1x1x16x256xf32> to vector<1x16x256xf32>
    %132 = vector.extract_strided_slice %127 {offsets = [0, 1, 0, 0], sizes = [1, 1, 16, 256], strides = [1, 1, 1, 1]} : vector<1x2x16x256xf32> to vector<1x1x16x256xf32>
    %133 = vector.shape_cast %132 : vector<1x1x16x256xf32> to vector<1x16x256xf32>
    %134 = vector.extract_strided_slice %129 {offsets = [0, 1, 0, 0], sizes = [1, 1, 16, 256], strides = [1, 1, 1, 1]} : vector<1x2x16x256xf32> to vector<1x1x16x256xf32>
    %135 = vector.shape_cast %134 : vector<1x1x16x256xf32> to vector<1x16x256xf32>
    %136 = arith.maximumf %131, %133 : vector<1x16x256xf32>
    %137 = arith.maximumf %136, %135 : vector<1x16x256xf32>
    %cst_41 = arith.constant 0.000000e+00 : f32
    %138 = vector.broadcast %cst_41 : f32 to vector<1x16x256xf32>
    %139 = arith.maximumf %137, %138 : vector<1x16x256xf32>
    %140 = tpu.concatenate %18, %139, %18 in 0 : vector<1x16x256xf32>, vector<1x16x256xf32>, vector<1x16x256xf32> -> vector<3x16x256xf32>
    %141 = arith.truncf %140 : vector<3x16x256xf32> to vector<3x16x256xbf16>
    %142 = vector.extract_strided_slice %141 {offsets = [0, 0, 0], sizes = [1, 16, 256], strides = [1, 1, 1]} : vector<3x16x256xbf16> to vector<1x16x256xbf16>
    %143 = vector.shape_cast %142 : vector<1x16x256xbf16> to vector<16x256xbf16>
    %cst_42 = arith.constant dense<0.000000e+00> : vector<16x256xf32>
    %144 = tpu.matmul %143, %7, %cst_42 {dimension_numbers = #tpu.dot_dimension_numbers<[1], [0], [0], [1], [0, 0, 1, 1], [], []>} : vector<16x256xbf16>, vector<256x256xbf16>, vector<16x256xf32> -> vector<16x256xf32>
    %145 = vector.extract_strided_slice %141 {offsets = [1, 0, 0], sizes = [1, 16, 256], strides = [1, 1, 1]} : vector<3x16x256xbf16> to vector<1x16x256xbf16>
    %146 = vector.shape_cast %145 : vector<1x16x256xbf16> to vector<16x256xbf16>
    %cst_43 = arith.constant dense<0.000000e+00> : vector<16x256xf32>
    %147 = tpu.matmul %146, %9, %cst_43 {dimension_numbers = #tpu.dot_dimension_numbers<[1], [0], [0], [1], [0, 0, 1, 1], [], []>} : vector<16x256xbf16>, vector<256x256xbf16>, vector<16x256xf32> -> vector<16x256xf32>
    %148 = arith.addf %144, %147 : vector<16x256xf32>
    %149 = vector.extract_strided_slice %141 {offsets = [2, 0, 0], sizes = [1, 16, 256], strides = [1, 1, 1]} : vector<3x16x256xbf16> to vector<1x16x256xbf16>
    %150 = vector.shape_cast %149 : vector<1x16x256xbf16> to vector<16x256xbf16>
    %cst_44 = arith.constant dense<0.000000e+00> : vector<16x256xf32>
    %151 = tpu.matmul %150, %11, %cst_44 {dimension_numbers = #tpu.dot_dimension_numbers<[1], [0], [0], [1], [0, 0, 1, 1], [], []>} : vector<16x256xbf16>, vector<256x256xbf16>, vector<16x256xf32> -> vector<16x256xf32>
    %152 = arith.addf %148, %151 : vector<16x256xf32>
    %153 = vector.shape_cast %152 : vector<16x256xf32> to vector<1x16x256xf32>
    %154 = vector.shape_cast %17 : vector<16x256xf32> to vector<1x16x256xf32>
    %155 = arith.addf %153, %154 : vector<1x16x256xf32>
    %cst_45 = arith.constant 0.000000e+00 : f32
    %156 = vector.broadcast %cst_45 : f32 to vector<1x16x256xf32>
    %157 = arith.maximumf %155, %156 : vector<1x16x256xf32>
    %158 = tpu.concatenate %18, %157, %18 in 0 : vector<1x16x256xf32>, vector<1x16x256xf32>, vector<1x16x256xf32> -> vector<3x16x256xf32>
    %159 = arith.truncf %158 : vector<3x16x256xf32> to vector<3x16x256xbf16>
    %160 = vector.extract_strided_slice %159 {offsets = [0, 0, 0], sizes = [1, 16, 256], strides = [1, 1, 1]} : vector<3x16x256xbf16> to vector<1x16x256xbf16>
    %161 = vector.shape_cast %160 : vector<1x16x256xbf16> to vector<16x256xbf16>
    %cst_46 = arith.constant dense<0.000000e+00> : vector<16x256xf32>
    %162 = tpu.matmul %161, %7, %cst_46 {dimension_numbers = #tpu.dot_dimension_numbers<[1], [0], [0], [1], [0, 0, 1, 1], [], []>} : vector<16x256xbf16>, vector<256x256xbf16>, vector<16x256xf32> -> vector<16x256xf32>
    %163 = vector.extract_strided_slice %159 {offsets = [1, 0, 0], sizes = [1, 16, 256], strides = [1, 1, 1]} : vector<3x16x256xbf16> to vector<1x16x256xbf16>
    %164 = vector.shape_cast %163 : vector<1x16x256xbf16> to vector<16x256xbf16>
    %cst_47 = arith.constant dense<0.000000e+00> : vector<16x256xf32>
    %165 = tpu.matmul %164, %9, %cst_47 {dimension_numbers = #tpu.dot_dimension_numbers<[1], [0], [0], [1], [0, 0, 1, 1], [], []>} : vector<16x256xbf16>, vector<256x256xbf16>, vector<16x256xf32> -> vector<16x256xf32>
    %166 = arith.addf %162, %165 : vector<16x256xf32>
    %167 = vector.extract_strided_slice %159 {offsets = [2, 0, 0], sizes = [1, 16, 256], strides = [1, 1, 1]} : vector<3x16x256xbf16> to vector<1x16x256xbf16>
    %168 = vector.shape_cast %167 : vector<1x16x256xbf16> to vector<16x256xbf16>
    %cst_48 = arith.constant dense<0.000000e+00> : vector<16x256xf32>
    %169 = tpu.matmul %168, %11, %cst_48 {dimension_numbers = #tpu.dot_dimension_numbers<[1], [0], [0], [1], [0, 0, 1, 1], [], []>} : vector<16x256xbf16>, vector<256x256xbf16>, vector<16x256xf32> -> vector<16x256xf32>
    %170 = arith.addf %166, %169 : vector<16x256xf32>
    %171 = vector.shape_cast %170 : vector<16x256xf32> to vector<1x16x256xf32>
    %172 = vector.shape_cast %17 : vector<16x256xf32> to vector<1x16x256xf32>
    %173 = arith.addf %171, %172 : vector<1x16x256xf32>
    %174 = arith.addf %173, %137 : vector<1x16x256xf32>
    %175 = vector.shape_cast %174 : vector<1x16x256xf32> to vector<16x256xf32>
    %c0_49 = arith.constant 0 : index
    %c0_50 = arith.constant 0 : index
    %176 = vector.load %arg6[%c0_49, %c0_50] : memref<16x256xf32, #tpu.memory_space<vmem>>, vector<16x256xf32>
    tpu.vector_store %arg6[%c0_49, %c0_50], %175 {strides = array<i32>} : memref<16x256xf32, #tpu.memory_space<vmem>>, vector<16x256xf32>,
    return
  }
  func.func @transform_0(%arg0: i32) -> (i32, i32, i32) {
    %c0_i32 = arith.constant 0 : i32
    %c0_i32_0 = arith.constant 0 : i32
    %c0_i32_1 = arith.constant 0 : i32
    return %c0_i32, %arg0, %c0_i32_0 : i32, i32, i32
  }
  func.func @transform_1(%arg0: i32) -> (i32, i32, i32) {
    %c0_i32 = arith.constant 0 : i32
    %c0_i32_0 = arith.constant 0 : i32
    %c0_i32_1 = arith.constant 0 : i32
    %c0_i32_2 = arith.constant 0 : i32
    return %c0_i32, %c0_i32_0, %c0_i32_1 : i32, i32, i32
  }
  func.func @transform_2(%arg0: i32) -> (i32, i32) {
    %c0_i32 = arith.constant 0 : i32
    %c0_i32_0 = arith.constant 0 : i32
    %c0_i32_1 = arith.constant 0 : i32
    return %c0_i32, %c0_i32_0 : i32, i32
  }
  func.func @transform_3(%arg0: i32) -> (i32, i32, i32) {
    %c0_i32 = arith.constant 0 : i32
    %c0_i32_0 = arith.constant 0 : i32
    %c0_i32_1 = arith.constant 0 : i32
    %c0_i32_2 = arith.constant 0 : i32
    return %c0_i32, %c0_i32_0, %c0_i32_1 : i32, i32, i32
  }
  func.func @transform_4(%arg0: i32) -> (i32, i32) {
    %c0_i32 = arith.constant 0 : i32
    %c0_i32_0 = arith.constant 0 : i32
    %c0_i32_1 = arith.constant 0 : i32
    return %c0_i32, %c0_i32_0 : i32, i32
  }
  func.func @transform_5(%arg0: i32) -> (i32, i32) {
    %c0_i32 = arith.constant 0 : i32
    %c0_i32_0 = arith.constant 0 : i32
    return %arg0, %c0_i32 : i32, i32
  }
}

</mosaic_0001>

<bundles_post_ra>
// kernel: tpu_custom_call.1
= control target key start
LH: loop header
LB: loop body
LE: loop exit
PB: predicated region body
PF: predicated region fallthrough
CT: control target
= control target key end

     0   :  { %10 = vsyncpa [#allocation3], 0  ;;  %s7021_s0 = inlined_call_operand.hbm [shape: bf16[8,32,300], index: 0, kind: input, shape index: {}]   ;;  %s7022_s1 = inlined_call_operand.hbm [shape: bf16[3,300,256], index: 1, kind: input, shape index: {}]   ;;  %s7023_s2 = inlined_call_operand.vmem [shape: f32[1,256], index: 2, kind: input, shape index: {}]   ;;  %s7024_s3 = inlined_call_operand.hbm [shape: bf16[3,256,256], index: 3, kind: input, shape index: {}]   ;;  %s7025_s4 = inlined_call_operand.vmem [shape: f32[1,256], index: 4, kind: input, shape index: {}]   ;;  %s7026_s5 = inlined_call_operand.hbm [shape: f32[32,256], index: 5, kind: output, shape index: {}]  }
   0x1   :  { %12 = vsyncpa [#allocation3 + $0x1], 0 }
   0x2   :  { %13 = vsyncpa [#allocation6], 0 }
   0x3   :  { %14 = vsyncpa [#allocation4], 0 }
   0x4   :  { %16 = vsyncpa [#allocation4 + $0x1], 0  ;;  %s5262_s18 = smov 0   ;;  %s5264_s19 = smov 0  }
   0x5   :  { %s5266_s20 = smov 0   ;;  %s5268_s21 = smov 0  }
   0x6 LB: > { %s5283_s22 = sadd.s32 4294967295, %s5215_s21   ;;  %s3976_s23 = sadd.s32 4294967294, %s5215_s21   ;;  %s5215_s21 = sphi %s5268_s21, %s7446_s21   ;;  %s5211_s20 = sphi %s5266_s20, %s7445_s20   ;;  %s5207_s19 = sphi %s5264_s19, %s7444_s19   ;;  %s5203_s18 = sphi %s5262_s18, %s7443_s18  }
   0x7   : > { %s5287_s24 = sadd.s32 1, %s5215_s21   ;;  %s29_s25 = sadd.s32 1, %s5211_s20 }
   0x8   : > { %s26_s26 = ssub.s32 %s5215_s21, %s5287_s24  ;;  %p36_p0 = scmp.ne.s32.totalorder %s5211_s20, %s5207_s19 }
   0x9   : > { %p27_p1 = scmp.eq.s32.totalorder %s26_s26, 0  ;;  %p37_p2 = scmp.eq.s32.totalorder %s5215_s21, 0 }
   0xa   : > { %p42_p3 = scmp.ne.s32.totalorder %s5207_s19, %s5203_s18  ;;  %p7027_p4 = scmp.eq.s32.totalorder %s5283_s22, 0 }
   0xb   : > { %s5299_s27 = scalar_select %p27_p1, %s5211_s20, %s29_s25  }
   0xc   : > { %p5301_p5 = por %p37_p2, %p36_p0  ;;  %p5307_p6 = por %p7027_p4, %p42_p3 }
   0xd   : > { %7195 = sst [smem:[#allocation15_spill]] %s5299_s27  ;;  %p150_p7 = scmp.eq.s32.totalorder %s5283_s22, 1 }
   0xe   : > { %s7196_s28 = scalar_select %p5301_p5, 1, 0 }
   0xf   : > { %s7197_s29 = scalar_select %p5307_p6, 1, 0 }
  0x10   : > { %p156_p8 = scmp.eq.s32.totalorder %s3976_s23, 1  ;;  %p3977_p9 = scmp.ge.s32.totalorder %s5215_s21, 1 }
  0x11   : > { %p163_p10 = scmp.lt.s32.totalorder %s5215_s21, 3  ;;  %p5314_p11 = por %p150_p7, %p36_p0 }
  0x12   : > { %p5318_p12 = por %p156_p8, %p42_p3  ;;  %s5217_s8 = smov [#allocation5]  }
  0x13   : > { %s7198_s30 = scalar_select %p5314_p11, 1, 0 }
  0x14   : > { %s7199_s6 = scalar_select %p5318_p12, 1, 0 }
  0x15   : > { %p5322_p13 = pnand %p3977_p9, %p163_p10  ;;  %s175_s9 = sshll.u32 %s5217_s8, 4  ;;  %s176_s9 = int_to_ptr.vmem [resolvable:$true] %s175_s9 }
  0x16   : > { %s5218_s11 = smov [#allocation7]   ;;  %s5089_s15 = scalar_lea.hbm %s7022_s1, 14592 }
  0x17   : > { %s7200_s7 = scalar_select %p5322_p13, 1, 0 }
  0x18   : > { %p4547_p1 = pneg %p5322_p13  ;;  %s191_s12 = sshll.u32 %s5218_s11, 4  ;;  %s5334_s12 = int_to_ptr.vmem [resolvable:$true] %s191_s12 }
  0x19   : > { %p5090_p0 = scmp.ne.s32.totalorder %s7022_s1, %s5089_s15  ;;  %p5096_p9 = scmp.lt.u32.totalorder %s5089_s15, %s7022_s1 }
  0x1a   : > { %p5330_p2 = pnand %p4547_p1, %p7027_p4 }
  0x1c   : > { %p5091_p3 = pneg %p5330_p2 }
  0x1e   : > { %p5092_p7 = pnand %p5091_p3, %p5090_p0 }
  0x20   : > { %p5093_p8 = pneg %p5092_p7 }
  0x22   : > { %p5098_p10 = pnand %p5096_p9, %p5093_p8 }
  0x24   : > { %5101 = shalt.err (!%p5098_p10)
}
  0x25   : > { %s5102_s26 = scalar_lea.vmem %s176_s9, 14592  ;;  %p5110_p11 = scmp.lt.s32.totalorder %s176_s9, %s176_s9 }
  0x26   : > { %p5103_p1 = scmp.ne.s32.totalorder %s176_s9, %s5102_s26  ;;  %p5111_p6 = scmp.lt.s32.totalorder %s5102_s26, %s5102_s26 }
  0x28   : > { %p5105_p4 = pnand %p5103_p1, %p5091_p3  ;;  %p5112_p13 = por %p5111_p6, %p5110_p11 }
  0x2a   : > { %p5106_p12 = pneg %p5105_p4 }
  0x2c   : > { %p5113_p5 = pnand %p5112_p13, %p5106_p12 }
  0x2e   : > { %5116 = shalt.err (!%p5113_p5)
}
  0x2f   : > { %s5219_s8 = smov 128   ;;  %s5220_s11 = smov 8  }
  0x30   : > { %4550 = dma.hbm_to_vmem [thread:$0]  (!%p5330_p2), %s7022_s1, 14592, %s176_s9, [#allocation6], %s5219_s8, %s5219_s8, %s5220_s11  }
  0x31   : > { %s5117_s17 = scalar_lea.hbm %s7024_s3, 12288 }
  0x32   : > { %p5118_p4 = scmp.ne.s32.totalorder %s7024_s3, %s5117_s17  ;;  %p5124_p11 = scmp.lt.u32.totalorder %s5117_s17, %s7024_s3 }
  0x34   : > { %p5120_p5 = pnand %p5118_p4, %p5091_p3 }
  0x36   : > { %p5121_p6 = pneg %p5120_p5 }
  0x38   : > { %p5126_p12 = pnand %p5124_p11, %p5121_p6 }
  0x3a   : > { %5129 = shalt.err (!%p5126_p12)
}
  0x3b   : > { %s5130_s9 = scalar_lea.vmem %s5334_s12, 12288  ;;  %p5138_p8 = scmp.lt.s32.totalorder %s5334_s12, %s5334_s12 }
  0x3c   : > { %p5131_p13 = scmp.ne.s32.totalorder %s5334_s12, %s5130_s9  ;;  %p5139_p9 = scmp.lt.s32.totalorder %s5130_s9, %s5130_s9 }
  0x3e   : > { %p5133_p0 = pnand %p5131_p13, %p5091_p3  ;;  %p5140_p10 = por %p5139_p9, %p5138_p8 }
  0x40   : > { %p5134_p7 = pneg %p5133_p0 }
  0x42   : > { %p5141_p1 = pnand %p5140_p10, %p5134_p7 }
  0x44   : > { %5144 = shalt.err (!%p5141_p1)
}
  0x45   : > { %4553 = dma.hbm_to_vmem [thread:$0]  (!%p5330_p2), %s7024_s3, 12288, %s5334_s12, [#allocation6], %s5219_s8, %s5219_s8, %s5220_s11  }
  0x46   : > { %p3980_p4 = scmp.ge.s32.totalorder %s5215_s21, 2 }
  0x48   : > { %204 = sbr.rel (%p3980_p4) target bundleno = 95 (0x5f), region = 32 }
  0x4f   : > { %s208_s14 = sand.u32 1, %s5211_s20   ;;  %s4526_s15 = smul.u32 384, %s5215_s21 }
  0x50   : > { %s4525_s10 = smul.u32 192, %s208_s14  ;;  %s5221_s16 = smov 768  }
  0x51   : > { %p7202_p3 = scmp.ne.s32.totalorder %s7196_s28, 0  ;;  %s219_s17 = scalar_lea.hbm %s7021_s0, %s4526_s15 }
  0x52   : > { %s212_s25 = scalar_lea.vmem [#allocation2], %s4525_s10  ;;  %s5222_s9 = smov 384  }
  0x53   : > { %4533 = sst [smem:[#allocation10]] (%p7202_p3), %s5221_s16  ;;  %s232_s26 = sshll.u32 %s212_s25, 4  ;;  %s233_s26 = int_to_ptr.vmem [resolvable:$true] %s232_s26 }
  0x54   : > { %s4532_s12 = scalar_select %p7202_p3, [#allocation0], [#allocation11] }
  0x55   : > { %4534 = sst [smem:[#allocation10 + $0x1]] (%p7202_p3), %s5222_s9  ;;  %s5223_s27 = smov 2  }
  0x56   : > { %s224_s23 = sld [smem:[%s4532_s12]]   ;;  %s5224_s13 = smov 192  }
  0x57   : > { %4535 = sst [smem:[#allocation10 + $0x2]] (%p7202_p3), %s5223_s27  ;;  %s5225_s16 = smov 12  }
  0x58   : > { %4536 = sst [smem:[#allocation10 + $0x3]] (%p7202_p3), %s5224_s13  ;;  %s209_s10 = scalar_lea.sflag [#allocation3], %s208_s14 }
  0x59   : > { %4537 = sst [smem:[#allocation10 + $0x4]] (%p7202_p3), %s5224_s13  ;;  %s5226_s8 = smov [#allocation9]  }
  0x5a   : > { %4538 = sst [smem:[#allocation10 + $0x5]] (%p7202_p3), %s5225_s16 }
  0x5c   : > { %s3984_s15 = sshll.u32 %s224_s23, 26 }
  0x5d   : > { %s3985_s12 = sadd.s32 134217728, %s3984_s15 }
  0x5e   : > { %4539 = dma.general (%p7202_p3), %s219_s17, 3072, %s233_s26, %s209_s10, %s5226_s8, [#allocation10], %s3985_s12, 0  }
  0x5f PF: > { %p7203_p2 = scmp.ne.s32.totalorder %s7200_s7, 0 }
  0x61   : > { %257 = sbr.rel (%p7203_p2) target bundleno = 2565 (0xa05), region = 40 }
  0x68   : > { %s5410_s11 = sand.u32 1, %s5207_s19   ;;  %p7204_p5 = scmp.ne.s32.totalorder %s7197_s29, 0 }
  0x69   : > { %s4527_s25 = smul.u32 192, %s5410_s11  ;;  %s260_s9 = scalar_lea.sflag [#allocation3], %s5410_s11 }
  0x6b   : > { %s5414_s27 = scalar_lea.vmem [#allocation2], %s4527_s25 }
  0x6c   : > { %5190 = dma.done.wait (%p7204_p5), %s260_s9, 3072  }
  0x6d   : > { %5192 = vsyncadd (%p7204_p5), %s260_s9, 4294964224  ;;  %p7205_p6 = scmp.eq.s32.totalorder %s5283_s22, 0 }
  0x6f   : > { %5194 = dma.done.wait (%p7205_p6), [#allocation6], 26880   ;;  %p7206_p11 = pmov %p7205_p6 }
  0x70   : > { %v5227_v0 = vmov 0   ;;  %v4609_v1 = vld [vmem:[#allocation5 + $0x134] ss:$8 sps:$4 sm:$0xff]   ;;  %v4611_v2 = vld [vmem:[#allocation5 + $0x130] ss:$8 sps:$4 sm:$0xff]   ;;  %vm846_vm0 = vcmask 1045504  }
  0x71   : > { %5196 = vsyncadd (%p7206_p11), [#allocation6], 4294940416  ;;  %978 = vmatprep.mubr.bf16.mxu1 %v5227_v0  ;;  %853 = vmatprep.subr.bf16.mxu0 %v4609_v1  ;;  %v4612_v3 = vld [vmem:[#allocation5 + $0x144] ss:$8 sps:$4 sm:$0xff]   ;;  %v4614_v4 = vld [vmem:[#allocation5 + $0x140] ss:$8 sps:$4 sm:$0xff]  }
  0x72   : > { %854 = vmatpush1.bf16.msra.mxu0 %v4611_v2  ;;  %v4615_v5 = vld [vmem:[#allocation5 + $0x154] ss:$8 sps:$4 sm:$0xff]   ;;  %v4617_v6 = vld [vmem:[#allocation5 + $0x150] ss:$8 sps:$4 sm:$0xff]   ;;  %v4618_v7 = vld [vmem:[#allocation5 + $0x164] ss:$8 sps:$4 sm:$0xff]  }
  0x73   : > { %855 = vmatprep.subr.bf16.mxu0 %v4612_v3  ;;  %v4620_v8 = vld [vmem:[#allocation5 + $0x160] ss:$8 sps:$4 sm:$0xff]   ;;  %v4621_v9 = vld [vmem:[#allocation5 + $0x174] ss:$8 sps:$4 sm:$0xff]   ;;  %v4623_v10 = vld [vmem:[#allocation5 + $0x170] ss:$8 sps:$4 sm:$0xff]  }
  0x74   : > { %v4624_v11 = vld [vmem:[#allocation5 + $0x184] ss:$8 sps:$4 sm:$0xff]   ;;  %v4626_v12 = vld [vmem:[#allocation5 + $0x180] ss:$8 sps:$4 sm:$0xff]   ;;  %v4650_v13 = vld [vmem:[#allocation5 + $0x234] ss:$8 sps:$4 sm:$0xff]  }
  0x75   : > { %v4653_v14 = vld [vmem:[#allocation5 + $0x230] ss:$8 sps:$4 sm:$0xff]   ;;  %v4627_v15 = vld [vmem:[#allocation5 + $0x194] ss:$8 sps:$4 sm:$0xff]   ;;  %946 = vmatprep.subr.bf16.mxu1 %v4650_v13  ;;  %v4656_v16 = vld [vmem:[#allocation5 + $0x244] ss:$8 sps:$4 sm:$0xff]  }
  0x76   : > { %856 = vmatpush1.bf16.msra.mxu0 %v4614_v4  ;;  %v4629_v17 = vld [vmem:[#allocation5 + $0x190] ss:$8 sps:$4 sm:$0xff]   ;;  %947 = vmatpush1.bf16.msra.mxu1 %v4653_v14  ;;  %v4659_v18 = vld [vmem:[#allocation5 + $0x240] ss:$8 sps:$4 sm:$0xff]   ;;  %v4630_v19 = vld [vmem:[#allocation5 + $0x1a4] ss:$8 sps:$4 sm:$0xff]  }
  0x77   : > { %857 = vmatprep.subr.bf16.mxu0 %v4615_v5  ;;  %948 = vmatprep.subr.bf16.mxu1 %v4656_v16  ;;  %v4662_v20 = vld [vmem:[#allocation5 + $0x254] ss:$8 sps:$4 sm:$0x3f]   ;;  %v4665_v21 = vld [vmem:[#allocation5 + $0x250] ss:$8 sps:$4 sm:$0x3f]  }
  0x78   : > { %v5426_v22 = vld [vmem:[%s5414_s27 + $0x1c] ss:$12 sps:$4 sm:$0xff]   ;;  %v848_v24 = vsel %vm846_vm0, %v4665_v21, 0  ;;  %v5432_v26 = vld [vmem:[%s5414_s27 + $0x20] ss:$12 sps:$4 sm:$0xff]   ;;  %vm827_vm1 = vcmask 359424  }
  0x79   : > { %v4632_v23 = vld [vmem:[#allocation5 + $0x1a0] ss:$8 sps:$4 sm:$0xff]   ;;  %v4633_v25 = vld [vmem:[#allocation5 + $0x1b4] ss:$8 sps:$4 sm:$0xff]   ;;  %885 = vmatprep.mubr.bf16.mxu0 %v5426_v22  ;;  %v4635_v27 = vld [vmem:[#allocation5 + $0x1b0] ss:$8 sps:$4 sm:$0xff]  }
  0x7a   : > { %858 = vmatpush1.bf16.msra.mxu0 %v4617_v6  ;;  %949 = vmatpush1.bf16.msra.mxu1 %v4659_v18  ;;  %v4636_v28 = vld [vmem:[#allocation5 + $0x1c4] ss:$8 sps:$4 sm:$0xff]   ;;  %v4638_v29 = vld [vmem:[#allocation5 + $0x1c0] ss:$8 sps:$4 sm:$0xff]   ;;  %v4639_v30 = vld [vmem:[#allocation5 + $0x1d4] ss:$8 sps:$4 sm:$0xff]  }
  0x7b   : > { %859 = vmatprep.subr.bf16.mxu0 %v4618_v7  ;;  %4046 = vmatprep.subr.msk.bf16.mxu1 %vm846_vm0, %v4662_v20  ;;  %v5438_v31 = vld [vmem:[%s5414_s27 + $0x38] ss:$12 sps:$4 sm:$0xff]   ;;  %v4644_v34 = vld [vmem:[#allocation5 + $0x1e0] ss:$8 sps:$4 sm:$0xff]   ;;  %v4645_v35 = vld [vmem:[#allocation5 + $0x1f4] ss:$8 sps:$4 sm:$0xff]  }
  0x7c   : > { %v4641_v32 = vld [vmem:[#allocation5 + $0x1d0] ss:$8 sps:$4 sm:$0xff]   ;;  %v4642_v33 = vld [vmem:[#allocation5 + $0x1e4] ss:$8 sps:$4 sm:$0xff]   ;;  %v4652_v39 = vld [vmem:[#allocation5 + $0x200] ss:$8 sps:$4 sm:$0xff]  }
  0x7d   : > { %v5444_v36 = vld [vmem:[%s5414_s27 + $0x50] ss:$12 sps:$4 sm:$0xff]   ;;  %v4648_v38 = vld [vmem:[#allocation5 + $0x204] ss:$8 sps:$4 sm:$0xff]   ;;  %v5450_v41 = vld [vmem:[%s5414_s27 + $0x68] ss:$12 sps:$4 sm:$0xff]  }
  0x7e   : > { %860 = vmatpush1.bf16.msra.mxu0 %v4620_v8  ;;  %951 = vmatpush1.bf16.msra.mxu1 %v848_v24  ;;  %v4647_v37 = vld [vmem:[#allocation5 + $0x1f0] ss:$8 sps:$4 sm:$0xff]   ;;  %v4654_v40 = vld [vmem:[#allocation5 + $0x214] ss:$8 sps:$4 sm:$0xff]   ;;  %v4660_v43 = vld [vmem:[#allocation5 + $0x224] ss:$8 sps:$4 sm:$0xff]  }
  0x7f   : > { %861 = vmatprep.subr.bf16.mxu0 %v4621_v9  ;;  %v4658_v42 = vld [vmem:[#allocation5 + $0x210] ss:$8 sps:$4 sm:$0xff]   ;;  %v4664_v44 = vld [vmem:[#allocation5 + $0x220] ss:$8 sps:$4 sm:$0xff]   ;;  %v4672_v45 = vld [vmem:[#allocation5 + $0x4] ss:$8 sps:$4 sm:$0xff]  }
  0x80   : > { %v5456_v46 = vld [vmem:[%s5414_s27 + $0x18] ss:$12 sps:$4 sm:$0xff]   ;;  %v5459_v47 = vld [vmem:[%s5414_s27 + $0x80] ss:$12 sps:$4 sm:$0xff]   ;;  %v4675_v50 = vld [vmem:[#allocation5 + $0x14] ss:$8 sps:$4 sm:$0xff]  }
  0x81   : > { %4047 = vmatmul.mubr.msk.bf16.vlgmr.msra.gmra.mrb[0].mxu1 %vm827_vm1, %v5432_v26  ;;  %v4670_v48 = vld [vmem:[#allocation5] ss:$8 sps:$4 sm:$0xff]   ;;  %v4673_v51 = vld [vmem:[#allocation5 + $0x10] ss:$8 sps:$4 sm:$0xff]   ;;  %v4678_v52 = vld [vmem:[#allocation5 + $0x24] ss:$8 sps:$4 sm:$0xff]  }
  0x82   : > { %862 = vmatpush1.bf16.msra.mxu0 %v4623_v10  ;;  %988 = vmatprep.mubr.bf16.mxu1 %v5227_v0  ;;  %v5462_v49 = vld [vmem:[%s5414_s27 + $0x34] ss:$12 sps:$4 sm:$0xff]   ;;  %v4731_v53 = vld [vmem:[%s5414_s27 + $0x98] ss:$12 sps:$4 sm:$0xff]   ;;  %v5471_v55 = vld [vmem:[%s5414_s27 + $0x30] ss:$12 sps:$4 sm:$0xff]  }
  0x83   : > { %863 = vmatprep.subr.bf16.mxu0 %v4624_v11  ;;  %v4676_v54 = vld [vmem:[#allocation5 + $0x20] ss:$8 sps:$4 sm:$0xff]   ;;  %v5474_v56 = vld [vmem:[%s5414_s27 + $0x4c] ss:$12 sps:$4 sm:$0xff]   ;;  %v4681_v57 = vld [vmem:[#allocation5 + $0x34] ss:$8 sps:$4 sm:$0xff]  }
  0x84   : > { %v4679_v58 = vld [vmem:[#allocation5 + $0x30] ss:$8 sps:$4 sm:$0xff]   ;;  %v4684_v59 = vld [vmem:[#allocation5 + $0x44] ss:$8 sps:$4 sm:$0xff]   ;;  %v4682_v60 = vld [vmem:[#allocation5 + $0x40] ss:$8 sps:$4 sm:$0xff]  }
  0x85   : > { %v5480_v61 = vld [vmem:[%s5414_s27 + $0x48] ss:$12 sps:$4 sm:$0xff]   ;;  %v5483_v63 = vld [vmem:[%s5414_s27 + $0x64] ss:$12 sps:$4 sm:$0xff]   ;;  %v5488_v3 = vld [vmem:[%s5414_s27 + $0x60] ss:$12 sps:$4 sm:$0xff]  }
  0x86   : > { %864 = vmatpush1.bf16.msra.mxu0 %v4626_v12  ;;  %v4689_v62 = vld [vmem:[#allocation5 + $0x54] ss:$8 sps:$4 sm:$0xff]   ;;  %v4687_v1 = vld [vmem:[#allocation5 + $0x50] ss:$8 sps:$4 sm:$0xff]   ;;  %v4694_v2 = vld [vmem:[#allocation5 + $0x64] ss:$8 sps:$4 sm:$0xff]  }
  0x87   : > { %865 = vmatprep.subr.bf16.mxu0 %v4627_v15  ;;  %v4692_v4 = vld [vmem:[#allocation5 + $0x60] ss:$8 sps:$4 sm:$0xff]   ;;  %v4699_v5 = vld [vmem:[#allocation5 + $0x74] ss:$8 sps:$4 sm:$0xff]   ;;  %v4697_v7 = vld [vmem:[#allocation5 + $0x70] ss:$8 sps:$4 sm:$0xff]  }
  0x88   : > { %v5491_v6 = vld [vmem:[%s5414_s27 + $0x7c] ss:$12 sps:$4 sm:$0xff]   ;;  %v4704_v8 = vld [vmem:[#allocation5 + $0x84] ss:$8 sps:$4 sm:$0xff]   ;;  %v5499_v12 = vld [vmem:[%s5414_s27 + $0x94] ss:$12 sps:$4 sm:$0xff]  }
  0x89   : > { %4048 = vmatmul.mubr.msk.bf16.gmra.mrb[4].mxu1 %vm827_vm1, %v5438_v31  ;;  %v5496_v9 = vld [vmem:[%s5414_s27 + $0x78] ss:$12 sps:$4 sm:$0xff]   ;;  %v4702_v10 = vld [vmem:[#allocation5 + $0x80] ss:$8 sps:$4 sm:$0xff]   ;;  %v4709_v11 = vld [vmem:[#allocation5 + $0x94] ss:$8 sps:$4 sm:$0xff]  }
  0x8a   : > { %866 = vmatpush1.bf16.msra.mxu0 %v4629_v17  ;;  %998 = vmatprep.mubr.bf16.mxu1 %v5227_v0  ;;  %v4707_v13 = vld [vmem:[#allocation5 + $0x90] ss:$8 sps:$4 sm:$0xff]   ;;  %v4714_v14 = vld [vmem:[#allocation5 + $0xa4] ss:$8 sps:$4 sm:$0xff]   ;;  %v4712_v16 = vld [vmem:[#allocation5 + $0xa0] ss:$8 sps:$4 sm:$0xff]  }
  0x8b   : > { %867 = vmatprep.subr.bf16.mxu0 %v4630_v19  ;;  %v5504_v15 = vld [vmem:[%s5414_s27 + $0x90] ss:$12 sps:$4 sm:$0xff]   ;;  %v4724_v20 = vld [vmem:[#allocation5 + $0xc4] ss:$8 sps:$4 sm:$0xff]   ;;  %v4722_v21 = vld [vmem:[#allocation5 + $0xc0] ss:$8 sps:$4 sm:$0xff]  }
  0x8c   : > { %v4719_v17 = vld [vmem:[#allocation5 + $0xb4] ss:$8 sps:$4 sm:$0xff]   ;;  %v4740_v18 = vld [vmem:[%s5414_s27 + $0x4] ss:$12 sps:$4 sm:$0xff]   ;;  %s3989_s17 = sshll.u32 %s5410_s11, 5  ;;  %s4252_s13 = sshll.u32 %s5283_s22, 9 }
  0x8d   : > { %v4717_v19 = vld [vmem:[#allocation5 + $0xb0] ss:$8 sps:$4 sm:$0xff]   ;;  %s297_s23 = scalar_lea.vmem [#allocation8], %s3989_s17  ;;  %s6976_s22 = scalar_lea.hbm %s7026_s5, %s4252_s13 }
  0x8e   : > { %868 = vmatpush1.bf16.msra.mxu0 %v4632_v23  ;;  %v4729_v23 = vld [vmem:[#allocation5 + $0xd4] ss:$8 sps:$4 sm:$0xff]   ;;  %v4727_v24 = vld [vmem:[#allocation5 + $0xd0] ss:$8 sps:$4 sm:$0xff]   ;;  %s3884_s26 = sshll.u32 %s297_s23, 4  ;;  %s3870_s12 = scalar_lea.sflag [#allocation4], %s5410_s11  ;;  %s6968_s26 = int_to_ptr.vmem [resolvable:$true] %s3884_s26 }
  0x8f   : > { %869 = vmatprep.subr.bf16.mxu0 %v4633_v25  ;;  %v4734_v25 = vld [vmem:[#allocation5 + $0xe4] ss:$8 sps:$4 sm:$0xff]   ;;  %s5145_s10 = scalar_lea.vmem %s6968_s26, 512  ;;  %p7440_p13 = scmp.ne.s32.totalorder %s7198_s30, 0 }
  0x90   : > { %p5146_p12 = scmp.ne.s32.totalorder %s6968_s26, %s5145_s10  ;;  %s5229_s8 = smov [#allocation8]  }
  0x91   : > { %4049 = vmatmul.mubr.msk.bf16.gmra.mrb[8].mxu1 %vm827_vm1, %v5444_v36  ;;  %s5149_s25 = sshll.u32 %s5229_s8, 4  ;;  %s5150_s25 = int_to_ptr.vmem [resolvable:$false] %s5149_s25 }
  0x92   : > { %870 = vmatpush1.bf16.msra.mxu0 %v4635_v27  ;;  %1008 = vmatprep.mubr.bf16.mxu1 %v5227_v0  ;;  %v4732_v27 = vld [vmem:[#allocation5 + $0xe0] ss:$8 sps:$4 sm:$0xff]   ;;  %p5147_p0 = pnand %p5146_p12, %p7440_p13  ;;  %s5151_s9 = scalar_lea.vmem %s5150_s25, 1024 }
  0x93   : > { %871 = vmatprep.subr.bf16.mxu0 %v4636_v28  ;;  %v4737_v28 = vld [vmem:[#allocation5 + $0xf4] ss:$8 sps:$4 sm:$0xff]   ;;  %p5152_p8 = scmp.lt.s32.totalorder %s6968_s26, %s5150_s25  ;;  %p5153_p9 = scmp.lt.s32.totalorder %s5151_s9, %s5145_s10 }
  0x94   : > { %p5148_p7 = pneg %p5147_p0 }
  0x95   : > { %p5154_p10 = por %p5153_p9, %p5152_p8 }
  0x96   : > { %872 = vmatpush1.bf16.msra.mxu0 %v4638_v29  ;;  %v4735_v29 = vld [vmem:[#allocation5 + $0xf0] ss:$8 sps:$4 sm:$0xff]  }
  0x97   : > { %873 = vmatprep.subr.bf16.mxu0 %v4639_v30  ;;  %v4743_v30 = vld [vmem:[#allocation5 + $0x104] ss:$8 sps:$4 sm:$0xff]   ;;  %p5155_p1 = pnand %p5154_p10, %p5148_p7 }
  0x99   : > { %4050 = vmatmul.mubr.msk.bf16.gmra.mrb[12].mxu1 %vm827_vm1, %v5450_v41 }
  0x9a   : > { %874 = vmatpush1.bf16.msra.mxu0 %v4641_v32  ;;  %1018 = vmatprep.mubr.bf16.mxu1 %v5227_v0  ;;  %v4738_v32 = vld [vmem:[%s5414_s27] ss:$12 sps:$4 sm:$0xff]  }
  0x9b   : > { %875 = vmatprep.subr.bf16.mxu0 %v4642_v33  ;;  %v4741_v33 = vld [vmem:[#allocation5 + $0x100] ss:$8 sps:$4 sm:$0xff]  }
  0x9e   : > { %876 = vmatpush1.bf16.msra.mxu0 %v4644_v34  ;;  %v4746_v34 = vld [vmem:[#allocation5 + $0x114] ss:$8 sps:$4 sm:$0xff]  }
  0x9f   : > { %877 = vmatprep.subr.bf16.mxu0 %v4645_v35  ;;  %v4744_v35 = vld [vmem:[#allocation5 + $0x110] ss:$8 sps:$4 sm:$0xff]  }
  0xa1   : > { %4051 = vmatmul.mubr.msk.bf16.gmra.mrb[16].mxu1 %vm827_vm1, %v5459_v47 }
  0xa2   : > { %878 = vmatpush1.bf16.msra.mxu0 %v4647_v37  ;;  %1028 = vmatprep.mubr.bf16.mxu1 %v5227_v0  ;;  %v4747_v37 = vld [vmem:[#allocation5 + $0x124] ss:$8 sps:$4 sm:$0x3f]  }
  0xa3   : > { %879 = vmatprep.subr.bf16.mxu0 %v4648_v38  ;;  %v4749_v38 = vld [vmem:[#allocation5 + $0x120] ss:$8 sps:$4 sm:$0x3f]  }
  0xa6   : > { %880 = vmatpush1.bf16.msra.mxu0 %v4652_v39  ;;  %v1246_v39 = vsel %vm846_vm0, %v4749_v38, 0  ;;  %v4796_v38 = vld [vmem:[#allocation5 + $0x350] ss:$8 sps:$4 sm:$0xff]  }
  0xa7   : > { %881 = vmatprep.subr.bf16.mxu0 %v4654_v40  ;;  %v4752_v40 = vld [vmem:[#allocation5 + $0x264] ss:$8 sps:$4 sm:$0xff]  }
  0xa9   : > { %4052 = vmatmul.mubr.msk.bf16.gmra.mrb[20].mxu1 %vm827_vm1, %v4731_v53  ;;  %v4768_v53 = vld [vmem:[#allocation5 + $0x2b4] ss:$8 sps:$4 sm:$0xff]  }
  0xaa   : > { %882 = vmatpush1.bf16.msra.mxu0 %v4658_v42  ;;  %v4750_v42 = vld [vmem:[#allocation5 + $0x260] ss:$8 sps:$4 sm:$0xff]  }
  0xab   : > { %883 = vmatprep.subr.bf16.mxu0 %v4660_v43  ;;  %v4756_v43 = vld [vmem:[#allocation5 + $0x274] ss:$8 sps:$4 sm:$0xff]  }
  0xae   : > { %884 = vmatpush1.bf16.msra.mxu0 %v4664_v44  ;;  %v4754_v44 = vld [vmem:[#allocation5 + $0x270] ss:$8 sps:$4 sm:$0xff]  }
  0xaf   : > { %1251 = vmatprep.subr.bf16.mxu0 %v4672_v45  ;;  %v4759_v45 = vld [vmem:[#allocation5 + $0x284] ss:$8 sps:$4 sm:$0xff]  }
  0xb1   : > { %886 = vmatmul.mubr.bf16.vlgmr.msra.gmra.mrb[0].mxu0 %v5456_v46 }
  0xb2   : > { %1252 = vmatpush1.bf16.msra.mxu0 %v4670_v48  ;;  %895 = vmatprep.mubr.bf16.mxu0 %v5462_v49  ;;  %v4762_v48 = vld [vmem:[#allocation5 + $0x294] ss:$8 sps:$4 sm:$0xff]  }
  0xb3   : > { %1253 = vmatprep.subr.bf16.mxu0 %v4675_v50  ;;  %v4760_v50 = vld [vmem:[#allocation5 + $0x290] ss:$8 sps:$4 sm:$0xff]  }
  0xb6   : > { %1254 = vmatpush1.bf16.msra.mxu0 %v4673_v51  ;;  %v4765_v51 = vld [vmem:[#allocation5 + $0x2a4] ss:$8 sps:$4 sm:$0xff]  }
  0xb7   : > { %1255 = vmatprep.subr.bf16.mxu0 %v4678_v52  ;;  %v4763_v52 = vld [vmem:[#allocation5 + $0x2a0] ss:$8 sps:$4 sm:$0xff]  }
  0xb9   : > { %896 = vmatmul.mubr.bf16.gmra.mrb[4].mxu0 %v5471_v55 }
  0xba   : > { %1256 = vmatpush1.bf16.msra.mxu0 %v4676_v54  ;;  %905 = vmatprep.mubr.bf16.mxu0 %v5474_v56  ;;  %v4766_v54 = vld [vmem:[#allocation5 + $0x2b0] ss:$8 sps:$4 sm:$0xff]  }
  0xbb   : > { %1257 = vmatprep.subr.bf16.mxu0 %v4681_v57  ;;  %v4771_v57 = vld [vmem:[#allocation5 + $0x2c4] ss:$8 sps:$4 sm:$0xff]  }
  0xbe   : > { %1258 = vmatpush1.bf16.msra.mxu0 %v4679_v58  ;;  %v4774_v58 = vld [vmem:[#allocation5 + $0x2d4] ss:$8 sps:$4 sm:$0xff]  }
  0xbf   : > { %1259 = vmatprep.subr.bf16.mxu0 %v4684_v59  ;;  %v4812_v59 = vld [vmem:[#allocation7 + $0x4] ss:$8 sps:$4 sm:$0xff]  }
  0xc0   : > { %2344 = vmatprep.subr.bf16.mxu1 %v4812_v59  ;;  %v4874_v59 = vld [vmem:[#allocation7 + $0xd4] ss:$8 sps:$4 sm:$0xff]  }
  0xc1   : > { %906 = vmatmul.mubr.bf16.gmra.mrb[8].mxu0 %v5480_v61 }
  0xc2   : > { %1260 = vmatpush1.bf16.msra.mxu0 %v4682_v60  ;;  %915 = vmatprep.mubr.bf16.mxu0 %v5483_v63  ;;  %v4814_v60 = vld [vmem:[#allocation7] ss:$8 sps:$4 sm:$0xff]  }
  0xc3   : > { %1261 = vmatprep.subr.bf16.mxu0 %v4689_v62  ;;  %v4815_v62 = vld [vmem:[#allocation7 + $0x14] ss:$8 sps:$4 sm:$0xff]   ;;  %2345 = vmatpush1.bf16.msra.mxu1 %v4814_v60 }
  0xc4   : > { %2346 = vmatprep.subr.bf16.mxu1 %v4815_v62 }
  0xc6   : > { %1262 = vmatpush1.bf16.msra.mxu0 %v4687_v1  ;;  %v4772_v1 = vld [vmem:[#allocation5 + $0x2d0] ss:$8 sps:$4 sm:$0xff]  }
  0xc7   : > { %1263 = vmatprep.subr.bf16.mxu0 %v4694_v2  ;;  %v4817_v2 = vld [vmem:[#allocation7 + $0x10] ss:$8 sps:$4 sm:$0xff]  }
  0xc8   : > { %2347 = vmatpush1.bf16.msra.mxu1 %v4817_v2  ;;  %v4880_v2 = vld [vmem:[#allocation7 + $0xe4] ss:$8 sps:$4 sm:$0xff]  }
  0xc9   : > { %916 = vmatmul.mubr.bf16.gmra.mrb[12].mxu0 %v5488_v3 }
  0xca   : > { %1264 = vmatpush1.bf16.msra.mxu0 %v4692_v4  ;;  %925 = vmatprep.mubr.bf16.mxu0 %v5491_v6  ;;  %v4818_v4 = vld [vmem:[#allocation7 + $0x24] ss:$8 sps:$4 sm:$0xff]  }
  0xcb   : > { %1265 = vmatprep.subr.bf16.mxu0 %v4699_v5  ;;  %v4775_v5 = vld [vmem:[#allocation5 + $0x2e0] ss:$8 sps:$4 sm:$0xff]   ;;  %2348 = vmatprep.subr.bf16.mxu1 %v4818_v4 }
  0xce   : > { %1266 = vmatpush1.bf16.msra.mxu0 %v4697_v7  ;;  %v4780_v7 = vld [vmem:[#allocation5 + $0x2f4] ss:$8 sps:$4 sm:$0xff]  }
  0xcf   : > { %1267 = vmatprep.subr.bf16.mxu0 %v4704_v8  ;;  %v4821_v8 = vld [vmem:[#allocation7 + $0x34] ss:$8 sps:$4 sm:$0xff]  }
  0xd1   : > { %926 = vmatmul.mubr.bf16.gmra.mrb[16].mxu0 %v5496_v9 }
  0xd2   : > { %1268 = vmatpush1.bf16.msra.mxu0 %v4702_v10  ;;  %935 = vmatprep.mubr.bf16.mxu0 %v5499_v12  ;;  %v4778_v10 = vld [vmem:[#allocation5 + $0x2f0] ss:$8 sps:$4 sm:$0xff]  }
  0xd3   : > { %1269 = vmatprep.subr.bf16.mxu0 %v4709_v11  ;;  %v4783_v11 = vld [vmem:[#allocation5 + $0x304] ss:$8 sps:$4 sm:$0xff]  }
  0xd6   : > { %1270 = vmatpush1.bf16.msra.mxu0 %v4707_v13  ;;  %v4823_v13 = vld [vmem:[#allocation7 + $0x30] ss:$8 sps:$4 sm:$0xff]  }
  0xd7   : > { %1271 = vmatprep.subr.bf16.mxu0 %v4714_v14  ;;  %v4824_v14 = vld [vmem:[#allocation7 + $0x44] ss:$8 sps:$4 sm:$0xff]  }
  0xd9   : > { %936 = vmatmul.mubr.bf16.gmra.mrb[20].mxu0 %v5504_v15 }
  0xda   : > { %1272 = vmatpush1.bf16.msra.mxu0 %v4712_v16  ;;  %1283 = vmatprep.mubr.bf16.mxu0 %v4740_v18  ;;  %v4781_v16 = vld [vmem:[#allocation5 + $0x300] ss:$8 sps:$4 sm:$0xff]   ;;  %v4826_v18 = vld [vmem:[#allocation7 + $0x40] ss:$8 sps:$4 sm:$0xff]  }
  0xdb   : > { %1273 = vmatprep.subr.bf16.mxu0 %v4719_v17  ;;  %v4786_v17 = vld [vmem:[#allocation5 + $0x314] ss:$8 sps:$4 sm:$0xff]  }
  0xde   : > { %1274 = vmatpush1.bf16.msra.mxu0 %v4717_v19  ;;  %v4784_v19 = vld [vmem:[#allocation5 + $0x310] ss:$8 sps:$4 sm:$0xff]  }
  0xdf   : > { %1275 = vmatprep.subr.bf16.mxu0 %v4724_v20  ;;  %v4789_v20 = vld [vmem:[#allocation5 + $0x324] ss:$8 sps:$4 sm:$0xff]  }
  0xe2   : > { %1276 = vmatpush1.bf16.msra.mxu0 %v4722_v21  ;;  %v7032_v21 = vmov 0.0|0.0  }
  0xe3   : > { %1277 = vmatprep.subr.bf16.mxu0 %v4729_v23  ;;  %2376 = vmatprep.mubr.bf16.mxu1 %v7032_v21  ;;  %v4829_v23 = vld [vmem:[#allocation7 + $0x50] ss:$8 sps:$4 sm:$0xff]  }
  0xe6   : > { %1278 = vmatpush1.bf16.msra.mxu0 %v4727_v24  ;;  %v4832_v24 = vld [vmem:[#allocation7 + $0x64] ss:$8 sps:$4 sm:$0xff]  }
  0xe7   : > { %1279 = vmatprep.subr.bf16.mxu0 %v4734_v25  ;;  %v4787_v25 = vld [vmem:[#allocation5 + $0x320] ss:$8 sps:$4 sm:$0xff]  }
  0xea   : > { %1280 = vmatpush1.bf16.msra.mxu0 %v4732_v27  ;;  %v4792_v27 = vld [vmem:[#allocation5 + $0x334] ss:$8 sps:$4 sm:$0xff]  }
  0xeb   : > { %1281 = vmatprep.subr.bf16.mxu0 %v4737_v28  ;;  %v4838_v28 = vld [vmem:[#allocation7 + $0x74] ss:$8 sps:$4 sm:$0xff]  }
  0xee   : > { %1282 = vmatpush1.bf16.msra.mxu0 %v4735_v29  ;;  %v4790_v29 = vld [vmem:[#allocation5 + $0x330] ss:$8 sps:$4 sm:$0xff]  }
  0xef   : > { %1344 = vmatprep.subr.bf16.mxu0 %v4743_v30  ;;  %v4841_v30 = vld [vmem:[#allocation7 + $0x70] ss:$8 sps:$4 sm:$0xff]  }
  0xf1   : > { %1284 = vmatmul.mubr.bf16.vlgmr.msra.gmra.mrb[24].mxu0 %v4738_v32  ;;  %v4844_v32 = vld [vmem:[#allocation7 + $0x84] ss:$8 sps:$4 sm:$0xff]  }
  0xf2   : > { %1345 = vmatpush1.bf16.msra.mxu0 %v4741_v33  ;;  %1293 = vmatprep.mubr.bf16.mxu0 %v5426_v22  ;;  %v4753_v22 = vld [vmem:[%s5414_s27 + $0x8] ss:$12 sps:$4 sm:$0xff]  }
  0xf3   : > { %1346 = vmatprep.subr.bf16.mxu0 %v4746_v34  ;;  %v4793_v33 = vld [vmem:[#allocation5 + $0x340] ss:$8 sps:$4 sm:$0xff]   ;;  %v4798_v34 = vld [vmem:[#allocation5 + $0x354] ss:$8 sps:$4 sm:$0xff]  }
  0xf6   : > { %1347 = vmatpush1.bf16.msra.mxu0 %v4744_v35  ;;  %v4847_v35 = vld [vmem:[#allocation7 + $0x80] ss:$8 sps:$4 sm:$0xff]  }
  0xf7   : > { %4094 = vmatprep.subr.msk.bf16.mxu0 %vm846_vm0, %v4747_v37  ;;  %v4850_v37 = vld [vmem:[#allocation7 + $0x94] ss:$8 sps:$4 sm:$0xff]  }
  0xf9   : > { %1294 = vmatmul.mubr.bf16.gmra.mrb[28].mxu0 %v5456_v46  ;;  %v4757_v46 = vld [vmem:[#allocation5 + $0x280] ss:$8 sps:$4 sm:$0xff]  }
  0xfa   : > { %1303 = vmatprep.mubr.bf16.mxu0 %v5462_v49  ;;  %1349 = vmatpush1.bf16.msra.mxu0 %v1246_v39  ;;  %v4801_v39 = vld [vmem:[#allocation5 + $0x364] ss:$8 sps:$4 sm:$0xff]  }
  0xfb   : > { %1649 = vmatprep.subr.bf16.mxu0 %v4752_v40  ;;  %v4853_v40 = vld [vmem:[#allocation7 + $0x90] ss:$8 sps:$4 sm:$0xff]  }
 0x101   : > { %1304 = vmatmul.mubr.bf16.gmra.mrb[32].mxu0 %v5471_v55 }
 0x102   : > { %1313 = vmatprep.mubr.bf16.mxu0 %v5474_v56 }
 0x109   : > { %1314 = vmatmul.mubr.bf16.gmra.mrb[36].mxu0 %v5480_v61 }
 0x10a   : > { %1323 = vmatprep.mubr.bf16.mxu0 %v5483_v63 }
 0x111   : > { %1324 = vmatmul.mubr.bf16.gmra.mrb[40].mxu0 %v5488_v3 }
 0x112   : > { %1333 = vmatprep.mubr.bf16.mxu0 %v5491_v6 }
 0x119   : > { %1334 = vmatmul.mubr.bf16.gmra.mrb[44].mxu0 %v5496_v9 }
 0x11a   : > { %1376 = vmatprep.mubr.bf16.mxu0 %v5227_v0 }
 0x121   : > { %4095 = vmatmul.mubr.msk.bf16.vlgmr.msra.gmra.mrb[24].mxu0 %vm827_vm1, %v4753_v22  ;;  %v4856_v22 = vld [vmem:[#allocation7 + $0xa4] ss:$8 sps:$4 sm:$0xff]  }
 0x122   : > { %1650 = vmatpush1.bf16.msra.mxu0 %v4750_v42  ;;  %1386 = vmatprep.mubr.bf16.mxu0 %v5227_v0  ;;  %v4799_v42 = vld [vmem:[#allocation5 + $0x360] ss:$8 sps:$4 sm:$0xff]  }
 0x123   : > { %1651 = vmatprep.subr.bf16.mxu0 %v4756_v43  ;;  %v4804_v43 = vld [vmem:[#allocation5 + $0x374] ss:$8 sps:$4 sm:$0xff]  }
 0x126   : > { %1652 = vmatpush1.bf16.msra.mxu0 %v4754_v44  ;;  %v4859_v44 = vld [vmem:[#allocation7 + $0xa0] ss:$8 sps:$4 sm:$0xff]  }
 0x127   : > { %1653 = vmatprep.subr.bf16.mxu0 %v4759_v45  ;;  %v4862_v45 = vld [vmem:[#allocation7 + $0xb4] ss:$8 sps:$4 sm:$0xff]  }
 0x129   : > { %4096 = vmatmul.mubr.msk.bf16.gmra.mrb[28].mxu0 %vm827_vm1, %v5432_v26  ;;  %v4769_v26 = vld [vmem:[#allocation5 + $0x2c0] ss:$8 sps:$4 sm:$0xff]  }
 0x12a   : > { %1654 = vmatpush1.bf16.msra.mxu0 %v4757_v46  ;;  %1396 = vmatprep.mubr.bf16.mxu0 %v5227_v0  ;;  %v4802_v46 = vld [vmem:[#allocation5 + $0x370] ss:$8 sps:$4 sm:$0xff]  }
 0x12b   : > { %1655 = vmatprep.subr.bf16.mxu0 %v4762_v48  ;;  %v4805_v48 = vld [vmem:[#allocation5 + $0x384] ss:$8 sps:$4 sm:$0x3f]  }
 0x12e   : > { %1656 = vmatpush1.bf16.msra.mxu0 %v4760_v50  ;;  %v4807_v50 = vld [vmem:[#allocation5 + $0x380] ss:$8 sps:$4 sm:$0x3f]  }
 0x12f   : > { %1657 = vmatprep.subr.bf16.mxu0 %v4765_v51 }
 0x131   : > { %4097 = vmatmul.mubr.msk.bf16.gmra.mrb[32].mxu0 %vm827_vm1, %v5438_v31  ;;  %v4777_v31 = vld [vmem:[#allocation5 + $0x2e4] ss:$8 sps:$4 sm:$0xff]  }
 0x132   : > { %1658 = vmatpush1.bf16.msra.mxu0 %v4763_v52  ;;  %1406 = vmatprep.mubr.bf16.mxu0 %v5227_v0 }
 0x133   : > { %1659 = vmatprep.subr.bf16.mxu0 %v4768_v53  ;;  %v4865_v53 = vld [vmem:[#allocation7 + $0xb0] ss:$8 sps:$4 sm:$0xff]  }
 0x136   : > { %1660 = vmatpush1.bf16.msra.mxu0 %v4766_v54 }
 0x137   : > { %1661 = vmatprep.subr.bf16.mxu0 %v4771_v57  ;;  %v4868_v57 = vld [vmem:[#allocation7 + $0xc4] ss:$8 sps:$4 sm:$0xff]  }
 0x139   : > { %4098 = vmatmul.mubr.msk.bf16.gmra.mrb[36].mxu0 %vm827_vm1, %v5444_v36  ;;  %v4820_v36 = vld [vmem:[#allocation7 + $0x20] ss:$8 sps:$4 sm:$0xff]  }
 0x13a   : > { %1662 = vmatpush1.bf16.msra.mxu0 %v4769_v26  ;;  %1416 = vmatprep.mubr.bf16.mxu0 %v5227_v0  ;;  %v5553_v26 = vld [vmem:[#allocation7 + $0x104] ss:$8 sps:$4 sm:$0xff]  }
 0x13b   : > { %1663 = vmatprep.subr.bf16.mxu0 %v4774_v58  ;;  %2349 = vmatpush1.bf16.msra.mxu1 %v4820_v36  ;;  %v4871_v58 = vld [vmem:[#allocation7 + $0xc0] ss:$8 sps:$4 sm:$0xff]   ;;  %v4889_v36 = vld [vmem:[#allocation7 + $0xf0] ss:$8 sps:$4 sm:$0xff]  }
 0x13c   : > { %2350 = vmatprep.subr.bf16.mxu1 %v4821_v8 }
 0x13e   : > { %1664 = vmatpush1.bf16.msra.mxu0 %v4772_v1  ;;  %v4877_v1 = vld [vmem:[#allocation7 + $0xd0] ss:$8 sps:$4 sm:$0xff]  }
 0x13f   : > { %1665 = vmatprep.subr.bf16.mxu0 %v4777_v31  ;;  %2351 = vmatpush1.bf16.msra.mxu1 %v4823_v13  ;;  %v4895_v13 = vld [vmem:[#allocation7 + $0x200] ss:$8 sps:$4 sm:$0xff]  }
 0x140   : > { %2352 = vmatprep.subr.bf16.mxu1 %v4824_v14 }
 0x141   : > { %4099 = vmatmul.mubr.msk.bf16.gmra.mrb[40].mxu0 %vm827_vm1, %v5450_v41  ;;  %v4827_v41 = vld [vmem:[#allocation7 + $0x54] ss:$8 sps:$4 sm:$0xff]  }
 0x142   : > { %1666 = vmatpush1.bf16.msra.mxu0 %v4775_v5  ;;  %1426 = vmatprep.mubr.bf16.mxu0 %v5227_v0 }
 0x143   : > { %1667 = vmatprep.subr.bf16.mxu0 %v4780_v7  ;;  %2353 = vmatpush1.bf16.msra.mxu1 %v4826_v18  ;;  %v4904_v18 = vld [vmem:[#allocation7 + $0x224] ss:$8 sps:$4 sm:$0xff]  }
 0x144   : > { %2354 = vmatprep.subr.bf16.mxu1 %v4827_v41  ;;  %v4808_v41 = vld [vmem:[%s5414_s27 + $0xac] ss:$12 sps:$4 sm:$0xff]  }
 0x146   : > { %1668 = vmatpush1.bf16.msra.mxu0 %v4778_v10  ;;  %v4892_v10 = vld [vmem:[#allocation7 + $0x204] ss:$8 sps:$4 sm:$0xff]  }
 0x147   : > { %1669 = vmatprep.subr.bf16.mxu0 %v4783_v11  ;;  %2355 = vmatpush1.bf16.msra.mxu1 %v4829_v23 }
 0x148   : > { %2356 = vmatprep.subr.bf16.mxu1 %v4832_v24 }
 0x149   : > { %4100 = vmatmul.mubr.msk.bf16.gmra.mrb[44].mxu0 %vm827_vm1, %v5459_v47  ;;  %v4835_v47 = vld [vmem:[#allocation7 + $0x60] ss:$8 sps:$4 sm:$0xff]  }
 0x14a   : > { %1670 = vmatpush1.bf16.msra.mxu0 %v4781_v16  ;;  %1681 = vmatprep.mubr.bf16.mxu0 %v5462_v49  ;;  %v4795_v49 = vld [vmem:[#allocation5 + $0x344] ss:$8 sps:$4 sm:$0xff]   ;;  %v4901_v16 = vld [vmem:[#allocation7 + $0x210] ss:$8 sps:$4 sm:$0xff]  }
 0x14b   : > { %1671 = vmatprep.subr.bf16.mxu0 %v4786_v17  ;;  %2357 = vmatpush1.bf16.msra.mxu1 %v4835_v47 }
 0x14c   : > { %2358 = vmatprep.subr.bf16.mxu1 %v4838_v28 }
 0x14e   : > { %1672 = vmatpush1.bf16.msra.mxu0 %v4784_v19 }
 0x14f   : > { %1673 = vmatprep.subr.bf16.mxu0 %v4789_v20  ;;  %2359 = vmatpush1.bf16.msra.mxu1 %v4841_v30 }
 0x150   : > { %2360 = vmatprep.subr.bf16.mxu1 %v4844_v32 }
 0x152   : > { %1674 = vmatpush1.bf16.msra.mxu0 %v4787_v25 }
 0x153   : > { %1675 = vmatprep.subr.bf16.mxu0 %v4792_v27  ;;  %2361 = vmatpush1.bf16.msra.mxu1 %v4847_v35  ;;  %v4810_v27 = vld [vmem:[%s5414_s27 + $0xa8] ss:$12 sps:$4 sm:$0xff]  }
 0x154   : > { %2362 = vmatprep.subr.bf16.mxu1 %v4850_v37  ;;  %v5543_v51 = vpop.f32.mrb[0].mxu1 }
 0x155   : > { %v5545_v52 = vpop.f32.mrb[1].mxu1 }
 0x156   : > { %1676 = vmatpush1.bf16.msra.mxu0 %v4790_v29  ;;  %v5547_v54 = vpop.f32.mrb[2].mxu1 }
 0x157   : > { %1677 = vmatprep.subr.bf16.mxu0 %v4795_v49  ;;  %2363 = vmatpush1.bf16.msra.mxu1 %v4853_v40 }
 0x158   : > { %2364 = vmatprep.subr.bf16.mxu1 %v4856_v22 }
 0x15a   : > { %1678 = vmatpush1.bf16.msra.mxu0 %v4793_v33 }
 0x15b   : > { %1679 = vmatprep.subr.bf16.mxu0 %v4798_v34  ;;  %2365 = vmatpush1.bf16.msra.mxu1 %v4859_v44 }
 0x15c   : > { %2366 = vmatprep.subr.bf16.mxu1 %v4862_v45 }
 0x15e   : > { %1680 = vmatpush1.bf16.msra.mxu0 %v4796_v38 }
 0x15f   : > { %1742 = vmatprep.subr.bf16.mxu0 %v4801_v39  ;;  %2367 = vmatpush1.bf16.msra.mxu1 %v4865_v53 }
 0x160   : > { %2368 = vmatprep.subr.bf16.mxu1 %v4868_v57 }
 0x161   : > { %1682 = vmatmul.mubr.bf16.vlgmr.msra.gmra.mrb[24].mxu0 %v5471_v55  ;;  %v5549_v55 = vpop.f32.mrb[3].mxu1 }
 0x162   : > { %1743 = vmatpush1.bf16.msra.mxu0 %v4799_v42  ;;  %1691 = vmatprep.mubr.bf16.mxu0 %v5474_v56  ;;  %v1644_v56 = vsel %vm846_vm0, %v4807_v50, 0  ;;  %v5557_v60 = vpop.f32.mrb[4].mxu1  ;;  %v4956_v50 = vld [vmem:[%s5414_s27 + $0x38] ss:$12 sps:$4 sm:$0xff]  }
 0x163   : > { %1744 = vmatprep.subr.bf16.mxu0 %v4804_v43  ;;  %v5560_v62 = vpop.f32.mrb[5].mxu1  ;;  %2369 = vmatpush1.bf16.msra.mxu1 %v4871_v58  ;;  %v5625_v43 = vld [vmem:[#allocation7 + $0x100] ss:$8 sps:$4 sm:$0xff]  }
 0x164   : > { %v5562_v31 = vpop.f32.mrb[6].mxu1  ;;  %2370 = vmatprep.subr.bf16.mxu1 %v4874_v59  ;;  %v5651_v58 = vld [vmem:[#allocation7 + $0x120] ss:$8 sps:$4 sm:$0xff]  }
 0x165   : > { %v5564_v4 = vpop.f32.mrb[7].mxu1 }
 0x166   : > { %1745 = vmatpush1.bf16.msra.mxu0 %v4802_v46  ;;  %v5568_v5 = vpop.f32.mrb[8].mxu1  ;;  %v5630_v46 = vld [vmem:[#allocation7 + $0x114] ss:$8 sps:$4 sm:$0xff]  }
 0x167   : > { %4142 = vmatprep.subr.msk.bf16.mxu0 %vm846_vm0, %v4805_v48  ;;  %2371 = vmatpush1.bf16.msra.mxu1 %v4877_v1  ;;  %v5570_v7 = vpop.f32.mrb[9].mxu1 }
 0x168   : > { %2372 = vmatprep.subr.bf16.mxu1 %v4880_v2  ;;  %v5572_v8 = vpop.f32.mrb[10].mxu1  ;;  %v5666_v2 = vld [vmem:[#allocation7 + $0x130] ss:$8 sps:$4 sm:$0xff]  }
 0x169   : > { %1692 = vmatmul.mubr.bf16.gmra.mrb[28].mxu0 %v5480_v61  ;;  %v4883_v61 = vld [vmem:[#allocation7 + $0xe0] ss:$8 sps:$4 sm:$0xff]   ;;  %v5574_v11 = vpop.f32.mrb[11].mxu1 }
 0x16a   : > { %1701 = vmatprep.mubr.bf16.mxu0 %v5483_v63  ;;  %1747 = vmatpush1.bf16.msra.mxu0 %v1644_v56  ;;  %v4886_v63 = vld [vmem:[#allocation7 + $0xf4] ss:$8 sps:$4 sm:$0xff]  }
 0x16b   : > { %2091 = vmatprep.subr.bf16.mxu0 %v5553_v26  ;;  %2373 = vmatpush1.bf16.msra.mxu1 %v4883_v61 }
 0x16c   : > { %2374 = vmatprep.subr.bf16.mxu1 %v4886_v63 }
 0x16f   : > { %2375 = vmatpush1.bf16.msra.mxu1 %v4889_v36 }
 0x170   : > { %2597 = vmatprep.subr.bf16.mxu1 %v4892_v10 }
 0x171   : > { %1702 = vmatmul.mubr.bf16.gmra.mrb[32].mxu0 %v5488_v3  ;;  %v4898_v3 = vld [vmem:[#allocation7 + $0x214] ss:$8 sps:$4 sm:$0xff]  }
 0x172   : > { %1711 = vmatprep.mubr.bf16.mxu0 %v5491_v6  ;;  %v5578_v6 = vpop.f32.mrb[12].mxu1  ;;  %2377 = vmatmul.mubr.bf16.vlgmr.msra.gmra.mrb[24].mxu1 %v7032_v21  ;;  %v5810_v21 = vld [vmem:[#allocation7 + $0x260] ss:$8 sps:$4 sm:$0xff]  }
 0x173   : > { %v5581_v14 = vpop.f32.mrb[13].mxu1  ;;  %2598 = vmatpush1.bf16.msra.mxu1 %v4895_v13  ;;  %v5684_v13 = vld [vmem:[#allocation7 + $0x154] ss:$8 sps:$4 sm:$0xff]   ;;  %7223 = vst [vmem:[#allocation32_spill] sm:$0xff] %v5810_v21 }
 0x174   : > { %v5583_v17 = vpop.f32.mrb[14].mxu1  ;;  %2599 = vmatprep.subr.bf16.mxu1 %v4898_v3 }
 0x175   : > { %v5586_v19 = vpop.f32.mrb[15].mxu1 }
 0x177   : > { %2600 = vmatpush1.bf16.msra.mxu1 %v4901_v16  ;;  %v5696_v16 = vld [vmem:[#allocation7 + $0x164] ss:$8 sps:$4 sm:$0xff]  }
 0x178   : > { %2601 = vmatprep.subr.bf16.mxu1 %v4904_v18 }
 0x179   : > { %1712 = vmatmul.mubr.bf16.gmra.mrb[36].mxu0 %v5496_v9  ;;  %v4907_v9 = vld [vmem:[#allocation7 + $0x220] ss:$8 sps:$4 sm:$0xff]  }
 0x17a   : > { %1721 = vmatprep.mubr.bf16.mxu0 %v5499_v12  ;;  %v5589_v12 = vpop.f32.mrb[16].mxu1 }
 0x17b   : > { %v5591_v23 = vpop.f32.mrb[17].mxu1  ;;  %2602 = vmatpush1.bf16.msra.mxu1 %v4907_v9 }
 0x17c   : > { %v5597_v47 = vpop.f32.mrb[18].mxu1 }
 0x181   : > { %1722 = vmatmul.mubr.bf16.gmra.mrb[40].mxu0 %v5504_v15  ;;  %v5602_v15 = vpop.f32.mrb[19].mxu1 }
 0x182   : > { %1731 = vmatprep.mubr.bf16.mxu0 %v4808_v41  ;;  %v5611_v33 = vpop.f32.mrb[20].mxu1 }
 0x183   : > { %v5613_v35 = vpop.f32.mrb[21].mxu1 }
 0x184   : > { %v887_v20 = vpop.f32.mrb[0].mxu0  ;;  %v5618_v39 = vpop.f32.mrb[22].mxu1 }
 0x185   : > { %v5594_v24 = vadd.f32 %v5543_v51, %v887_v20  ;;  %v889_v25 = vpop.f32.mrb[1].mxu0  ;;  %v5623_v42 = vpop.f32.mrb[23].mxu1  ;;  %v5639_v51 = vld [vmem:[#allocation7 + $0x110] ss:$8 sps:$4 sm:$0xff]   ;;  %v5705_v20 = vld [vmem:[#allocation7 + $0x160] ss:$8 sps:$4 sm:$0xff]  }
 0x186   : > { %v5600_v28 = vadd.f32 %v5545_v52, %v889_v25  ;;  %v891_v29 = vpop.f32.mrb[2].mxu0  ;;  %v5642_v52 = vld [vmem:[#allocation7 + $0x124] ss:$8 sps:$4 sm:$0xff]  }
 0x187   : > { %v5605_v49 = vadd.f32 %v5547_v54, %v891_v29  ;;  %v893_v30 = vpop.f32.mrb[3].mxu0  ;;  %v5711_v29 = vld [vmem:[#allocation7 + $0x174] ss:$8 sps:$4 sm:$0xff]  }
 0x188   : > { %v5608_v32 = vadd.f32 %v5549_v55, %v893_v30  ;;  %v4959_v30 = vld [vmem:[%s5414_s27 + $0x80] ss:$12 sps:$4 sm:$0xff]  }
 0x189   : > { %1732 = vmatmul.mubr.bf16.gmra.mrb[44].mxu0 %v4810_v27 }
 0x18a   : > { %1774 = vmatprep.mubr.bf16.mxu0 %v5227_v0 }
 0x18c   : > { %v897_v34 = vpop.f32.mrb[4].mxu0 }
 0x18d   : > { %v5616_v37 = vadd.f32 %v5557_v60, %v897_v34  ;;  %v899_v38 = vpop.f32.mrb[5].mxu0 }
 0x18e   : > { %v5621_v40 = vadd.f32 %v5560_v62, %v899_v38  ;;  %v901_v22 = vpop.f32.mrb[6].mxu0  ;;  %v5657_v62 = vld [vmem:[#allocation7 + $0x134] ss:$8 sps:$4 sm:$0xff]  }
 0x18f   : > { %v5628_v44 = vadd.f32 %v5562_v31, %v901_v22  ;;  %v903_v45 = vpop.f32.mrb[7].mxu0  ;;  %v4957_v31 = vld [vmem:[%s5414_s27 + $0x50] ss:$12 sps:$4 sm:$0xff]  }
 0x190   : > { %v5633_v48 = vadd.f32 %v5564_v4, %v903_v45  ;;  %v5669_v4 = vld [vmem:[#allocation7 + $0x144] ss:$8 sps:$4 sm:$0xff]  }
 0x191   : > { %4143 = vmatmul.mubr.msk.bf16.vlgmr.msra.gmra.mrb[24].mxu0 %vm827_vm1, %v4956_v50  ;;  %v5732_v50 = vld [vmem:[#allocation7 + $0x180] ss:$8 sps:$4 sm:$0xff]  }
 0x192   : > { %1784 = vmatprep.mubr.bf16.mxu0 %v5227_v0  ;;  %2092 = vmatpush1.bf16.msra.mxu0 %v5625_v43 }
 0x193   : > { %2093 = vmatprep.subr.bf16.mxu0 %v5630_v46 }
 0x194   : > { %v907_v53 = vpop.f32.mrb[8].mxu0 }
 0x195   : > { %v5645_v54 = vadd.f32 %v5568_v5, %v907_v53  ;;  %v909_v57 = vpop.f32.mrb[9].mxu0 }
 0x196   : > { %v5648_v55 = vadd.f32 %v5570_v7, %v909_v57  ;;  %v911_v56 = vpop.f32.mrb[10].mxu0  ;;  %2094 = vmatpush1.bf16.msra.mxu0 %v5639_v51 }
 0x197   : > { %v5654_v59 = vadd.f32 %v5572_v8, %v911_v56  ;;  %v913_v60 = vpop.f32.mrb[11].mxu0  ;;  %2095 = vmatprep.subr.bf16.mxu0 %v5642_v52  ;;  %v5678_v8 = vld [vmem:[#allocation7 + $0x140] ss:$8 sps:$4 sm:$0xff]   ;;  %v5738_v56 = vld [vmem:[#allocation7 + $0x194] ss:$8 sps:$4 sm:$0xff]  }
 0x198   : > { %v5660_v1 = vadd.f32 %v5574_v11, %v913_v60  ;;  %v4960_v60 = vld [vmem:[%s5414_s27 + $0x98] ss:$12 sps:$4 sm:$0xff]  }
 0x199   : > { %4144 = vmatmul.mubr.msk.bf16.gmra.mrb[28].mxu0 %vm827_vm1, %v4957_v31  ;;  %v4811_v31 = vld [vmem:[%s5414_s27 + $0xb0] ss:$12 sps:$4 sm:$0xff]  }
 0x19a   : > { %1794 = vmatprep.mubr.bf16.mxu0 %v5227_v0  ;;  %2096 = vmatpush1.bf16.msra.mxu0 %v5651_v58 }
 0x19b   : > { %2097 = vmatprep.subr.bf16.mxu0 %v5657_v62 }
 0x19c   : > { %v917_v61 = vpop.f32.mrb[12].mxu0 }
 0x19d   : > { %v5672_v63 = vadd.f32 %v5578_v6, %v917_v61  ;;  %v919_v5 = vpop.f32.mrb[13].mxu0  ;;  %v4958_v6 = vld [vmem:[%s5414_s27 + $0x68] ss:$12 sps:$4 sm:$0xff]   ;;  %v5754_v61 = vld [vmem:[#allocation7 + $0x1a0] ss:$8 sps:$4 sm:$0xff]  }
 0x19e   : > { %v5675_v7 = vadd.f32 %v5581_v14, %v919_v5  ;;  %v921_v36 = vpop.f32.mrb[14].mxu0  ;;  %2098 = vmatpush1.bf16.msra.mxu0 %v5666_v2  ;;  %v5693_v14 = vld [vmem:[#allocation7 + $0x150] ss:$8 sps:$4 sm:$0xff]   ;;  %v5764_v5 = vld [vmem:[#allocation7 + $0x1c4] ss:$8 sps:$4 sm:$0xff]  }
 0x19f   : > { %v5681_v10 = vadd.f32 %v5583_v17, %v921_v36  ;;  %v923_v11 = vpop.f32.mrb[15].mxu0  ;;  %2099 = vmatprep.subr.bf16.mxu0 %v5669_v4  ;;  %7208 = vst [vmem:[#allocation17_spill] sm:$0xff] %v5764_v5  ;;  %v5767_v36 = vld [vmem:[#allocation7 + $0x1c0] ss:$8 sps:$4 sm:$0xff]  }
 0x1a0   : > { %v5687_v3 = vadd.f32 %v5586_v19, %v923_v11  ;;  %7209 = vst [vmem:[#allocation18_spill] sm:$0xff] %v5767_v36  ;;  %v5771_v11 = vld [vmem:[#allocation7 + $0x1d4] ss:$8 sps:$4 sm:$0xff]  }
 0x1a1   : > { %4145 = vmatmul.mubr.msk.bf16.gmra.mrb[32].mxu0 %vm827_vm1, %v4958_v6  ;;  %7210 = vst [vmem:[#allocation19_spill] sm:$0xff] %v5771_v11  ;;  %v5773_v6 = vld [vmem:[#allocation7 + $0x234] ss:$8 sps:$4 sm:$0xff]  }
 0x1a2   : > { %1804 = vmatprep.mubr.bf16.mxu0 %v5227_v0  ;;  %2100 = vmatpush1.bf16.msra.mxu0 %v5678_v8  ;;  %7211 = vst [vmem:[#allocation20_spill] sm:$0xff] %v5773_v6 }
 0x1a3   : > { %2101 = vmatprep.subr.bf16.mxu0 %v5684_v13  ;;  %2603 = vmatprep.subr.bf16.mxu1 %v5773_v6 }
 0x1a4   : > { %v927_v17 = vpop.f32.mrb[16].mxu0 }
 0x1a5   : > { %v5699_v18 = vadd.f32 %v5589_v12, %v927_v17  ;;  %v929_v41 = vpop.f32.mrb[17].mxu0  ;;  %v5775_v17 = vld [vmem:[#allocation7 + $0x1d0] ss:$8 sps:$4 sm:$0xff]  }
 0x1a6   : > { %v5702_v19 = vadd.f32 %v5591_v23, %v929_v41  ;;  %v931_v9 = vpop.f32.mrb[18].mxu0  ;;  %2102 = vmatpush1.bf16.msra.mxu0 %v5693_v14  ;;  %v5720_v23 = vld [vmem:[#allocation7 + $0x170] ss:$8 sps:$4 sm:$0xff]   ;;  %7212 = vst [vmem:[#allocation21_spill] sm:$0xff] %v5775_v17 }
 0x1a7   : > { %v5708_v25 = vadd.f32 %v5597_v47, %v931_v9  ;;  %v933_v27 = vpop.f32.mrb[19].mxu0  ;;  %2103 = vmatprep.subr.bf16.mxu0 %v5696_v16  ;;  %v5723_v47 = vld [vmem:[#allocation7 + $0x184] ss:$8 sps:$4 sm:$0xff]   ;;  %v5777_v41 = vld [vmem:[#allocation7 + $0x230] ss:$8 sps:$4 sm:$0xff]  }
 0x1a8   : > { %v5714_v12 = vadd.f32 %v5602_v15, %v933_v27  ;;  %7213 = vst [vmem:[#allocation22_spill] sm:$0xff] %v5777_v41  ;;  %2604 = vmatpush1.bf16.msra.mxu1 %v5777_v41  ;;  %v5783_v9 = vld [vmem:[#allocation7 + $0x1e4] ss:$8 sps:$4 sm:$0xff]   ;;  %v5826_v41 = vld [vmem:[#allocation7 + $0x294] ss:$8 sps:$4 sm:$0xff]  }
 0x1a9   : > { %4146 = vmatmul.mubr.msk.bf16.gmra.mrb[36].mxu0 %vm827_vm1, %v4959_v30  ;;  %7214 = vst [vmem:[#allocation23_spill] sm:$0xff] %v5783_v9  ;;  %v5785_v27 = vld [vmem:[#allocation7 + $0x244] ss:$8 sps:$4 sm:$0xff]   ;;  %v5787_v30 = vld [vmem:[#allocation7 + $0x1e0] ss:$8 sps:$4 sm:$0xff]   ;;  %7228 = vst [vmem:[#allocation37_spill] sm:$0xff] %v5826_v41 }
 0x1aa   : > { %1814 = vmatprep.mubr.bf16.mxu0 %v5227_v0  ;;  %2104 = vmatpush1.bf16.msra.mxu0 %v5705_v20  ;;  %7215 = vst [vmem:[#allocation24_spill] sm:$0xff] %v5785_v27  ;;  %7216 = vst [vmem:[#allocation25_spill] sm:$0xff] %v5787_v30 }
 0x1ab   : > { %2105 = vmatprep.subr.bf16.mxu0 %v5711_v29  ;;  %2605 = vmatprep.subr.bf16.mxu1 %v5785_v27  ;;  %v5816_v27 = vld [vmem:[#allocation7 + $0x270] ss:$8 sps:$4 sm:$0xff]  }
 0x1ac   : > { %v937_v34 = vpop.f32.mrb[20].mxu0  ;;  %7225 = vst [vmem:[#allocation34_spill] sm:$0xff] %v5816_v27 }
 0x1ad   : > { %v5726_v38 = vadd.f32 %v5611_v33, %v937_v34  ;;  %v939_v15 = vpop.f32.mrb[21].mxu0  ;;  %v5789_v34 = vld [vmem:[#allocation7 + $0x240] ss:$8 sps:$4 sm:$0xff]  }
 0x1ae   : > { %v5729_v22 = vadd.f32 %v5613_v35, %v939_v15  ;;  %v941_v45 = vpop.f32.mrb[22].mxu0  ;;  %2106 = vmatpush1.bf16.msra.mxu0 %v5720_v23  ;;  %v5747_v35 = vld [vmem:[#allocation7 + $0x190] ss:$8 sps:$4 sm:$0xff]   ;;  %7217 = vst [vmem:[#allocation26_spill] sm:$0xff] %v5789_v34  ;;  %2606 = vmatpush1.bf16.msra.mxu1 %v5789_v34  ;;  %v5795_v15 = vld [vmem:[#allocation7 + $0x1f4] ss:$8 sps:$4 sm:$0xff]  }
 0x1af   : > { %v5735_v53 = vadd.f32 %v5618_v39, %v941_v45  ;;  %v943_v57 = vpop.f32.mrb[23].mxu0  ;;  %2107 = vmatprep.subr.bf16.mxu0 %v5723_v47  ;;  %v5750_v39 = vld [vmem:[#allocation7 + $0x1a4] ss:$8 sps:$4 sm:$0xff]   ;;  %7218 = vst [vmem:[#allocation27_spill] sm:$0xff] %v5795_v15  ;;  %v5797_v45 = vld [vmem:[#allocation7 + $0x254] ss:$8 sps:$4 sm:$0xff]  }
 0x1b0   : > { %v5741_v33 = vadd.f32 %v5623_v42, %v943_v57  ;;  %v5757_v42 = vld [vmem:[#allocation7 + $0x1b4] ss:$8 sps:$4 sm:$0xff]   ;;  %7219 = vst [vmem:[#allocation28_spill] sm:$0xff] %v5797_v45  ;;  %v5799_v57 = vld [vmem:[#allocation7 + $0x1f0] ss:$8 sps:$4 sm:$0xff]   ;;  %2607 = vmatprep.subr.bf16.mxu1 %v5797_v45 }
 0x1b1   : > { %4147 = vmatmul.mubr.msk.bf16.gmra.mrb[40].mxu0 %vm827_vm1, %v4960_v60  ;;  %7220 = vst [vmem:[#allocation29_spill] sm:$0xff] %v5799_v57  ;;  %v5801_v60 = vld [vmem:[#allocation7 + $0x250] ss:$8 sps:$4 sm:$0xff]   ;;  %v5814_v34 = vld [vmem:[#allocation7 + $0x274] ss:$8 sps:$4 sm:$0xff]  }
 0x1b2   : > { %1824 = vmatprep.mubr.bf16.mxu0 %v5227_v0  ;;  %2108 = vmatpush1.bf16.msra.mxu0 %v5732_v50  ;;  %v5761_v0 = vld [vmem:[#allocation7 + $0x1b0] ss:$8 sps:$4 sm:$0xff]   ;;  %7221 = vst [vmem:[#allocation30_spill] sm:$0xff] %v5801_v60  ;;  %7224 = vst [vmem:[#allocation33_spill] sm:$0xff] %v5814_v34  ;;  %v5820_v45 = vld [vmem:[#allocation7 + $0x284] ss:$8 sps:$4 sm:$0xff]  }
 0x1b3   : > { %2109 = vmatprep.subr.bf16.mxu0 %v5738_v56  ;;  %7207 = vst [vmem:[#allocation16_spill] sm:$0xff] %v5761_v0  ;;  %2608 = vmatpush1.bf16.msra.mxu1 %v5801_v60  ;;  %7226 = vst [vmem:[#allocation35_spill] sm:$0xff] %v5820_v45  ;;  %v5822_v60 = vld [vmem:[#allocation7 + $0x280] ss:$8 sps:$4 sm:$0xff]  }
 0x1b4   : > { %7227 = vst [vmem:[#allocation36_spill] sm:$0xff] %v5822_v60 }
 0x1b6   : > { %2110 = vmatpush1.bf16.msra.mxu0 %v5747_v35 }
 0x1b7   : > { %2111 = vmatprep.subr.bf16.mxu0 %v5750_v39 }
 0x1b9   : > { %4148 = vmatmul.mubr.msk.bf16.gmra.mrb[44].mxu0 %vm827_vm1, %v4811_v31  ;;  %v5807_v31 = vld [vmem:[#allocation7 + $0x264] ss:$8 sps:$4 sm:$0xff]  }
 0x1ba   : > { %2112 = vmatpush1.bf16.msra.mxu0 %v5754_v61  ;;  %7222 = vst [vmem:[#allocation31_spill] sm:$0xff] %v5807_v31  ;;  %2609 = vmatprep.subr.bf16.mxu1 %v5807_v31  ;;  %v5828_v31 = vld [vmem:[#allocation7 + $0x290] ss:$8 sps:$4 sm:$0xff]  }
 0x1bb   : > { %2113 = vmatprep.subr.bf16.mxu0 %v5757_v42  ;;  %2610 = vmatpush1.bf16.msra.mxu1 %v5810_v21  ;;  %7229 = vst [vmem:[#allocation38_spill] sm:$0xff] %v5828_v31  ;;  %v5832_v21 = vld [vmem:[#allocation7 + $0x2a4] ss:$8 sps:$4 sm:$0xff]  }
 0x1bc   : > { %2611 = vmatprep.subr.bf16.mxu1 %v5814_v34  ;;  %7230 = vst [vmem:[#allocation39_spill] sm:$0xff] %v5832_v21  ;;  %v5834_v34 = vld [vmem:[#allocation7 + $0x2a0] ss:$8 sps:$4 sm:$0xff]  }
 0x1bd   : > { %7231 = vst [vmem:[#allocation40_spill] sm:$0xff] %v5834_v34 }
 0x1be   : > { %2114 = vmatpush1.bf16.msra.mxu0 %v5761_v0 }
 0x1bf   : > { %2115 = vmatprep.subr.bf16.mxu0 %v5764_v5  ;;  %2612 = vmatpush1.bf16.msra.mxu1 %v5816_v27  ;;  %v5838_v27 = vld [vmem:[#allocation7 + $0x2b4] ss:$8 sps:$4 sm:$0xff]  }
 0x1c0   : > { %2613 = vmatprep.subr.bf16.mxu1 %v5820_v45  ;;  %7232 = vst [vmem:[#allocation41_spill] sm:$0xff] %v5838_v27  ;;  %v5840_v45 = vld [vmem:[#allocation7 + $0x2b0] ss:$8 sps:$4 sm:$0xff]  }
 0x1c1   : > { %7233 = vst [vmem:[#allocation42_spill] sm:$0xff] %v5840_v45 }
 0x1c2   : > { %2116 = vmatpush1.bf16.msra.mxu0 %v5767_v36 }
 0x1c3   : > { %2117 = vmatprep.subr.bf16.mxu0 %v5771_v11  ;;  %2614 = vmatpush1.bf16.msra.mxu1 %v5822_v60  ;;  %v5844_v60 = vld [vmem:[#allocation7 + $0x2c4] ss:$8 sps:$4 sm:$0xff]  }
 0x1c4   : > { %2615 = vmatprep.subr.bf16.mxu1 %v5826_v41  ;;  %7234 = vst [vmem:[#allocation43_spill] sm:$0xff] %v5844_v60  ;;  %v5846_v41 = vld [vmem:[#allocation7 + $0x2c0] ss:$8 sps:$4 sm:$0xff]  }
 0x1c5   : > { %7235 = vst [vmem:[#allocation44_spill] sm:$0xff] %v5846_v41 }
 0x1c6   : > { %2118 = vmatpush1.bf16.msra.mxu0 %v5775_v17 }
 0x1c7   : > { %2119 = vmatprep.subr.bf16.mxu0 %v5783_v9  ;;  %2616 = vmatpush1.bf16.msra.mxu1 %v5828_v31  ;;  %v5850_v31 = vld [vmem:[#allocation7 + $0x2d4] ss:$8 sps:$4 sm:$0xff]  }
 0x1c8   : > { %2617 = vmatprep.subr.bf16.mxu1 %v5832_v21  ;;  %7236 = vst [vmem:[#allocation45_spill] sm:$0xff] %v5850_v31  ;;  %v5852_v21 = vld [vmem:[#allocation7 + $0x2d0] ss:$8 sps:$4 sm:$0xff]  }
 0x1c9   : > { %7237 = vst [vmem:[#allocation46_spill] sm:$0xff] %v5852_v21 }
 0x1ca   : > { %2120 = vmatpush1.bf16.msra.mxu0 %v5787_v30 }
 0x1cb   : > { %2121 = vmatprep.subr.bf16.mxu0 %v5795_v15  ;;  %2618 = vmatpush1.bf16.msra.mxu1 %v5834_v34  ;;  %v5856_v34 = vld [vmem:[#allocation7 + $0x2e4] ss:$8 sps:$4 sm:$0xff]  }
 0x1cc   : > { %2619 = vmatprep.subr.bf16.mxu1 %v5838_v27  ;;  %7238 = vst [vmem:[#allocation47_spill] sm:$0xff] %v5856_v34  ;;  %v5858_v27 = vld [vmem:[#allocation7 + $0x2e0] ss:$8 sps:$4 sm:$0xff]  }
 0x1cd   : > { %7239 = vst [vmem:[#allocation48_spill] sm:$0xff] %v5858_v27 }
 0x1ce   : > { %2122 = vmatpush1.bf16.msra.mxu0 %v5799_v57 }
 0x1cf   : > { %3154 = vmatprep.subr.bf16.mxu0 %v5553_v26  ;;  %2620 = vmatpush1.bf16.msra.mxu1 %v5840_v45  ;;  %v5862_v45 = vld [vmem:[#allocation7 + $0x2f4] ss:$8 sps:$4 sm:$0xff]  }
 0x1d0   : > { %2621 = vmatprep.subr.bf16.mxu1 %v5844_v60  ;;  %7240 = vst [vmem:[#allocation49_spill] sm:$0xff] %v5862_v45  ;;  %v5864_v60 = vld [vmem:[#allocation7 + $0x2f0] ss:$8 sps:$4 sm:$0xff]  }
 0x1d1   : > { %7241 = vst [vmem:[#allocation50_spill] sm:$0xff] %v5864_v60 }
 0x1d3   : > { %2622 = vmatpush1.bf16.msra.mxu1 %v5846_v41 }
 0x1d4   : > { %2623 = vmatprep.subr.bf16.mxu1 %v5850_v31  ;;  %v1860_v31 = vlaneseq }
 0x1d7   : > { %2624 = vmatpush1.bf16.msra.mxu1 %v5852_v21  ;;  %v5869_v21 = vshrl.u32 %v1860_v31, 7 }
 0x1d8   : > { %2625 = vmatprep.subr.bf16.mxu1 %v5856_v34  ;;  %v515_v34 = vld [vmem:[%s7023_s2] sm:$0x3] }
 0x1d9   : > { %7242 = vst [vmem:[#allocation51_spill] sm:$0xff] %v5869_v21  ;;  %v7072_v41 = vsub.s32 0, %v5869_v21 }
 0x1db   : > { %2626 = vmatpush1.bf16.msra.mxu1 %v5858_v27  ;;  %v7075_v27 = vsub.s32 1, %v5869_v21  ;;  %v5878_v6 = vrot.slane %v515_v34, %v7072_v41 }
 0x1dc   : > { %2627 = vmatprep.subr.bf16.mxu1 %v5862_v45 }
 0x1df   : > { %2628 = vmatpush1.bf16.msra.mxu1 %v5864_v60  ;;  %v5882_v60 = vrot.slane %v515_v34, %v7075_v27 }
 0x1e0   : > { %2785 = vmatprep.subr.bf16.mxu1 %v5553_v26 }
 0x264   : > { %v1776_v45 = vpop.f32.mrb[24].mxu0 }
 0x265   : > { %v4254_v26 = vadd.f32 %v1776_v45, %v5594_v24  ;;  %v1778_v31 = vpop.f32.mrb[25].mxu0 }
 0x266   : > { %v4256_v57 = vadd.f32 %v1778_v31, %v5600_v28  ;;  %v1780_v15 = vpop.f32.mrb[26].mxu0 }
 0x267   : > { %v1870_v30 = vadd.f32 %v4254_v26, %v5878_v6  ;;  %v4258_v9 = vadd.f32 %v1780_v15, %v5605_v49  ;;  %v1782_v17 = vpop.f32.mrb[27].mxu0 }
 0x268   : > { %v1871_v11 = vadd.f32 %v4256_v57, %v5882_v60  ;;  %v4260_v41 = vadd.f32 %v1782_v17, %v5608_v32 }
 0x269   : > { %v1872_v36 = vadd.f32 %v4258_v9, %v5878_v6  ;;  %v1894_v27 = vmax.f32 %v1870_v30, 0.0 }
 0x26a   : > { %v1873_v34 = vadd.f32 %v4260_v41, %v5882_v60  ;;  %v1895_v24 = vmax.f32 %v1871_v11, 0.0 }
 0x26b   : > { %v1896_v21 = vmax.f32 %v1872_v36, 0.0 }
 0x26c   : > { %v1897_v45 = vmax.f32 %v1873_v34, 0.0  ;;  %v1786_v5 = vpop.f32.mrb[28].mxu0 }
 0x26d   : > { %v1919_v28 = vpack.c.bf16 %v1896_v21, %v1894_v27  ;;  %v4262_v31 = vadd.f32 %v1786_v5, %v5616_v37  ;;  %v1788_v26 = vpop.f32.mrb[29].mxu0 }
 0x26e   : > { %v4264_v49 = vadd.f32 %v1788_v26, %v5621_v40  ;;  %v1790_v15 = vpop.f32.mrb[30].mxu0  ;;  %v1920_v0 = vpack.c.bf16 %v1897_v45, %v1895_v24 }
 0x26f   : > { %v1874_v57 = vadd.f32 %v4262_v31, %v5878_v6  ;;  %v4266_v32 = vadd.f32 %v1790_v15, %v5628_v44  ;;  %v1792_v17 = vpop.f32.mrb[31].mxu0 }
 0x270   : > { %v1875_v41 = vadd.f32 %v4264_v49, %v5882_v60  ;;  %v4268_v36 = vadd.f32 %v1792_v17, %v5633_v48  ;;  %2123 = vmatprep.mubr.bf16.mxu0 %v1920_v0  ;;  %2386 = vmatprep.mubr.bf16.mxu1 %v1920_v0 }
 0x271   : > { %v1876_v21 = vadd.f32 %v4266_v32, %v5878_v6  ;;  %2124 = vmatmul.mubr.bf16.vlgmr.msra.gmra.mrb[48].mxu0 %v1919_v28  ;;  %2387 = vmatmul.mubr.bf16.gmra.mrb[28].mxu1 %v1919_v28  ;;  %v1898_v40 = vmax.f32 %v1874_v57, 0.0 }
 0x272   : > { %v1877_v37 = vadd.f32 %v4268_v36, %v5882_v60  ;;  %3155 = vmatpush1.bf16.msra.mxu0 %v5625_v43  ;;  %v1899_v44 = vmax.f32 %v1875_v41, 0.0 }
 0x273   : > { %v1900_v5 = vmax.f32 %v1876_v21, 0.0  ;;  %3156 = vmatprep.subr.bf16.mxu0 %v5630_v46 }
 0x274   : > { %v1901_v11 = vmax.f32 %v1877_v37, 0.0  ;;  %v1796_v9 = vpop.f32.mrb[32].mxu0 }
 0x275   : > { %v4270_v27 = vadd.f32 %v1796_v9, %v5645_v54  ;;  %v1798_v48 = vpop.f32.mrb[33].mxu0  ;;  %v5903_v30 = vpack.c.bf16 %v1900_v5, %v1898_v40 }
 0x276   : > { %v4272_v0 = vadd.f32 %v1798_v48, %v5648_v55  ;;  %v1800_v34 = vpop.f32.mrb[34].mxu0  ;;  %v5906_v24 = vpack.c.bf16 %v1901_v11, %v1899_v44  ;;  %3157 = vmatpush1.bf16.msra.mxu0 %v5639_v51 }
 0x277   : > { %v1878_v45 = vadd.f32 %v4270_v27, %v5878_v6  ;;  %v4274_v28 = vadd.f32 %v1800_v34, %v5654_v59  ;;  %v1802_v31 = vpop.f32.mrb[35].mxu0  ;;  %3158 = vmatprep.subr.bf16.mxu0 %v5642_v52 }
 0x278   : > { %v1879_v26 = vadd.f32 %v4272_v0, %v5882_v60  ;;  %v4276_v54 = vadd.f32 %v1802_v31, %v5660_v1  ;;  %2133 = vmatprep.mubr.bf16.mxu0 %v5906_v24  ;;  %2396 = vmatprep.mubr.bf16.mxu1 %v5906_v24 }
 0x279   : > { %v1880_v55 = vadd.f32 %v4274_v28, %v5878_v6  ;;  %2134 = vmatmul.mubr.bf16.gmra.mrb[52].mxu0 %v5903_v30  ;;  %2397 = vmatmul.mubr.bf16.gmra.mrb[32].mxu1 %v5903_v30  ;;  %v1902_v59 = vmax.f32 %v1878_v45, 0.0 }
 0x27a   : > { %v1881_v49 = vadd.f32 %v4276_v54, %v5882_v60  ;;  %3159 = vmatpush1.bf16.msra.mxu0 %v5651_v58  ;;  %v1903_v57 = vmax.f32 %v1879_v26, 0.0 }
 0x27b   : > { %v1904_v15 = vmax.f32 %v1880_v55, 0.0  ;;  %3160 = vmatprep.subr.bf16.mxu0 %v5657_v62 }
 0x27c   : > { %v1905_v1 = vmax.f32 %v1881_v49, 0.0  ;;  %v1806_v32 = vpop.f32.mrb[36].mxu0 }
 0x27d   : > { %v4278_v17 = vadd.f32 %v1806_v32, %v5672_v63  ;;  %v1808_v41 = vpop.f32.mrb[37].mxu0  ;;  %v5923_v36 = vpack.c.bf16 %v1904_v15, %v1902_v59 }
 0x27e   : > { %v4280_v21 = vadd.f32 %v1808_v41, %v5675_v7  ;;  %v1810_v37 = vpop.f32.mrb[38].mxu0  ;;  %v5926_v40 = vpack.c.bf16 %v1905_v1, %v1903_v57  ;;  %3161 = vmatpush1.bf16.msra.mxu0 %v5666_v2 }
 0x27f   : > { %v1882_v5 = vadd.f32 %v4278_v17, %v5878_v6  ;;  %v4282_v44 = vadd.f32 %v1810_v37, %v5681_v10  ;;  %v1812_v11 = vpop.f32.mrb[39].mxu0  ;;  %3162 = vmatprep.subr.bf16.mxu0 %v5669_v4 }
 0x280   : > { %v1883_v9 = vadd.f32 %v4280_v21, %v5882_v60  ;;  %v4284_v63 = vadd.f32 %v1812_v11, %v5687_v3  ;;  %2143 = vmatprep.mubr.bf16.mxu0 %v5926_v40  ;;  %2406 = vmatprep.mubr.bf16.mxu1 %v5926_v40 }
 0x281   : > { %v1884_v7 = vadd.f32 %v4282_v44, %v5878_v6  ;;  %2144 = vmatmul.mubr.bf16.gmra.mrb[56].mxu0 %v5923_v36  ;;  %2407 = vmatmul.mubr.bf16.gmra.mrb[36].mxu1 %v5923_v36  ;;  %v1906_v10 = vmax.f32 %v1882_v5, 0.0 }
 0x282   : > { %v1885_v27 = vadd.f32 %v4284_v63, %v5882_v60  ;;  %3163 = vmatpush1.bf16.msra.mxu0 %v5678_v8  ;;  %v1907_v0 = vmax.f32 %v1883_v9, 0.0 }
 0x283   : > { %v1908_v48 = vmax.f32 %v1884_v7, 0.0  ;;  %3164 = vmatprep.subr.bf16.mxu0 %v5684_v13 }
 0x284   : > { %v1909_v3 = vmax.f32 %v1885_v27, 0.0  ;;  %v1816_v34 = vpop.f32.mrb[40].mxu0 }
 0x285   : > { %v4286_v45 = vadd.f32 %v1816_v34, %v5699_v18  ;;  %v1818_v28 = vpop.f32.mrb[41].mxu0  ;;  %v5943_v31 = vpack.c.bf16 %v1908_v48, %v1906_v10 }
 0x286   : > { %v4288_v26 = vadd.f32 %v1818_v28, %v5702_v19  ;;  %v1820_v54 = vpop.f32.mrb[42].mxu0  ;;  %v5946_v55 = vpack.c.bf16 %v1909_v3, %v1907_v0  ;;  %3165 = vmatpush1.bf16.msra.mxu0 %v5693_v14 }
 0x287   : > { %v1886_v49 = vadd.f32 %v4286_v45, %v5878_v6  ;;  %v4290_v59 = vadd.f32 %v1820_v54, %v5708_v25  ;;  %v1822_v15 = vpop.f32.mrb[43].mxu0  ;;  %3166 = vmatprep.subr.bf16.mxu0 %v5696_v16  ;;  %v516_v54 = vld [vmem:[%s7025_s4] sm:$0x3] }
 0x288   : > { %v1887_v57 = vadd.f32 %v4288_v26, %v5882_v60  ;;  %v4292_v18 = vadd.f32 %v1822_v15, %v5714_v12  ;;  %2153 = vmatprep.mubr.bf16.mxu0 %v5946_v55  ;;  %2416 = vmatprep.mubr.bf16.mxu1 %v5946_v55 }
 0x289   : > { %v1888_v19 = vadd.f32 %v4290_v59, %v5878_v6  ;;  %2154 = vmatmul.mubr.bf16.gmra.mrb[60].mxu0 %v5943_v31  ;;  %2417 = vmatmul.mubr.bf16.gmra.mrb[40].mxu1 %v5943_v31  ;;  %v1910_v25 = vmax.f32 %v1886_v49, 0.0 }
 0x28a   : > { %v1889_v1 = vadd.f32 %v4292_v18, %v5882_v60  ;;  %3167 = vmatpush1.bf16.msra.mxu0 %v5705_v20  ;;  %v1911_v17 = vmax.f32 %v1887_v57, 0.0 }
 0x28b   : > { %v1912_v32 = vmax.f32 %v1888_v19, 0.0  ;;  %3168 = vmatprep.subr.bf16.mxu0 %v5711_v29 }
 0x28c   : > { %v1913_v12 = vmax.f32 %v1889_v1, 0.0  ;;  %v1826_v41 = vpop.f32.mrb[44].mxu0 }
 0x28d   : > { %v4294_v21 = vadd.f32 %v1826_v41, %v5726_v38  ;;  %v1828_v37 = vpop.f32.mrb[45].mxu0  ;;  %v1927_v5 = vpack.c.bf16 %v1912_v32, %v1910_v25 }
 0x28e   : > { %v4296_v44 = vadd.f32 %v1828_v37, %v5729_v22  ;;  %v1830_v11 = vpop.f32.mrb[46].mxu0  ;;  %v1928_v9 = vpack.c.bf16 %v1913_v12, %v1911_v17  ;;  %3169 = vmatpush1.bf16.msra.mxu0 %v5720_v23 }
 0x28f   : > { %v1890_v63 = vadd.f32 %v4294_v21, %v5878_v6  ;;  %v4298_v7 = vadd.f32 %v1830_v11, %v5735_v53  ;;  %v1832_v27 = vpop.f32.mrb[47].mxu0  ;;  %3170 = vmatprep.subr.bf16.mxu0 %v5723_v47 }
 0x290   : > { %v1891_v10 = vadd.f32 %v4296_v44, %v5882_v60  ;;  %v4300_v48 = vadd.f32 %v1832_v27, %v5741_v33  ;;  %2163 = vmatprep.mubr.bf16.mxu0 %v1928_v9  ;;  %2426 = vmatprep.mubr.bf16.mxu1 %v1928_v9 }
 0x291   : > { %v1892_v38 = vadd.f32 %v4298_v7, %v5878_v6  ;;  %2164 = vmatmul.mubr.bf16.gmra.mrb[64].mxu0 %v1927_v5  ;;  %2427 = vmatmul.mubr.bf16.gmra.mrb[44].mxu1 %v1927_v5  ;;  %v1914_v53 = vmax.f32 %v1890_v63, 0.0  ;;  %v7243_v6 = vld [vmem:[#allocation16_spill] sm:$0xff] }
 0x292   : > { %v1893_v22 = vadd.f32 %v4300_v48, %v5882_v60  ;;  %2629 = vmatprep.mubr.bf16.mxu1 %v5906_v24  ;;  %3171 = vmatpush1.bf16.msra.mxu0 %v5732_v50  ;;  %v1915_v3 = vmax.f32 %v1891_v10, 0.0  ;;  %v7244_v60 = vld [vmem:[#allocation17_spill] sm:$0xff] }
 0x293   : > { %v1916_v0 = vmax.f32 %v1892_v38, 0.0  ;;  %3172 = vmatprep.subr.bf16.mxu0 %v5738_v56 }
 0x294   : > { %v1917_v34 = vmax.f32 %v1893_v22, 0.0 }
 0x295   : > { %v1929_v45 = vpack.c.bf16 %v1916_v0, %v1914_v53 }
 0x296   : > { %v1930_v33 = vpack.c.bf16 %v1917_v34, %v1915_v3  ;;  %3173 = vmatpush1.bf16.msra.mxu0 %v5747_v35 }
 0x297   : > { %3174 = vmatprep.subr.bf16.mxu0 %v5750_v39 }
 0x298   : > { %2173 = vmatprep.mubr.bf16.mxu0 %v1930_v33 }
 0x299   : > { %2174 = vmatmul.mubr.bf16.gmra.mrb[68].mxu0 %v1929_v45  ;;  %2630 = vmatmul.mubr.bf16.vlgmr.msra.gmra.mrb[24].mxu1 %v5903_v30 }
 0x29a   : > { %2639 = vmatprep.mubr.bf16.mxu1 %v5926_v40  ;;  %2786 = vmatpush1.bf16.msra.mxu1 %v5625_v43  ;;  %v7245_v43 = vld [vmem:[#allocation18_spill] sm:$0xff] }
 0x29b   : > { %2787 = vmatprep.subr.bf16.mxu1 %v5630_v46  ;;  %3175 = vmatpush1.bf16.msra.mxu0 %v5754_v61  ;;  %v7246_v46 = vld [vmem:[#allocation19_spill] sm:$0xff] }
 0x29c   : > { %3176 = vmatprep.subr.bf16.mxu0 %v5757_v42 }
 0x29e   : > { %2788 = vmatpush1.bf16.msra.mxu1 %v5639_v51  ;;  %v7247_v51 = vld [vmem:[#allocation21_spill] sm:$0xff] }
 0x29f   : > { %2789 = vmatprep.subr.bf16.mxu1 %v5642_v52  ;;  %3177 = vmatpush1.bf16.msra.mxu0 %v7243_v6  ;;  %v7248_v52 = vld [vmem:[#allocation23_spill] sm:$0xff] }
 0x2a0   : > { %3178 = vmatprep.subr.bf16.mxu0 %v7244_v60 }
 0x2a1   : > { %2640 = vmatmul.mubr.bf16.gmra.mrb[28].mxu1 %v5923_v36 }
 0x2a2   : > { %2649 = vmatprep.mubr.bf16.mxu1 %v5946_v55  ;;  %2790 = vmatpush1.bf16.msra.mxu1 %v5651_v58  ;;  %v7249_v58 = vld [vmem:[#allocation25_spill] sm:$0xff]  ;;  %v7254_v55 = vld [vmem:[#allocation51_spill] sm:$0xff] }
 0x2a3   : > { %2791 = vmatprep.subr.bf16.mxu1 %v5657_v62  ;;  %3179 = vmatpush1.bf16.msra.mxu0 %v7245_v43  ;;  %v7250_v62 = vld [vmem:[#allocation27_spill] sm:$0xff]  ;;  %v7255_v49 = vsub.s32 0, %v7254_v55  ;;  %v7256_v15 = vsub.s32 1, %v7254_v55 }
 0x2a4   : > { %3180 = vmatprep.subr.bf16.mxu0 %v7246_v46  ;;  %v6091_v55 = vld [vmem:[#allocation7 + $0x10] ss:$8 sps:$4 sm:$0xff]  }
 0x2a5   : > { %v6055_v59 = vrot.slane %v516_v54, %v7255_v49  ;;  %v6059_v57 = vrot.slane %v516_v54, %v7256_v15 }
 0x2a6   : > { %2792 = vmatpush1.bf16.msra.mxu1 %v5666_v2  ;;  %v7251_v2 = vld [vmem:[#allocation29_spill] sm:$0xff] }
 0x2a7   : > { %2793 = vmatprep.subr.bf16.mxu1 %v5669_v4  ;;  %3181 = vmatpush1.bf16.msra.mxu0 %v7247_v51  ;;  %v6005_v4 = vld [vmem:[#allocation7 + $0x4] ss:$8 sps:$4 sm:$0xff]  }
 0x2a8   : > { %3182 = vmatprep.subr.bf16.mxu0 %v7248_v52  ;;  %7252 = vst [vmem:[#allocation16_spill] sm:$0xff] %v6005_v4 }
 0x2a9   : > { %2650 = vmatmul.mubr.bf16.gmra.mrb[32].mxu1 %v5943_v31 }
 0x2aa   : > { %2659 = vmatprep.mubr.bf16.mxu1 %v1928_v9  ;;  %2794 = vmatpush1.bf16.msra.mxu1 %v5678_v8  ;;  %v7253_v8 = vmov 0.0|0.0  }
 0x2ab   : > { %2795 = vmatprep.subr.bf16.mxu1 %v5684_v13  ;;  %3183 = vmatpush1.bf16.msra.mxu0 %v7249_v58 }
 0x2ac   : > { %3184 = vmatprep.subr.bf16.mxu0 %v7250_v62 }
 0x2ae   : > { %2796 = vmatpush1.bf16.msra.mxu1 %v5693_v14 }
 0x2af   : > { %2797 = vmatprep.subr.bf16.mxu1 %v5696_v16  ;;  %3185 = vmatpush1.bf16.msra.mxu0 %v7251_v2 }
 0x2b0   : > { %3217 = vmatprep.subr.bf16.mxu0 %v6005_v4 }
 0x2b1   : > { %2660 = vmatmul.mubr.bf16.gmra.mrb[36].mxu1 %v1927_v5 }
 0x2b2   : > { %2669 = vmatprep.mubr.bf16.mxu1 %v1930_v33  ;;  %2798 = vmatpush1.bf16.msra.mxu1 %v5705_v20 }
 0x2b3   : > { %2799 = vmatprep.subr.bf16.mxu1 %v5711_v29 }
 0x2b6   : > { %2800 = vmatpush1.bf16.msra.mxu1 %v5720_v23 }
 0x2b7   : > { %2801 = vmatprep.subr.bf16.mxu1 %v5723_v47 }
 0x2b9   : > { %2670 = vmatmul.mubr.bf16.gmra.mrb[40].mxu1 %v1929_v45 }
 0x2ba   : > { %2679 = vmatprep.mubr.bf16.mxu1 %v7253_v8  ;;  %2802 = vmatpush1.bf16.msra.mxu1 %v5732_v50 }
 0x2bb   : > { %2803 = vmatprep.subr.bf16.mxu1 %v5738_v56 }
 0x2be   : > { %2804 = vmatpush1.bf16.msra.mxu1 %v5747_v35 }
 0x2bf   : > { %2805 = vmatprep.subr.bf16.mxu1 %v5750_v39 }
 0x2c1   : > { %2680 = vmatmul.mubr.bf16.gmra.mrb[44].mxu1 %v7253_v8 }
 0x2c2   : > { %2806 = vmatpush1.bf16.msra.mxu1 %v5754_v61 }
 0x2c3   : > { %2807 = vmatprep.subr.bf16.mxu1 %v5757_v42 }
 0x2c6   : > { %2808 = vmatpush1.bf16.msra.mxu1 %v7243_v6 }
 0x2c7   : > { %2809 = vmatprep.subr.bf16.mxu1 %v7244_v60 }
 0x2ca   : > { %2810 = vmatpush1.bf16.msra.mxu1 %v7245_v43 }
 0x2cb   : > { %2811 = vmatprep.subr.bf16.mxu1 %v7246_v46 }
 0x2ce   : > { %2812 = vmatpush1.bf16.msra.mxu1 %v7247_v51 }
 0x2cf   : > { %2813 = vmatprep.subr.bf16.mxu1 %v7248_v52 }
 0x2d2   : > { %2814 = vmatpush1.bf16.msra.mxu1 %v7249_v58 }
 0x2d3   : > { %2815 = vmatprep.subr.bf16.mxu1 %v7250_v62  ;;  %v6083_v62 = vld [vmem:[#allocation7] ss:$8 sps:$4 sm:$0xff]  }
 0x2d6   : > { %2816 = vmatpush1.bf16.msra.mxu1 %v7251_v2 }
 0x2d7   : > { %2878 = vmatprep.subr.bf16.mxu1 %v6005_v4 }
 0x344   : > { %v2125_v13 = vpop.f32.mrb[48].mxu0 }
 0x345   : > { %v2127_v14 = vpop.f32.mrb[49].mxu0 }
 0x346   : > { %v2129_v16 = vpop.f32.mrb[50].mxu0 }
 0x347   : > { %v2131_v20 = vpop.f32.mrb[51].mxu0 }
 0x34c   : > { %v2135_v29 = vpop.f32.mrb[52].mxu0 }
 0x34d   : > { %v2137_v23 = vpop.f32.mrb[53].mxu0 }
 0x34e   : > { %v2139_v47 = vpop.f32.mrb[54].mxu0 }
 0x34f   : > { %v2141_v50 = vpop.f32.mrb[55].mxu0 }
 0x354   : > { %v2145_v56 = vpop.f32.mrb[56].mxu0 }
 0x355   : > { %v2147_v35 = vpop.f32.mrb[57].mxu0 }
 0x356   : > { %v6030_v39 = vpop.f32.mrb[58].mxu0 }
 0x357   : > { %v6032_v61 = vpop.f32.mrb[59].mxu0 }
 0x35c   : > { %v6034_v42 = vpop.f32.mrb[60].mxu0 }
 0x35d   : > { %v6036_v30 = vpop.f32.mrb[61].mxu0 }
 0x35e   : > { %v6038_v24 = vpop.f32.mrb[62].mxu0 }
 0x35f   : > { %v6040_v36 = vpop.f32.mrb[63].mxu0 }
 0x364   : > { %v6042_v40 = vpop.f32.mrb[64].mxu0 }
 0x365   : > { %v6044_v28 = vpop.f32.mrb[65].mxu0 }
 0x366   : > { %v6046_v31 = vpop.f32.mrb[66].mxu0 }
 0x367   : > { %v6048_v26 = vpop.f32.mrb[67].mxu0 }
 0x36c   : > { %v6061_v18 = vpop.f32.mrb[68].mxu0  ;;  %v2631_v19 = vpop.f32.mrb[24].mxu1 }
 0x36d   : > { %v4301_v1 = vadd.f32 %v2631_v19, %v2125_v13  ;;  %v6063_v25 = vpop.f32.mrb[69].mxu0  ;;  %v2633_v32 = vpop.f32.mrb[25].mxu1 }
 0x36e   : > { %v4302_v17 = vadd.f32 %v2633_v32, %v2127_v14  ;;  %v6065_v12 = vpop.f32.mrb[70].mxu0  ;;  %v2635_v41 = vpop.f32.mrb[26].mxu1  ;;  %v6086_v14 = vld [vmem:[#allocation7 + $0x14] ss:$8 sps:$4 sm:$0xff]  }
 0x36f   : > { %v2725_v21 = vadd.f32 %v4301_v1, %v6055_v59  ;;  %v4303_v37 = vadd.f32 %v2635_v41, %v2129_v16  ;;  %v6068_v5 = vpop.f32.mrb[71].mxu0  ;;  %v2637_v44 = vpop.f32.mrb[27].mxu1 }
 0x370   : > { %v2726_v11 = vadd.f32 %v4302_v17, %v6059_v57  ;;  %v4304_v9 = vadd.f32 %v2637_v44, %v2131_v20  ;;  %v6098_v17 = vld [vmem:[#allocation7 + $0x24] ss:$8 sps:$4 sm:$0xff]  }
 0x371   : > { %v2727_v63 = vadd.f32 %v4303_v37, %v6055_v59  ;;  %v2749_v27 = vmax.f32 %v2725_v21, 0.0  ;;  %v6107_v37 = vld [vmem:[#allocation7 + $0x20] ss:$8 sps:$4 sm:$0xff]  }
 0x372   : > { %v2728_v7 = vadd.f32 %v4304_v9, %v6059_v57  ;;  %v2750_v48 = vmax.f32 %v2726_v11, 0.0  ;;  %v6110_v11 = vld [vmem:[#allocation7 + $0x34] ss:$8 sps:$4 sm:$0xff]  }
 0x373   : > { %v2751_v10 = vmax.f32 %v2727_v63, 0.0 }
 0x374   : > { %v2752_v38 = vmax.f32 %v2728_v7, 0.0  ;;  %v2641_v22 = vpop.f32.mrb[28].mxu1 }
 0x375   : > { %v6073_v53 = vpack.c.bf16 %v2751_v10, %v2749_v27  ;;  %v4305_v0 = vadd.f32 %v2641_v22, %v2135_v29  ;;  %v2643_v3 = vpop.f32.mrb[29].mxu1 }
 0x376   : > { %v4306_v34 = vadd.f32 %v2643_v3, %v2137_v23  ;;  %v2645_v45 = vpop.f32.mrb[30].mxu1  ;;  %v6075_v33 = vpack.c.bf16 %v2752_v38, %v2750_v48  ;;  %v6117_v38 = vld [vmem:[#allocation7 + $0x30] ss:$8 sps:$4 sm:$0xff]  }
 0x377   : > { %v2729_v6 = vadd.f32 %v4305_v0, %v6055_v59  ;;  %v4307_v60 = vadd.f32 %v2645_v45, %v2139_v47  ;;  %v2647_v43 = vpop.f32.mrb[31].mxu1 }
 0x378   : > { %v2730_v46 = vadd.f32 %v4306_v34, %v6059_v57  ;;  %v4308_v51 = vadd.f32 %v2647_v43, %v2141_v50  ;;  %2817 = vmatprep.mubr.bf16.mxu1 %v6075_v33 }
 0x379   : > { %v2731_v52 = vadd.f32 %v4307_v60, %v6055_v59  ;;  %2818 = vmatmul.mubr.bf16.vlgmr.msra.gmra.mrb[48].mxu1 %v6073_v53  ;;  %v2753_v2 = vmax.f32 %v2729_v6, 0.0  ;;  %v6124_v6 = vld [vmem:[#allocation7 + $0x44] ss:$8 sps:$4 sm:$0xff]  }
 0x37a   : > { %v2732_v58 = vadd.f32 %v4308_v51, %v6059_v57  ;;  %2879 = vmatpush1.bf16.msra.mxu1 %v6083_v62  ;;  %v2754_v16 = vmax.f32 %v2730_v46, 0.0  ;;  %v6133_v46 = vld [vmem:[#allocation7 + $0x40] ss:$8 sps:$4 sm:$0xff]  }
 0x37b   : > { %v2755_v13 = vmax.f32 %v2731_v52, 0.0  ;;  %2880 = vmatprep.subr.bf16.mxu1 %v6086_v14  ;;  %v6136_v52 = vld [vmem:[#allocation7 + $0x54] ss:$8 sps:$4 sm:$0xff]  }
 0x37c   : > { %v2756_v20 = vmax.f32 %v2732_v58, 0.0  ;;  %v2651_v29 = vpop.f32.mrb[32].mxu1 }
 0x37d   : > { %v4309_v23 = vadd.f32 %v2651_v29, %v2145_v56  ;;  %v2653_v47 = vpop.f32.mrb[33].mxu1  ;;  %v6089_v50 = vpack.c.bf16 %v2755_v13, %v2753_v2 }
 0x37e   : > { %v4310_v54 = vadd.f32 %v2653_v47, %v2147_v35  ;;  %2881 = vmatpush1.bf16.msra.mxu1 %v6091_v55  ;;  %v2655_v49 = vpop.f32.mrb[34].mxu1  ;;  %v6094_v15 = vpack.c.bf16 %v2756_v20, %v2754_v16 }
 0x37f   : > { %v2733_v19 = vadd.f32 %v4309_v23, %v6055_v59  ;;  %v4311_v1 = vadd.f32 %v2655_v49, %v6030_v39  ;;  %v2657_v32 = vpop.f32.mrb[35].mxu1  ;;  %2882 = vmatprep.subr.bf16.mxu1 %v6098_v17  ;;  %v6143_v23 = vld [vmem:[#allocation7 + $0x50] ss:$8 sps:$4 sm:$0xff]  }
 0x380   : > { %v2734_v56 = vadd.f32 %v4310_v54, %v6059_v57  ;;  %v4312_v35 = vadd.f32 %v2657_v32, %v6032_v61  ;;  %2827 = vmatprep.mubr.bf16.mxu1 %v6094_v15  ;;  %v6150_v32 = vld [vmem:[#allocation7 + $0x64] ss:$8 sps:$4 sm:$0xff]  }
 0x381   : > { %v2735_v41 = vadd.f32 %v4311_v1, %v6055_v59  ;;  %2828 = vmatmul.mubr.bf16.gmra.mrb[52].mxu1 %v6089_v50  ;;  %v2757_v39 = vmax.f32 %v2733_v19, 0.0 }
 0x382   : > { %v2736_v21 = vadd.f32 %v4312_v35, %v6059_v57  ;;  %2883 = vmatpush1.bf16.msra.mxu1 %v6107_v37  ;;  %v2758_v9 = vmax.f32 %v2734_v56, 0.0 }
 0x383   : > { %v2759_v44 = vmax.f32 %v2735_v41, 0.0  ;;  %2884 = vmatprep.subr.bf16.mxu1 %v6110_v11  ;;  %v6159_v41 = vld [vmem:[#allocation7 + $0x60] ss:$8 sps:$4 sm:$0xff]  }
 0x384   : > { %v2760_v61 = vmax.f32 %v2736_v21, 0.0  ;;  %v2661_v63 = vpop.f32.mrb[36].mxu1 }
 0x385   : > { %v4313_v7 = vadd.f32 %v2661_v63, %v6034_v42  ;;  %v2663_v27 = vpop.f32.mrb[37].mxu1  ;;  %v6114_v10 = vpack.c.bf16 %v2759_v44, %v2757_v39  ;;  %v6162_v39 = vld [vmem:[#allocation7 + $0x74] ss:$8 sps:$4 sm:$0xff]  }
 0x386   : > { %v4314_v48 = vadd.f32 %v2663_v27, %v6036_v30  ;;  %2885 = vmatpush1.bf16.msra.mxu1 %v6117_v38  ;;  %v2665_v22 = vpop.f32.mrb[38].mxu1  ;;  %v6120_v0 = vpack.c.bf16 %v2760_v61, %v2758_v9 }
 0x387   : > { %v2737_v3 = vadd.f32 %v4313_v7, %v6055_v59  ;;  %v4315_v34 = vadd.f32 %v2665_v22, %v6038_v24  ;;  %v2667_v45 = vpop.f32.mrb[39].mxu1  ;;  %2886 = vmatprep.subr.bf16.mxu1 %v6124_v6 }
 0x388   : > { %v2738_v42 = vadd.f32 %v4314_v48, %v6059_v57  ;;  %v4316_v30 = vadd.f32 %v2667_v45, %v6040_v36  ;;  %2837 = vmatprep.mubr.bf16.mxu1 %v6120_v0  ;;  %v6169_v48 = vld [vmem:[#allocation7 + $0x70] ss:$8 sps:$4 sm:$0xff]  }
 0x389   : > { %v2739_v60 = vadd.f32 %v4315_v34, %v6055_v59  ;;  %2838 = vmatmul.mubr.bf16.gmra.mrb[56].mxu1 %v6114_v10  ;;  %v2761_v24 = vmax.f32 %v2737_v3, 0.0 }
 0x38a   : > { %v2740_v43 = vadd.f32 %v4316_v30, %v6059_v57  ;;  %2887 = vmatpush1.bf16.msra.mxu1 %v6133_v46  ;;  %v2762_v58 = vmax.f32 %v2738_v42, 0.0  ;;  %v6176_v30 = vld [vmem:[#allocation7 + $0x84] ss:$8 sps:$4 sm:$0xff]  }
 0x38b   : > { %v2763_v51 = vmax.f32 %v2739_v60, 0.0  ;;  %2888 = vmatprep.subr.bf16.mxu1 %v6136_v52 }
 0x38c   : > { %v2764_v36 = vmax.f32 %v2740_v43, 0.0  ;;  %v2671_v2 = vpop.f32.mrb[40].mxu1 }
 0x38d   : > { %v4317_v13 = vadd.f32 %v2671_v2, %v6042_v40  ;;  %v2673_v16 = vpop.f32.mrb[41].mxu1  ;;  %v6140_v20 = vpack.c.bf16 %v2763_v51, %v2761_v24  ;;  %v6185_v24 = vld [vmem:[#allocation7 + $0x80] ss:$8 sps:$4 sm:$0xff]  }
 0x38e   : > { %v4318_v29 = vadd.f32 %v2673_v16, %v6044_v28  ;;  %2889 = vmatpush1.bf16.msra.mxu1 %v6143_v23  ;;  %v2675_v47 = vpop.f32.mrb[42].mxu1  ;;  %v6146_v54 = vpack.c.bf16 %v2764_v36, %v2762_v58  ;;  %v6188_v58 = vld [vmem:[#allocation7 + $0x94] ss:$8 sps:$4 sm:$0xff]  }
 0x38f   : > { %v2741_v49 = vadd.f32 %v4317_v13, %v6055_v59  ;;  %v4319_v19 = vadd.f32 %v2675_v47, %v6046_v31  ;;  %v2677_v1 = vpop.f32.mrb[43].mxu1  ;;  %2890 = vmatprep.subr.bf16.mxu1 %v6150_v32  ;;  %v6193_v13 = vld [vmem:[#allocation7 + $0x90] ss:$8 sps:$4 sm:$0xff]   ;;  %v6203_v47 = vld [vmem:[#allocation7 + $0xa0] ss:$8 sps:$4 sm:$0xff]  }
 0x390   : > { %v2742_v40 = vadd.f32 %v4318_v29, %v6059_v57  ;;  %v4320_v28 = vadd.f32 %v2677_v1, %v6048_v26  ;;  %2847 = vmatprep.mubr.bf16.mxu1 %v6146_v54  ;;  %v6198_v29 = vld [vmem:[#allocation7 + $0xa4] ss:$8 sps:$4 sm:$0xff]  }
 0x391   : > { %v2743_v56 = vadd.f32 %v4319_v19, %v6055_v59  ;;  %2848 = vmatmul.mubr.bf16.gmra.mrb[60].mxu1 %v6140_v20  ;;  %v2765_v31 = vmax.f32 %v2741_v49, 0.0  ;;  %v6207_v49 = vld [vmem:[#allocation7 + $0xb4] ss:$8 sps:$4 sm:$0xff]   ;;  %v6210_v19 = vld [vmem:[#allocation7 + $0xb0] ss:$8 sps:$4 sm:$0xff]  }
 0x392   : > { %v2744_v35 = vadd.f32 %v4320_v28, %v6059_v57  ;;  %2891 = vmatpush1.bf16.msra.mxu1 %v6159_v41  ;;  %v2766_v44 = vmax.f32 %v2742_v40, 0.0  ;;  %v6213_v1 = vld [vmem:[#allocation7 + $0xc4] ss:$8 sps:$4 sm:$0xff]   ;;  %v6216_v40 = vld [vmem:[#allocation7 + $0xc0] ss:$8 sps:$4 sm:$0xff]  }
 0x393   : > { %v2767_v21 = vmax.f32 %v2743_v56, 0.0  ;;  %2892 = vmatprep.subr.bf16.mxu1 %v6162_v39  ;;  %v6219_v28 = vld [vmem:[#allocation7 + $0xd4] ss:$8 sps:$4 sm:$0xff]   ;;  %v6222_v56 = vld [vmem:[#allocation7 + $0xd0] ss:$8 sps:$4 sm:$0xff]  }
 0x394   : > { %v2768_v26 = vmax.f32 %v2744_v35, 0.0  ;;  %v2681_v9 = vpop.f32.mrb[44].mxu1  ;;  %v6225_v35 = vld [vmem:[#allocation7 + $0xe4] ss:$8 sps:$4 sm:$0xff]  }
 0x395   : > { %v4321_v61 = vadd.f32 %v2681_v9, %v6061_v18  ;;  %v2683_v63 = vpop.f32.mrb[45].mxu1  ;;  %v6166_v7 = vpack.c.bf16 %v2767_v21, %v2765_v31  ;;  %v6228_v31 = vld [vmem:[#allocation7 + $0xe0] ss:$8 sps:$4 sm:$0xff]   ;;  %v6231_v21 = vld [vmem:[#allocation7 + $0xf4] ss:$8 sps:$4 sm:$0xff]  }
 0x396   : > { %v4322_v27 = vadd.f32 %v2683_v63, %v6063_v25  ;;  %2893 = vmatpush1.bf16.msra.mxu1 %v6169_v48  ;;  %v2685_v22 = vpop.f32.mrb[46].mxu1  ;;  %v6172_v3 = vpack.c.bf16 %v2768_v26, %v2766_v44  ;;  %v6234_v44 = vld [vmem:[#allocation7 + $0xf0] ss:$8 sps:$4 sm:$0xff]   ;;  %v6237_v26 = vld [vmem:[#allocation7 + $0x204] ss:$8 sps:$4 sm:$0xff]  }
 0x397   : > { %v2745_v34 = vadd.f32 %v4321_v61, %v6055_v59  ;;  %v4323_v45 = vadd.f32 %v2685_v22, %v6065_v12  ;;  %v2687_v42 = vpop.f32.mrb[47].mxu1  ;;  %2894 = vmatprep.subr.bf16.mxu1 %v6176_v30  ;;  %v6242_v9 = vld [vmem:[#allocation7 + $0x200] ss:$8 sps:$4 sm:$0xff]   ;;  %v6245_v61 = vld [vmem:[#allocation7 + $0x214] ss:$8 sps:$4 sm:$0xff]  }
 0x398   : > { %v2746_v18 = vadd.f32 %v4322_v27, %v6059_v57  ;;  %v4324_v25 = vadd.f32 %v2687_v42, %v6068_v5  ;;  %2857 = vmatprep.mubr.bf16.mxu1 %v6172_v3  ;;  %v6248_v63 = vld [vmem:[#allocation7 + $0x210] ss:$8 sps:$4 sm:$0xff]   ;;  %v6251_v27 = vld [vmem:[#allocation7 + $0x224] ss:$8 sps:$4 sm:$0xff]  }
 0x399   : > { %v2747_v60 = vadd.f32 %v4323_v45, %v6055_v59  ;;  %2858 = vmatmul.mubr.bf16.gmra.mrb[64].mxu1 %v6166_v7  ;;  %v2769_v12 = vmax.f32 %v2745_v34, 0.0  ;;  %v7257_v22 = vld [vmem:[#allocation20_spill] sm:$0xff]  ;;  %v7258_v34 = vld [vmem:[#allocation22_spill] sm:$0xff] }
 0x39a   : > { %v2748_v43 = vadd.f32 %v4324_v25, %v6059_v57  ;;  %2895 = vmatpush1.bf16.msra.mxu1 %v6185_v24  ;;  %v2770_v36 = vmax.f32 %v2746_v18, 0.0  ;;  %v7259_v45 = vld [vmem:[#allocation24_spill] sm:$0xff]  ;;  %v7260_v42 = vld [vmem:[#allocation26_spill] sm:$0xff]  ;;  %v7263_v25 = vld [vmem:[#allocation31_spill] sm:$0xff] }
 0x39b   : > { %v2771_v51 = vmax.f32 %v2747_v60, 0.0  ;;  %2896 = vmatprep.subr.bf16.mxu1 %v6188_v58  ;;  %v7261_v18 = vld [vmem:[#allocation28_spill] sm:$0xff] }
 0x39c   : > { %v2772_v5 = vmax.f32 %v2748_v43, 0.0  ;;  %v7264_v60 = vld [vmem:[#allocation32_spill] sm:$0xff]  ;;  %v7265_v43 = vld [vmem:[#allocation33_spill] sm:$0xff] }
 0x39d   : > { %v6191_v2 = vpack.c.bf16 %v2771_v51, %v2769_v12  ;;  %v7266_v12 = vld [vmem:[#allocation34_spill] sm:$0xff]  ;;  %v7267_v51 = vld [vmem:[#allocation35_spill] sm:$0xff] }
 0x39e   : > { %2897 = vmatpush1.bf16.msra.mxu1 %v6193_v13  ;;  %v6196_v16 = vpack.c.bf16 %v2772_v5, %v2770_v36  ;;  %v7268_v36 = vld [vmem:[#allocation36_spill] sm:$0xff]  ;;  %v7269_v5 = vld [vmem:[#allocation37_spill] sm:$0xff] }
 0x39f   : > { %2898 = vmatprep.subr.bf16.mxu1 %v6198_v29 }
 0x3a0   : > { %2867 = vmatprep.mubr.bf16.mxu1 %v6196_v16 }
 0x3a1   : > { %2868 = vmatmul.mubr.bf16.gmra.mrb[68].mxu1 %v6191_v2 }
 0x3a2   : > { %2899 = vmatpush1.bf16.msra.mxu1 %v6203_v47  ;;  %2910 = vmatprep.mubr.bf16.mxu1 %v7253_v8 }
 0x3a3   : > { %2900 = vmatprep.subr.bf16.mxu1 %v6207_v49 }
 0x3a6   : > { %2901 = vmatpush1.bf16.msra.mxu1 %v6210_v19 }
 0x3a7   : > { %2902 = vmatprep.subr.bf16.mxu1 %v6213_v1 }
 0x3aa   : > { %2903 = vmatpush1.bf16.msra.mxu1 %v6216_v40 }
 0x3ab   : > { %2904 = vmatprep.subr.bf16.mxu1 %v6219_v28 }
 0x3ae   : > { %2905 = vmatpush1.bf16.msra.mxu1 %v6222_v56 }
 0x3af   : > { %2906 = vmatprep.subr.bf16.mxu1 %v6225_v35 }
 0x3b2   : > { %2907 = vmatpush1.bf16.msra.mxu1 %v6228_v31 }
 0x3b3   : > { %2908 = vmatprep.subr.bf16.mxu1 %v6231_v21 }
 0x3b6   : > { %2909 = vmatpush1.bf16.msra.mxu1 %v6234_v44 }
 0x3b7   : > { %2971 = vmatprep.subr.bf16.mxu1 %v6237_v26 }
 0x3b9   : > { %2911 = vmatmul.mubr.bf16.vlgmr.msra.gmra.mrb[48].mxu1 %v7253_v8 }
 0x3ba   : > { %2920 = vmatprep.mubr.bf16.mxu1 %v6075_v33  ;;  %2972 = vmatpush1.bf16.msra.mxu1 %v6242_v9  ;;  %v6256_v33 = vld [vmem:[#allocation7 + $0x220] ss:$8 sps:$4 sm:$0xff]  }
 0x3bb   : > { %2973 = vmatprep.subr.bf16.mxu1 %v6245_v61 }
 0x3be   : > { %2974 = vmatpush1.bf16.msra.mxu1 %v6248_v63 }
 0x3bf   : > { %2975 = vmatprep.subr.bf16.mxu1 %v6251_v27 }
 0x3c1   : > { %2921 = vmatmul.mubr.bf16.gmra.mrb[52].mxu1 %v6073_v53  ;;  %v7262_v53 = vld [vmem:[#allocation30_spill] sm:$0xff] }
 0x3c2   : > { %2930 = vmatprep.mubr.bf16.mxu1 %v6094_v15  ;;  %2976 = vmatpush1.bf16.msra.mxu1 %v6256_v33 }
 0x3c3   : > { %2977 = vmatprep.subr.bf16.mxu1 %v7257_v22  ;;  %v7270_v22 = vld [vmem:[#allocation38_spill] sm:$0xff] }
 0x3c6   : > { %2978 = vmatpush1.bf16.msra.mxu1 %v7258_v34  ;;  %v7271_v34 = vld [vmem:[#allocation39_spill] sm:$0xff] }
 0x3c7   : > { %2979 = vmatprep.subr.bf16.mxu1 %v7259_v45  ;;  %v7272_v45 = vld [vmem:[#allocation40_spill] sm:$0xff] }
 0x3c9   : > { %2931 = vmatmul.mubr.bf16.gmra.mrb[56].mxu1 %v6089_v50 }
 0x3ca   : > { %2940 = vmatprep.mubr.bf16.mxu1 %v6120_v0  ;;  %2980 = vmatpush1.bf16.msra.mxu1 %v7260_v42  ;;  %v7273_v42 = vld [vmem:[#allocation41_spill] sm:$0xff] }
 0x3cb   : > { %2981 = vmatprep.subr.bf16.mxu1 %v7261_v18  ;;  %v7274_v18 = vld [vmem:[#allocation42_spill] sm:$0xff] }
 0x3ce   : > { %2982 = vmatpush1.bf16.msra.mxu1 %v7262_v53  ;;  %v7275_v53 = vld [vmem:[#allocation43_spill] sm:$0xff] }
 0x3cf   : > { %2983 = vmatprep.subr.bf16.mxu1 %v7263_v25  ;;  %v7276_v25 = vld [vmem:[#allocation44_spill] sm:$0xff] }
 0x3d1   : > { %2941 = vmatmul.mubr.bf16.gmra.mrb[60].mxu1 %v6114_v10 }
 0x3d2   : > { %2950 = vmatprep.mubr.bf16.mxu1 %v6146_v54  ;;  %2984 = vmatpush1.bf16.msra.mxu1 %v7264_v60  ;;  %v7277_v60 = vld [vmem:[#allocation45_spill] sm:$0xff] }
 0x3d3   : > { %2985 = vmatprep.subr.bf16.mxu1 %v7265_v43  ;;  %v7278_v43 = vld [vmem:[#allocation46_spill] sm:$0xff] }
 0x3d6   : > { %2986 = vmatpush1.bf16.msra.mxu1 %v7266_v12  ;;  %v7279_v12 = vld [vmem:[#allocation47_spill] sm:$0xff] }
 0x3d7   : > { %2987 = vmatprep.subr.bf16.mxu1 %v7267_v51  ;;  %v7280_v51 = vld [vmem:[#allocation48_spill] sm:$0xff] }
 0x3d9   : > { %2951 = vmatmul.mubr.bf16.gmra.mrb[64].mxu1 %v6140_v20 }
 0x3da   : > { %2960 = vmatprep.mubr.bf16.mxu1 %v6172_v3  ;;  %2988 = vmatpush1.bf16.msra.mxu1 %v7268_v36  ;;  %v7281_v36 = vld [vmem:[#allocation49_spill] sm:$0xff] }
 0x3db   : > { %2989 = vmatprep.subr.bf16.mxu1 %v7269_v5  ;;  %v7282_v5 = vld [vmem:[#allocation50_spill] sm:$0xff] }
 0x3de   : > { %2990 = vmatpush1.bf16.msra.mxu1 %v7270_v22  ;;  %v6298_v22 = vld [vmem:[#allocation7 + $0x100] ss:$8 sps:$4 sm:$0xff]  }
 0x3df   : > { %2991 = vmatprep.subr.bf16.mxu1 %v7271_v34  ;;  %7284 = vst [vmem:[#allocation18_spill] sm:$0xff] %v6298_v22  ;;  %v6301_v34 = vld [vmem:[#allocation7 + $0x114] ss:$8 sps:$4 sm:$0xff]  }
 0x3e0   : > { %7285 = vst [vmem:[#allocation19_spill] sm:$0xff] %v6301_v34 }
 0x3e1   : > { %2961 = vmatmul.mubr.bf16.gmra.mrb[68].mxu1 %v6166_v7 }
 0x3e2   : > { %2992 = vmatpush1.bf16.msra.mxu1 %v7272_v45  ;;  %3003 = vmatprep.mubr.bf16.mxu1 %v6094_v15  ;;  %v6293_v15 = vld [vmem:[#allocation7 + $0x104] ss:$8 sps:$4 sm:$0xff]   ;;  %v6304_v45 = vld [vmem:[#allocation7 + $0x110] ss:$8 sps:$4 sm:$0xff]  }
 0x3e3   : > { %2993 = vmatprep.subr.bf16.mxu1 %v7273_v42  ;;  %7283 = vst [vmem:[#allocation17_spill] sm:$0xff] %v6293_v15  ;;  %7286 = vst [vmem:[#allocation21_spill] sm:$0xff] %v6304_v45  ;;  %v6307_v42 = vld [vmem:[#allocation7 + $0x124] ss:$8 sps:$4 sm:$0xff]  }
 0x3e4   : > { %7287 = vst [vmem:[#allocation23_spill] sm:$0xff] %v6307_v42 }
 0x3e6   : > { %2994 = vmatpush1.bf16.msra.mxu1 %v7274_v18  ;;  %v6318_v18 = vld [vmem:[#allocation7 + $0x130] ss:$8 sps:$4 sm:$0xff]  }
 0x3e7   : > { %2995 = vmatprep.subr.bf16.mxu1 %v7275_v53  ;;  %7290 = vst [vmem:[#allocation29_spill] sm:$0xff] %v6318_v18  ;;  %v6321_v53 = vld [vmem:[#allocation7 + $0x144] ss:$8 sps:$4 sm:$0xff]  }
 0x3e8   : > { %7291 = vst [vmem:[#allocation51_spill] sm:$0xff] %v6321_v53 }
 0x3ea   : > { %2996 = vmatpush1.bf16.msra.mxu1 %v7276_v25  ;;  %v6332_v25 = vld [vmem:[#allocation7 + $0x150] ss:$8 sps:$4 sm:$0xff]  }
 0x3eb   : > { %2997 = vmatprep.subr.bf16.mxu1 %v7277_v60  ;;  %7294 = vst [vmem:[#allocation24_spill] sm:$0xff] %v6332_v25  ;;  %v6335_v60 = vld [vmem:[#allocation7 + $0x164] ss:$8 sps:$4 sm:$0xff]  }
 0x3ec   : > { %7295 = vst [vmem:[#allocation26_spill] sm:$0xff] %v6335_v60 }
 0x3ee   : > { %2998 = vmatpush1.bf16.msra.mxu1 %v7278_v43  ;;  %v6346_v43 = vld [vmem:[#allocation7 + $0x170] ss:$8 sps:$4 sm:$0xff]  }
 0x3ef   : > { %2999 = vmatprep.subr.bf16.mxu1 %v7279_v12  ;;  %7298 = vst [vmem:[#allocation31_spill] sm:$0xff] %v6346_v43  ;;  %v6349_v12 = vld [vmem:[#allocation7 + $0x184] ss:$8 sps:$4 sm:$0xff]  }
 0x3f0   : > { %7299 = vst [vmem:[#allocation32_spill] sm:$0xff] %v6349_v12 }
 0x3f2   : > { %3000 = vmatpush1.bf16.msra.mxu1 %v7280_v51  ;;  %v6360_v51 = vld [vmem:[#allocation7 + $0x190] ss:$8 sps:$4 sm:$0xff]  }
 0x3f3   : > { %3001 = vmatprep.subr.bf16.mxu1 %v7281_v36  ;;  %7302 = vst [vmem:[#allocation35_spill] sm:$0xff] %v6360_v51  ;;  %v6363_v36 = vld [vmem:[#allocation7 + $0x1a4] ss:$8 sps:$4 sm:$0xff]  }
 0x3f4   : > { %7303 = vst [vmem:[#allocation36_spill] sm:$0xff] %v6363_v36 }
 0x3f6   : > { %3002 = vmatpush1.bf16.msra.mxu1 %v7282_v5  ;;  %v6370_v5 = vld [vmem:[#allocation7 + $0x1b4] ss:$8 sps:$4 sm:$0xff]  }
 0x3f7   : > { %3385 = vmatprep.subr.bf16.mxu1 %v6293_v15  ;;  %7305 = vst [vmem:[#allocation38_spill] sm:$0xff] %v6370_v5 }
 0x3f9   : > { %3004 = vmatmul.mubr.bf16.vlgmr.msra.gmra.mrb[48].mxu1 %v6089_v50  ;;  %v6312_v50 = vld [vmem:[#allocation7 + $0x120] ss:$8 sps:$4 sm:$0xff]  }
 0x3fa   : > { %3013 = vmatprep.mubr.bf16.mxu1 %v6120_v0  ;;  %3386 = vmatpush1.bf16.msra.mxu1 %v6298_v22  ;;  %7288 = vst [vmem:[#allocation25_spill] sm:$0xff] %v6312_v50  ;;  %v6315_v0 = vld [vmem:[#allocation7 + $0x134] ss:$8 sps:$4 sm:$0xff]  }
 0x3fb   : > { %3387 = vmatprep.subr.bf16.mxu1 %v6301_v34  ;;  %7289 = vst [vmem:[#allocation27_spill] sm:$0xff] %v6315_v0 }
 0x3fe   : > { %3388 = vmatpush1.bf16.msra.mxu1 %v6304_v45 }
 0x3ff   : > { %3389 = vmatprep.subr.bf16.mxu1 %v6307_v42 }
 0x401   : > { %3014 = vmatmul.mubr.bf16.gmra.mrb[52].mxu1 %v6114_v10  ;;  %v6326_v10 = vld [vmem:[#allocation7 + $0x140] ss:$8 sps:$4 sm:$0xff]  }
 0x402   : > { %3023 = vmatprep.mubr.bf16.mxu1 %v6146_v54  ;;  %3390 = vmatpush1.bf16.msra.mxu1 %v6312_v50  ;;  %7292 = vst [vmem:[#allocation20_spill] sm:$0xff] %v6326_v10  ;;  %v6329_v54 = vld [vmem:[#allocation7 + $0x154] ss:$8 sps:$4 sm:$0xff]  }
 0x403   : > { %3391 = vmatprep.subr.bf16.mxu1 %v6315_v0  ;;  %7293 = vst [vmem:[#allocation22_spill] sm:$0xff] %v6329_v54 }
 0x406   : > { %3392 = vmatpush1.bf16.msra.mxu1 %v6318_v18 }
 0x407   : > { %3393 = vmatprep.subr.bf16.mxu1 %v6321_v53 }
 0x409   : > { %3024 = vmatmul.mubr.bf16.gmra.mrb[56].mxu1 %v6140_v20  ;;  %v6340_v20 = vld [vmem:[#allocation7 + $0x160] ss:$8 sps:$4 sm:$0xff]  }
 0x40a   : > { %3033 = vmatprep.mubr.bf16.mxu1 %v6172_v3  ;;  %3394 = vmatpush1.bf16.msra.mxu1 %v6326_v10  ;;  %7296 = vst [vmem:[#allocation28_spill] sm:$0xff] %v6340_v20  ;;  %v6343_v3 = vld [vmem:[#allocation7 + $0x174] ss:$8 sps:$4 sm:$0xff]  }
 0x40b   : > { %3395 = vmatprep.subr.bf16.mxu1 %v6329_v54  ;;  %7297 = vst [vmem:[#allocation30_spill] sm:$0xff] %v6343_v3 }
 0x40e   : > { %3396 = vmatpush1.bf16.msra.mxu1 %v6332_v25 }
 0x40f   : > { %3397 = vmatprep.subr.bf16.mxu1 %v6335_v60 }
 0x411   : > { %3034 = vmatmul.mubr.bf16.gmra.mrb[60].mxu1 %v6166_v7  ;;  %v6354_v7 = vld [vmem:[#allocation7 + $0x180] ss:$8 sps:$4 sm:$0xff]  }
 0x412   : > { %3043 = vmatprep.mubr.bf16.mxu1 %v6196_v16  ;;  %3398 = vmatpush1.bf16.msra.mxu1 %v6340_v20  ;;  %7300 = vst [vmem:[#allocation33_spill] sm:$0xff] %v6354_v7  ;;  %v6357_v16 = vld [vmem:[#allocation7 + $0x194] ss:$8 sps:$4 sm:$0xff]  }
 0x413   : > { %3399 = vmatprep.subr.bf16.mxu1 %v6343_v3  ;;  %7301 = vst [vmem:[#allocation34_spill] sm:$0xff] %v6357_v16 }
 0x416   : > { %3400 = vmatpush1.bf16.msra.mxu1 %v6346_v43 }
 0x417   : > { %3401 = vmatprep.subr.bf16.mxu1 %v6349_v12 }
 0x419   : > { %3044 = vmatmul.mubr.bf16.gmra.mrb[64].mxu1 %v6191_v2  ;;  %v6367_v2 = vld [vmem:[#allocation7 + $0x1a0] ss:$8 sps:$4 sm:$0xff]  }
 0x41a   : > { %3053 = vmatprep.mubr.bf16.mxu1 %v7253_v8  ;;  %3402 = vmatpush1.bf16.msra.mxu1 %v6354_v7  ;;  %7304 = vst [vmem:[#allocation37_spill] sm:$0xff] %v6367_v2  ;;  %v6373_v7 = vld [vmem:[#allocation7 + $0x1b0] ss:$8 sps:$4 sm:$0xff]  }
 0x41b   : > { %3403 = vmatprep.subr.bf16.mxu1 %v6357_v16  ;;  %7306 = vst [vmem:[#allocation39_spill] sm:$0xff] %v6373_v7  ;;  %v6376_v16 = vld [vmem:[#allocation7 + $0x1c4] ss:$8 sps:$4 sm:$0xff]  }
 0x41c   : > { %7307 = vst [vmem:[#allocation40_spill] sm:$0xff] %v6376_v16 }
 0x41e   : > { %3404 = vmatpush1.bf16.msra.mxu1 %v6360_v51  ;;  %v6379_v51 = vld [vmem:[#allocation7 + $0x1c0] ss:$8 sps:$4 sm:$0xff]  }
 0x41f   : > { %3405 = vmatprep.subr.bf16.mxu1 %v6363_v36  ;;  %7308 = vst [vmem:[#allocation41_spill] sm:$0xff] %v6379_v51  ;;  %v6382_v36 = vld [vmem:[#allocation7 + $0x1d4] ss:$8 sps:$4 sm:$0xff]  }
 0x420   : > { %7309 = vst [vmem:[#allocation42_spill] sm:$0xff] %v6382_v36 }
 0x421   : > { %3054 = vmatmul.mubr.bf16.gmra.mrb[68].mxu1 %v7253_v8 }
 0x422   : > { %3406 = vmatpush1.bf16.msra.mxu1 %v6367_v2  ;;  %v6385_v2 = vld [vmem:[#allocation7 + $0x1d0] ss:$8 sps:$4 sm:$0xff]  }
 0x423   : > { %3407 = vmatprep.subr.bf16.mxu1 %v6370_v5  ;;  %7310 = vst [vmem:[#allocation43_spill] sm:$0xff] %v6385_v2  ;;  %v6388_v5 = vld [vmem:[#allocation7 + $0x1e4] ss:$8 sps:$4 sm:$0xff]  }
 0x424   : > { %7311 = vst [vmem:[#allocation44_spill] sm:$0xff] %v6388_v5 }
 0x426   : > { %3408 = vmatpush1.bf16.msra.mxu1 %v6373_v7  ;;  %v6391_v7 = vld [vmem:[#allocation7 + $0x1e0] ss:$8 sps:$4 sm:$0xff]  }
 0x427   : > { %3409 = vmatprep.subr.bf16.mxu1 %v6376_v16  ;;  %7312 = vst [vmem:[#allocation45_spill] sm:$0xff] %v6391_v7  ;;  %v6394_v16 = vld [vmem:[#allocation7 + $0x1f4] ss:$8 sps:$4 sm:$0xff]  }
 0x428   : > { %7313 = vst [vmem:[#allocation46_spill] sm:$0xff] %v6394_v16 }
 0x42a   : > { %3410 = vmatpush1.bf16.msra.mxu1 %v6379_v51  ;;  %v6397_v51 = vld [vmem:[#allocation7 + $0x1f0] ss:$8 sps:$4 sm:$0xff]  }
 0x42b   : > { %3411 = vmatprep.subr.bf16.mxu1 %v6382_v36  ;;  %7314 = vst [vmem:[#allocation47_spill] sm:$0xff] %v6397_v51 }
 0x42e   : > { %3412 = vmatpush1.bf16.msra.mxu1 %v6385_v2 }
 0x42f   : > { %3413 = vmatprep.subr.bf16.mxu1 %v6388_v5 }
 0x432   : > { %3414 = vmatpush1.bf16.msra.mxu1 %v6391_v7 }
 0x433   : > { %3415 = vmatprep.subr.bf16.mxu1 %v6394_v16 }
 0x436   : > { %3416 = vmatpush1.bf16.msra.mxu1 %v6397_v51 }
 0x437   : > { %3448 = vmatprep.subr.bf16.mxu1 %v6005_v4 }
 0x4cc   : > { %v3005_v36 = vpop.f32.mrb[48].mxu1 }
 0x4cd   : > { %v3007_v2 = vpop.f32.mrb[49].mxu1  ;;  %v3088_v5 = vadd.f32 %v3005_v36, %v6055_v59 }
 0x4ce   : > { %v3009_v12 = vpop.f32.mrb[50].mxu1  ;;  %v3089_v60 = vadd.f32 %v3007_v2, %v6059_v57 }
 0x4cf   : > { %v3011_v43 = vpop.f32.mrb[51].mxu1  ;;  %v3090_v54 = vadd.f32 %v3009_v12, %v6055_v59 }
 0x4d0   : > { %v3091_v53 = vadd.f32 %v3011_v43, %v6059_v57 }
 0x4d4   : > { %v3015_v3 = vpop.f32.mrb[52].mxu1 }
 0x4d5   : > { %v3092_v20 = vadd.f32 %v3015_v3, %v6055_v59  ;;  %v3017_v7 = vpop.f32.mrb[53].mxu1 }
 0x4d6   : > { %v3093_v16 = vadd.f32 %v3017_v7, %v6059_v57  ;;  %v3019_v25 = vpop.f32.mrb[54].mxu1 }
 0x4d7   : > { %v3112_v51 = vmax.f32 %v3088_v5, %v3092_v20  ;;  %v3094_v4 = vadd.f32 %v3019_v25, %v6055_v59  ;;  %v3021_v10 = vpop.f32.mrb[55].mxu1 }
 0x4d8   : > { %v3113_v18 = vmax.f32 %v3089_v60, %v3093_v16  ;;  %v3095_v0 = vadd.f32 %v3021_v10, %v6059_v57 }
 0x4d9   : > { %v3114_v36 = vmax.f32 %v3090_v54, %v3094_v4 }
 0x4da   : > { %v3115_v50 = vmax.f32 %v3091_v53, %v3095_v0 }
 0x4dc   : > { %v3025_v3 = vpop.f32.mrb[56].mxu1 }
 0x4dd   : > { %v3096_v42 = vadd.f32 %v3025_v3, %v6055_v59  ;;  %v3027_v2 = vpop.f32.mrb[57].mxu1 }
 0x4de   : > { %v3097_v7 = vadd.f32 %v3027_v2, %v6059_v57  ;;  %v3029_v45 = vpop.f32.mrb[58].mxu1 }
 0x4df   : > { %v6411_v34 = vmax.f32 %v3112_v51, %v3096_v42  ;;  %v3098_v20 = vadd.f32 %v3029_v45, %v6055_v59  ;;  %v3031_v25 = vpop.f32.mrb[59].mxu1 }
 0x4e0   : > { %v6414_v12 = vmax.f32 %v3113_v18, %v3097_v7  ;;  %v3099_v60 = vadd.f32 %v3031_v25, %v6059_v57 }
 0x4e1   : > { %7315 = vst [vmem:[#allocation48_spill] sm:$0xff] %v6411_v34  ;;  %v6417_v43 = vmax.f32 %v3114_v36, %v3098_v20  ;;  %v3136_v16 = vmax.f32 %v6411_v34, 0.0 }
 0x4e2   : > { %7316 = vst [vmem:[#allocation49_spill] sm:$0xff] %v6414_v12  ;;  %v6419_v4 = vmax.f32 %v3115_v50, %v3099_v60  ;;  %v3137_v53 = vmax.f32 %v6414_v12, 0.0 }
 0x4e3   : > { %7317 = vst [vmem:[#allocation50_spill] sm:$0xff] %v6417_v43  ;;  %v3138_v0 = vmax.f32 %v6417_v43, 0.0 }
 0x4e4   : > { %7318 = vst [vmem:[#allocation52_spill] sm:$0xff] %v6419_v4  ;;  %v3139_v10 = vmax.f32 %v6419_v4, 0.0  ;;  %v3035_v54 = vpop.f32.mrb[60].mxu1 }
 0x4e5   : > { %v3100_v45 = vadd.f32 %v3035_v54, %v6055_v59  ;;  %v3037_v51 = vpop.f32.mrb[61].mxu1  ;;  %v6429_v36 = vpack.c.bf16 %v3138_v0, %v3136_v16 }
 0x4e6   : > { %v3101_v18 = vadd.f32 %v3037_v51, %v6059_v57  ;;  %v3039_v5 = vpop.f32.mrb[62].mxu1  ;;  %v6427_v3 = vpack.c.bf16 %v3139_v10, %v3137_v53 }
 0x4e7   : > { %v3116_v50 = vmax.f32 %v3096_v42, %v3100_v45  ;;  %v3102_v2 = vadd.f32 %v3039_v5, %v6055_v59  ;;  %v3041_v25 = vpop.f32.mrb[63].mxu1 }
 0x4e8   : > { %v3117_v43 = vmax.f32 %v3097_v7, %v3101_v18  ;;  %v3103_v4 = vadd.f32 %v3041_v25, %v6059_v57  ;;  %3186 = vmatprep.mubr.bf16.mxu0 %v6427_v3 }
 0x4e9   : > { %v3118_v12 = vmax.f32 %v3098_v20, %v3102_v2  ;;  %3187 = vmatmul.mubr.bf16.vlgmr.msra.gmra.mrb[72].mxu0 %v6429_v36 }
 0x4ea   : > { %v3119_v54 = vmax.f32 %v3099_v60, %v3103_v4  ;;  %3218 = vmatpush1.bf16.msra.mxu0 %v6083_v62 }
 0x4eb   : > { %3219 = vmatprep.subr.bf16.mxu0 %v6086_v14 }
 0x4ec   : > { %v3045_v53 = vpop.f32.mrb[64].mxu1 }
 0x4ed   : > { %v3104_v0 = vadd.f32 %v3045_v53, %v6055_v59  ;;  %v3047_v42 = vpop.f32.mrb[65].mxu1 }
 0x4ee   : > { %v3105_v10 = vadd.f32 %v3047_v42, %v6059_v57  ;;  %3220 = vmatpush1.bf16.msra.mxu0 %v6091_v55  ;;  %v3049_v7 = vpop.f32.mrb[66].mxu1 }
 0x4ef   : > { %v6440_v16 = vmax.f32 %v3116_v50, %v3104_v0  ;;  %v3106_v20 = vadd.f32 %v3049_v7, %v6055_v59  ;;  %v3051_v45 = vpop.f32.mrb[67].mxu1  ;;  %3221 = vmatprep.subr.bf16.mxu0 %v6098_v17 }
 0x4f0   : > { %v6444_v60 = vmax.f32 %v3117_v43, %v3105_v10  ;;  %v3107_v4 = vadd.f32 %v3051_v45, %v6059_v57 }
 0x4f1   : > { %7319 = vst [vmem:[#allocation53_spill] sm:$0xff] %v6440_v16  ;;  %v6447_v51 = vmax.f32 %v3118_v12, %v3106_v20  ;;  %v3140_v43 = vmax.f32 %v6440_v16, 0.0 }
 0x4f2   : > { %7320 = vst [vmem:[#allocation54_spill] sm:$0xff] %v6444_v60  ;;  %v6449_v18 = vmax.f32 %v3119_v54, %v3107_v4  ;;  %3222 = vmatpush1.bf16.msra.mxu0 %v6107_v37  ;;  %v3141_v50 = vmax.f32 %v6444_v60, 0.0 }
 0x4f3   : > { %7321 = vst [vmem:[#allocation55_spill] sm:$0xff] %v6447_v51  ;;  %v3142_v5 = vmax.f32 %v6447_v51, 0.0  ;;  %3223 = vmatprep.subr.bf16.mxu0 %v6110_v11 }
 0x4f4   : > { %7322 = vst [vmem:[#allocation56_spill] sm:$0xff] %v6449_v18  ;;  %v3143_v2 = vmax.f32 %v6449_v18, 0.0  ;;  %v3055_v25 = vpop.f32.mrb[68].mxu1 }
 0x4f5   : > { %v3108_v53 = vadd.f32 %v3055_v25, %v6055_v59  ;;  %v3057_v42 = vpop.f32.mrb[69].mxu1  ;;  %v6464_v18 = vpack.c.bf16 %v3142_v5, %v3140_v43  ;;  %v6524_v43 = vld [vmem:[#allocation7 + $0x230] ss:$8 sps:$4 sm:$0xff]  }
 0x4f6   : > { %v3109_v12 = vadd.f32 %v3057_v42, %v6059_v57  ;;  %3224 = vmatpush1.bf16.msra.mxu0 %v6117_v38  ;;  %v3059_v54 = vpop.f32.mrb[70].mxu1  ;;  %v6460_v7 = vpack.c.bf16 %v3143_v2, %v3141_v50 }
 0x4f7   : > { %v3120_v45 = vmax.f32 %v3104_v0, %v3108_v53  ;;  %v3110_v51 = vadd.f32 %v3059_v54, %v6055_v59  ;;  %v3061_v34 = vpop.f32.mrb[71].mxu1  ;;  %3225 = vmatprep.subr.bf16.mxu0 %v6124_v6  ;;  %v6531_v53 = vld [vmem:[#allocation7 + $0x240] ss:$8 sps:$4 sm:$0xff]   ;;  %v6541_v54 = vld [vmem:[#allocation7 + $0x264] ss:$8 sps:$4 sm:$0xff]  }
 0x4f8   : > { %v3121_v60 = vmax.f32 %v3105_v10, %v3109_v12  ;;  %v3111_v16 = vadd.f32 %v3061_v34, %v6059_v57  ;;  %3196 = vmatprep.mubr.bf16.mxu0 %v6460_v7  ;;  %v6538_v12 = vld [vmem:[#allocation7 + $0x250] ss:$8 sps:$4 sm:$0xff]  }
 0x4f9   : > { %v3122_v25 = vmax.f32 %v3106_v20, %v3110_v51  ;;  %3197 = vmatmul.mubr.bf16.gmra.mrb[76].mxu0 %v6464_v18  ;;  %v6472_v0 = vmax.f32 %v3120_v45, 0.0  ;;  %v6521_v51 = vld [vmem:[#allocation7 + $0x234] ss:$8 sps:$4 sm:$0xff]   ;;  %v6544_v45 = vld [vmem:[#allocation7 + $0x260] ss:$8 sps:$4 sm:$0xff]  }
 0x4fa   : > { %v6469_v42 = vmax.f32 %v3121_v60, 0.0  ;;  %v3123_v50 = vmax.f32 %v3107_v4, %v3111_v16  ;;  %3226 = vmatpush1.bf16.msra.mxu0 %v6133_v46  ;;  %7327 = vst [vmem:[#allocation61_spill] sm:$0xff] %v6544_v45 }
 0x4fb   : > { %7324 = vst [vmem:[#allocation58_spill] sm:$0xff] %v6472_v0  ;;  %v6474_v2 = vmax.f32 %v3122_v25, 0.0  ;;  %3227 = vmatprep.subr.bf16.mxu0 %v6136_v52  ;;  %v3144_v16 = vmax.f32 %v6472_v0, 0.0  ;;  %v6547_v25 = vld [vmem:[#allocation7 + $0x274] ss:$8 sps:$4 sm:$0xff]  }
 0x4fc   : > { %7323 = vst [vmem:[#allocation57_spill] sm:$0xff] %v6469_v42  ;;  %v6477_v5 = vmax.f32 %v3123_v50, 0.0  ;;  %v3145_v10 = vmax.f32 %v6469_v42, 0.0  ;;  %7328 = vst [vmem:[#allocation62_spill] sm:$0xff] %v6547_v25  ;;  %v6553_v50 = vld [vmem:[#allocation7 + $0x284] ss:$8 sps:$4 sm:$0xff]  }
 0x4fd   : > { %7325 = vst [vmem:[#allocation59_spill] sm:$0xff] %v6474_v2  ;;  %v3146_v34 = vmax.f32 %v6474_v2, 0.0  ;;  %7330 = vst [vmem:[#allocation64_spill] sm:$0xff] %v6553_v50  ;;  %v6571_v2 = vld [vmem:[#allocation7 + $0x2b4] ss:$8 sps:$4 sm:$0xff]  }
 0x4fe   : > { %7326 = vst [vmem:[#allocation60_spill] sm:$0xff] %v6477_v5  ;;  %v3147_v20 = vmax.f32 %v6477_v5, 0.0  ;;  %3228 = vmatpush1.bf16.msra.mxu0 %v6143_v23  ;;  %v6568_v5 = vld [vmem:[#allocation7 + $0x2a0] ss:$8 sps:$4 sm:$0xff]   ;;  %7336 = vst [vmem:[#allocation70_spill] sm:$0xff] %v6571_v2 }
 0x4ff   : > { %3229 = vmatprep.subr.bf16.mxu0 %v6150_v32  ;;  %v6487_v4 = vpack.c.bf16 %v3146_v34, %v3144_v16  ;;  %v6556_v34 = vld [vmem:[#allocation7 + $0x280] ss:$8 sps:$4 sm:$0xff]   ;;  %v6565_v16 = vld [vmem:[#allocation7 + $0x2a4] ss:$8 sps:$4 sm:$0xff]   ;;  %7335 = vst [vmem:[#allocation69_spill] sm:$0xff] %v6568_v5 }
 0x500   : > { %v6485_v60 = vpack.c.bf16 %v3147_v20, %v3145_v10  ;;  %7331 = vst [vmem:[#allocation65_spill] sm:$0xff] %v6556_v34  ;;  %v6559_v10 = vld [vmem:[#allocation7 + $0x294] ss:$8 sps:$4 sm:$0xff]   ;;  %v6562_v20 = vld [vmem:[#allocation7 + $0x290] ss:$8 sps:$4 sm:$0xff]   ;;  %7334 = vst [vmem:[#allocation68_spill] sm:$0xff] %v6565_v16 }
 0x501   : > { %7332 = vst [vmem:[#allocation66_spill] sm:$0xff] %v6559_v10  ;;  %7333 = vst [vmem:[#allocation67_spill] sm:$0xff] %v6562_v20  ;;  %v6574_v42 = vld [vmem:[#allocation7 + $0x2b0] ss:$8 sps:$4 sm:$0xff]   ;;  %v6577_v0 = vld [vmem:[#allocation7 + $0x2c4] ss:$8 sps:$4 sm:$0xff]  }
 0x502   : > { %3230 = vmatpush1.bf16.msra.mxu0 %v6159_v41  ;;  %3206 = vmatprep.mubr.bf16.mxu0 %v6485_v60  ;;  %7337 = vst [vmem:[#allocation71_spill] sm:$0xff] %v6574_v42  ;;  %7338 = vst [vmem:[#allocation72_spill] sm:$0xff] %v6577_v0 }
 0x503   : > { %3207 = vmatmul.mubr.bf16.gmra.mrb[80].mxu0 %v6487_v4  ;;  %3231 = vmatprep.subr.bf16.mxu0 %v6162_v39 }
 0x504   : > { %3249 = vmatprep.mubr.bf16.mxu0 %v7253_v8 }
 0x506   : > { %3232 = vmatpush1.bf16.msra.mxu0 %v6169_v48 }
 0x507   : > { %3233 = vmatprep.subr.bf16.mxu0 %v6176_v30 }
 0x50a   : > { %3234 = vmatpush1.bf16.msra.mxu0 %v6185_v24 }
 0x50b   : > { %3235 = vmatprep.subr.bf16.mxu0 %v6188_v58 }
 0x50e   : > { %3236 = vmatpush1.bf16.msra.mxu0 %v6193_v13 }
 0x50f   : > { %3237 = vmatprep.subr.bf16.mxu0 %v6198_v29 }
 0x512   : > { %3238 = vmatpush1.bf16.msra.mxu0 %v6203_v47 }
 0x513   : > { %3239 = vmatprep.subr.bf16.mxu0 %v6207_v49 }
 0x516   : > { %3240 = vmatpush1.bf16.msra.mxu0 %v6210_v19 }
 0x517   : > { %3241 = vmatprep.subr.bf16.mxu0 %v6213_v1 }
 0x51a   : > { %3242 = vmatpush1.bf16.msra.mxu0 %v6216_v40 }
 0x51b   : > { %3243 = vmatprep.subr.bf16.mxu0 %v6219_v28 }
 0x51e   : > { %3244 = vmatpush1.bf16.msra.mxu0 %v6222_v56 }
 0x51f   : > { %3245 = vmatprep.subr.bf16.mxu0 %v6225_v35 }
 0x522   : > { %3246 = vmatpush1.bf16.msra.mxu0 %v6228_v31 }
 0x523   : > { %3247 = vmatprep.subr.bf16.mxu0 %v6231_v21 }
 0x526   : > { %3248 = vmatpush1.bf16.msra.mxu0 %v6234_v44 }
 0x527   : > { %3280 = vmatprep.subr.bf16.mxu0 %v6237_v26 }
 0x529   : > { %3250 = vmatmul.mubr.bf16.vlgmr.msra.gmra.mrb[72].mxu0 %v7253_v8 }
 0x52a   : > { %3259 = vmatprep.mubr.bf16.mxu0 %v6427_v3  ;;  %3281 = vmatpush1.bf16.msra.mxu0 %v6242_v9  ;;  %v6527_v3 = vld [vmem:[#allocation7 + $0x244] ss:$8 sps:$4 sm:$0xff]  }
 0x52b   : > { %3282 = vmatprep.subr.bf16.mxu0 %v6245_v61 }
 0x52e   : > { %3283 = vmatpush1.bf16.msra.mxu0 %v6248_v63 }
 0x52f   : > { %3284 = vmatprep.subr.bf16.mxu0 %v6251_v27 }
 0x531   : > { %3260 = vmatmul.mubr.bf16.gmra.mrb[76].mxu0 %v6429_v36  ;;  %v6535_v36 = vld [vmem:[#allocation7 + $0x254] ss:$8 sps:$4 sm:$0xff]  }
 0x532   : > { %3269 = vmatprep.mubr.bf16.mxu0 %v6460_v7  ;;  %3285 = vmatpush1.bf16.msra.mxu0 %v6256_v33 }
 0x533   : > { %3286 = vmatprep.subr.bf16.mxu0 %v6521_v51 }
 0x536   : > { %3287 = vmatpush1.bf16.msra.mxu0 %v6524_v43 }
 0x537   : > { %3288 = vmatprep.subr.bf16.mxu0 %v6527_v3 }
 0x539   : > { %3270 = vmatmul.mubr.bf16.gmra.mrb[80].mxu0 %v6464_v18 }
 0x53a   : > { %3289 = vmatpush1.bf16.msra.mxu0 %v6531_v53  ;;  %3312 = vmatprep.mubr.bf16.mxu0 %v6460_v7  ;;  %v6550_v7 = vld [vmem:[#allocation7 + $0x270] ss:$8 sps:$4 sm:$0xff]  }
 0x53b   : > { %3290 = vmatprep.subr.bf16.mxu0 %v6535_v36  ;;  %7329 = vst [vmem:[#allocation63_spill] sm:$0xff] %v6550_v7 }
 0x53e   : > { %3291 = vmatpush1.bf16.msra.mxu0 %v6538_v12 }
 0x53f   : > { %3292 = vmatprep.subr.bf16.mxu0 %v6541_v54 }
 0x542   : > { %3293 = vmatpush1.bf16.msra.mxu0 %v6544_v45 }
 0x543   : > { %3294 = vmatprep.subr.bf16.mxu0 %v6547_v25 }
 0x546   : > { %3295 = vmatpush1.bf16.msra.mxu0 %v6550_v7 }
 0x547   : > { %3296 = vmatprep.subr.bf16.mxu0 %v6553_v50 }
 0x54a   : > { %3297 = vmatpush1.bf16.msra.mxu0 %v6556_v34 }
 0x54b   : > { %3298 = vmatprep.subr.bf16.mxu0 %v6559_v10 }
 0x54e   : > { %3299 = vmatpush1.bf16.msra.mxu0 %v6562_v20  ;;  %v6580_v20 = vld [vmem:[#allocation7 + $0x2c0] ss:$8 sps:$4 sm:$0xff]  }
 0x54f   : > { %3300 = vmatprep.subr.bf16.mxu0 %v6565_v16  ;;  %7339 = vst [vmem:[#allocation73_spill] sm:$0xff] %v6580_v20  ;;  %v6583_v16 = vld [vmem:[#allocation7 + $0x2d4] ss:$8 sps:$4 sm:$0xff]  }
 0x550   : > { %7340 = vst [vmem:[#allocation74_spill] sm:$0xff] %v6583_v16 }
 0x552   : > { %3301 = vmatpush1.bf16.msra.mxu0 %v6568_v5  ;;  %v6586_v5 = vld [vmem:[#allocation7 + $0x2d0] ss:$8 sps:$4 sm:$0xff]  }
 0x553   : > { %3302 = vmatprep.subr.bf16.mxu0 %v6571_v2  ;;  %7341 = vst [vmem:[#allocation75_spill] sm:$0xff] %v6586_v5  ;;  %v6589_v2 = vld [vmem:[#allocation7 + $0x2e4] ss:$8 sps:$4 sm:$0xff]  }
 0x554   : > { %7342 = vst [vmem:[#allocation76_spill] sm:$0xff] %v6589_v2 }
 0x556   : > { %3303 = vmatpush1.bf16.msra.mxu0 %v6574_v42  ;;  %v6592_v42 = vld [vmem:[#allocation7 + $0x2e0] ss:$8 sps:$4 sm:$0xff]  }
 0x557   : > { %3304 = vmatprep.subr.bf16.mxu0 %v6577_v0  ;;  %7343 = vst [vmem:[#allocation77_spill] sm:$0xff] %v6592_v42  ;;  %v6595_v0 = vld [vmem:[#allocation7 + $0x2f4] ss:$8 sps:$4 sm:$0xff]  }
 0x558   : > { %7344 = vst [vmem:[#allocation78_spill] sm:$0xff] %v6595_v0 }
 0x55a   : > { %3305 = vmatpush1.bf16.msra.mxu0 %v6580_v20  ;;  %v6598_v20 = vld [vmem:[#allocation7 + $0x2f0] ss:$8 sps:$4 sm:$0xff]  }
 0x55b   : > { %3306 = vmatprep.subr.bf16.mxu0 %v6583_v16  ;;  %7345 = vst [vmem:[#allocation79_spill] sm:$0xff] %v6598_v20  ;;  %v7363_v16 = vld [vmem:[#allocation35_spill] sm:$0xff] }
 0x55e   : > { %3307 = vmatpush1.bf16.msra.mxu0 %v6586_v5  ;;  %v7347_v5 = vld [vmem:[#allocation21_spill] sm:$0xff] }
 0x55f   : > { %3308 = vmatprep.subr.bf16.mxu0 %v6589_v2  ;;  %v7346_v2 = vld [vmem:[#allocation19_spill] sm:$0xff] }
 0x562   : > { %3309 = vmatpush1.bf16.msra.mxu0 %v6592_v42  ;;  %v7348_v42 = vld [vmem:[#allocation23_spill] sm:$0xff] }
 0x563   : > { %3310 = vmatprep.subr.bf16.mxu0 %v6595_v0  ;;  %v7349_v0 = vld [vmem:[#allocation25_spill] sm:$0xff] }
 0x566   : > { %3311 = vmatpush1.bf16.msra.mxu0 %v6598_v20  ;;  %v7350_v20 = vld [vmem:[#allocation27_spill] sm:$0xff] }
 0x567   : > { %3624 = vmatprep.subr.bf16.mxu0 %v6293_v15  ;;  %v7351_v15 = vld [vmem:[#allocation29_spill] sm:$0xff] }
 0x569   : > { %3313 = vmatmul.mubr.bf16.vlgmr.msra.gmra.mrb[72].mxu0 %v6464_v18  ;;  %v7352_v18 = vld [vmem:[#allocation51_spill] sm:$0xff] }
 0x56a   : > { %3322 = vmatprep.mubr.bf16.mxu0 %v6485_v60  ;;  %3625 = vmatpush1.bf16.msra.mxu0 %v6298_v22  ;;  %v7353_v60 = vld [vmem:[#allocation20_spill] sm:$0xff]  ;;  %v7358_v22 = vld [vmem:[#allocation30_spill] sm:$0xff] }
 0x56b   : > { %3626 = vmatprep.subr.bf16.mxu0 %v7346_v2  ;;  %v7354_v2 = vld [vmem:[#allocation22_spill] sm:$0xff] }
 0x56e   : > { %3627 = vmatpush1.bf16.msra.mxu0 %v7347_v5  ;;  %v7355_v5 = vld [vmem:[#allocation24_spill] sm:$0xff] }
 0x56f   : > { %3628 = vmatprep.subr.bf16.mxu0 %v7348_v42  ;;  %v7356_v42 = vld [vmem:[#allocation26_spill] sm:$0xff] }
 0x571   : > { %3323 = vmatmul.mubr.bf16.gmra.mrb[76].mxu0 %v6487_v4  ;;  %v7357_v4 = vld [vmem:[#allocation28_spill] sm:$0xff] }
 0x572   : > { %3332 = vmatprep.mubr.bf16.mxu0 %v7253_v8  ;;  %3629 = vmatpush1.bf16.msra.mxu0 %v7349_v0  ;;  %v7359_v0 = vld [vmem:[#allocation31_spill] sm:$0xff] }
 0x573   : > { %3630 = vmatprep.subr.bf16.mxu0 %v7350_v20  ;;  %v7360_v20 = vld [vmem:[#allocation32_spill] sm:$0xff] }
 0x576   : > { %3631 = vmatpush1.bf16.msra.mxu0 %v7351_v15  ;;  %v7361_v15 = vld [vmem:[#allocation33_spill] sm:$0xff] }
 0x577   : > { %3632 = vmatprep.subr.bf16.mxu0 %v7352_v18  ;;  %v7362_v18 = vld [vmem:[#allocation34_spill] sm:$0xff] }
 0x579   : > { %3333 = vmatmul.mubr.bf16.gmra.mrb[80].mxu0 %v7253_v8 }
 0x57a   : > { %3633 = vmatpush1.bf16.msra.mxu0 %v7353_v60  ;;  %v7364_v60 = vld [vmem:[#allocation36_spill] sm:$0xff] }
 0x57b   : > { %3634 = vmatprep.subr.bf16.mxu0 %v7354_v2  ;;  %v7365_v2 = vld [vmem:[#allocation37_spill] sm:$0xff] }
 0x57e   : > { %3635 = vmatpush1.bf16.msra.mxu0 %v7355_v5  ;;  %v7366_v5 = vld [vmem:[#allocation38_spill] sm:$0xff] }
 0x57f   : > { %3636 = vmatprep.subr.bf16.mxu0 %v7356_v42  ;;  %v7367_v42 = vld [vmem:[#allocation39_spill] sm:$0xff] }
 0x582   : > { %3637 = vmatpush1.bf16.msra.mxu0 %v7357_v4  ;;  %v7368_v4 = vld [vmem:[#allocation40_spill] sm:$0xff] }
 0x583   : > { %3638 = vmatprep.subr.bf16.mxu0 %v7358_v22  ;;  %v7369_v22 = vld [vmem:[#allocation41_spill] sm:$0xff] }
 0x586   : > { %3639 = vmatpush1.bf16.msra.mxu0 %v7359_v0  ;;  %v7370_v0 = vld [vmem:[#allocation42_spill] sm:$0xff] }
 0x587   : > { %3640 = vmatprep.subr.bf16.mxu0 %v7360_v20  ;;  %v7371_v20 = vld [vmem:[#allocation43_spill] sm:$0xff] }
 0x58a   : > { %3641 = vmatpush1.bf16.msra.mxu0 %v7361_v15  ;;  %v7372_v15 = vld [vmem:[#allocation44_spill] sm:$0xff] }
 0x58b   : > { %3642 = vmatprep.subr.bf16.mxu0 %v7362_v18  ;;  %v7373_v18 = vld [vmem:[#allocation45_spill] sm:$0xff] }
 0x58e   : > { %3643 = vmatpush1.bf16.msra.mxu0 %v7363_v16  ;;  %v7374_v16 = vld [vmem:[#allocation46_spill] sm:$0xff] }
 0x58f   : > { %3644 = vmatprep.subr.bf16.mxu0 %v7364_v60  ;;  %v7375_v60 = vld [vmem:[#allocation47_spill] sm:$0xff] }
 0x592   : > { %3645 = vmatpush1.bf16.msra.mxu0 %v7365_v2  ;;  %v7376_v2 = vld [vmem:[#allocation16_spill] sm:$0xff] }
 0x593   : > { %3646 = vmatprep.subr.bf16.mxu0 %v7366_v5 }
 0x596   : > { %3647 = vmatpush1.bf16.msra.mxu0 %v7367_v42 }
 0x597   : > { %3648 = vmatprep.subr.bf16.mxu0 %v7368_v4 }
 0x59a   : > { %3649 = vmatpush1.bf16.msra.mxu0 %v7369_v22 }
 0x59b   : > { %3650 = vmatprep.subr.bf16.mxu0 %v7370_v0 }
 0x59e   : > { %3651 = vmatpush1.bf16.msra.mxu0 %v7371_v20 }
 0x59f   : > { %3652 = vmatprep.subr.bf16.mxu0 %v7372_v15 }
 0x5a2   : > { %3653 = vmatpush1.bf16.msra.mxu0 %v7373_v18 }
 0x5a3   : > { %3654 = vmatprep.subr.bf16.mxu0 %v7374_v16 }
 0x5a6   : > { %3655 = vmatpush1.bf16.msra.mxu0 %v7375_v60 }
 0x5a7   : > { %3667 = vmatprep.subr.bf16.mxu0 %v7376_v2 }
 0x63c   : > { %v3314_v5 = vpop.f32.mrb[72].mxu0 }
 0x63d   : > { %v3355_v42 = vadd.f32 %v3314_v5, %v6055_v59  ;;  %v3316_v4 = vpop.f32.mrb[73].mxu0 }
 0x63e   : > { %v3356_v22 = vadd.f32 %v3316_v4, %v6059_v57  ;;  %v3318_v10 = vpop.f32.mrb[74].mxu0 }
 0x63f   : > { %v3357_v0 = vadd.f32 %v3318_v10, %v6055_v59  ;;  %v3320_v20 = vpop.f32.mrb[75].mxu0  ;;  %v3367_v34 = vmax.f32 %v3355_v42, 0.0 }
 0x640   : > { %v3358_v15 = vadd.f32 %v3320_v20, %v6059_v57  ;;  %v3368_v50 = vmax.f32 %v3356_v22, 0.0 }
 0x641   : > { %v3369_v18 = vmax.f32 %v3357_v0, 0.0 }
 0x642   : > { %v3370_v16 = vmax.f32 %v3358_v15, 0.0 }
 0x643   : > { %v6643_v7 = vpack.c.bf16 %v3369_v18, %v3367_v34 }
 0x644   : > { %v6645_v60 = vpack.c.bf16 %v3370_v16, %v3368_v50  ;;  %v3324_v2 = vpop.f32.mrb[76].mxu0 }
 0x645   : > { %v3359_v5 = vadd.f32 %v3324_v2, %v6055_v59  ;;  %v3326_v25 = vpop.f32.mrb[77].mxu0 }
 0x646   : > { %v3360_v4 = vadd.f32 %v3326_v25, %v6059_v57  ;;  %v3328_v45 = vpop.f32.mrb[78].mxu0  ;;  %3417 = vmatprep.mubr.bf16.mxu1 %v6645_v60 }
 0x647   : > { %v3361_v10 = vadd.f32 %v3328_v45, %v6055_v59  ;;  %v3330_v20 = vpop.f32.mrb[79].mxu0  ;;  %3418 = vmatmul.mubr.bf16.vlgmr.msra.gmra.mrb[72].mxu1 %v6643_v7  ;;  %v3371_v22 = vmax.f32 %v3359_v5, 0.0 }
 0x648   : > { %v3362_v15 = vadd.f32 %v3330_v20, %v6059_v57  ;;  %3449 = vmatpush1.bf16.msra.mxu1 %v6083_v62  ;;  %v3372_v0 = vmax.f32 %v3360_v4, 0.0 }
 0x649   : > { %v3373_v42 = vmax.f32 %v3361_v10, 0.0  ;;  %3450 = vmatprep.subr.bf16.mxu1 %v6086_v14 }
 0x64a   : > { %v3374_v50 = vmax.f32 %v3362_v15, 0.0 }
 0x64b   : > { %v6655_v34 = vpack.c.bf16 %v3373_v42, %v3371_v22  ;;  %v7419_v42 = vld [vmem:[#allocation39_spill] sm:$0xff] }
 0x64c   : > { %v6657_v25 = vpack.c.bf16 %v3374_v50, %v3372_v0  ;;  %3451 = vmatpush1.bf16.msra.mxu1 %v6091_v55  ;;  %v3334_v45 = vpop.f32.mrb[80].mxu0  ;;  %v7420_v0 = vld [vmem:[#allocation40_spill] sm:$0xff]  ;;  %v7421_v50 = vld [vmem:[#allocation41_spill] sm:$0xff] }
 0x64d   : > { %v3363_v16 = vadd.f32 %v3334_v45, %v6055_v59  ;;  %v3336_v18 = vpop.f32.mrb[81].mxu0  ;;  %3452 = vmatprep.subr.bf16.mxu1 %v6098_v17  ;;  %v7424_v45 = vld [vmem:[#allocation44_spill] sm:$0xff] }
 0x64e   : > { %v3364_v62 = vadd.f32 %v3336_v18, %v6059_v57  ;;  %v3338_v2 = vpop.f32.mrb[82].mxu0  ;;  %3427 = vmatprep.mubr.bf16.mxu1 %v6657_v25  ;;  %v7426_v18 = vld [vmem:[#allocation46_spill] sm:$0xff] }
 0x64f   : > { %v3365_v14 = vadd.f32 %v3338_v2, %v6055_v59  ;;  %v3340_v5 = vpop.f32.mrb[83].mxu0  ;;  %3428 = vmatmul.mubr.bf16.gmra.mrb[76].mxu1 %v6655_v34  ;;  %v3375_v55 = vmax.f32 %v3363_v16, 0.0  ;;  %v7425_v16 = vld [vmem:[#allocation45_spill] sm:$0xff] }
 0x650   : > { %v3366_v4 = vadd.f32 %v3340_v5, %v6059_v57  ;;  %3453 = vmatpush1.bf16.msra.mxu1 %v6107_v37  ;;  %v3376_v20 = vmax.f32 %v3364_v62, 0.0  ;;  %v7377_v37 = vld [vmem:[#allocation61_spill] sm:$0xff]  ;;  %v7427_v62 = vld [vmem:[#allocation47_spill] sm:$0xff] }
 0x651   : > { %v3377_v10 = vmax.f32 %v3365_v14, 0.0  ;;  %3454 = vmatprep.subr.bf16.mxu1 %v6110_v11  ;;  %v7378_v11 = vld [vmem:[#allocation62_spill] sm:$0xff]  ;;  %v5057_v2 = vld [vmem:[#allocation7 + $0x4] ss:$8 sps:$4 sm:$0xff]  }
 0x652   : > { %v3378_v17 = vmax.f32 %v3366_v4, 0.0 }
 0x653   : > { %v6669_v15 = vpack.c.bf16 %v3377_v10, %v3375_v55 }
 0x654   : > { %v6671_v22 = vpack.c.bf16 %v3378_v17, %v3376_v20  ;;  %3455 = vmatpush1.bf16.msra.mxu1 %v6117_v38  ;;  %v7379_v38 = vld [vmem:[#allocation63_spill] sm:$0xff] }
 0x655   : > { %3456 = vmatprep.subr.bf16.mxu1 %v6124_v6  ;;  %v7380_v6 = vld [vmem:[#allocation64_spill] sm:$0xff] }
 0x656   : > { %3437 = vmatprep.mubr.bf16.mxu1 %v6671_v22 }
 0x657   : > { %3438 = vmatmul.mubr.bf16.gmra.mrb[80].mxu1 %v6669_v15 }
 0x658   : > { %3457 = vmatpush1.bf16.msra.mxu1 %v6133_v46  ;;  %3480 = vmatprep.mubr.bf16.mxu1 %v7253_v8  ;;  %v7381_v46 = vld [vmem:[#allocation65_spill] sm:$0xff] }
 0x659   : > { %3458 = vmatprep.subr.bf16.mxu1 %v6136_v52  ;;  %v7382_v52 = vld [vmem:[#allocation66_spill] sm:$0xff] }
 0x65c   : > { %3459 = vmatpush1.bf16.msra.mxu1 %v6143_v23  ;;  %v7383_v23 = vld [vmem:[#allocation67_spill] sm:$0xff] }
 0x65d   : > { %3460 = vmatprep.subr.bf16.mxu1 %v6150_v32  ;;  %v7384_v32 = vld [vmem:[#allocation68_spill] sm:$0xff] }
 0x660   : > { %3461 = vmatpush1.bf16.msra.mxu1 %v6159_v41  ;;  %v7385_v41 = vld [vmem:[#allocation69_spill] sm:$0xff] }
 0x661   : > { %3462 = vmatprep.subr.bf16.mxu1 %v6162_v39  ;;  %v7386_v39 = vld [vmem:[#allocation70_spill] sm:$0xff] }
 0x664   : > { %3463 = vmatpush1.bf16.msra.mxu1 %v6169_v48  ;;  %v7387_v48 = vld [vmem:[#allocation71_spill] sm:$0xff] }
 0x665   : > { %3464 = vmatprep.subr.bf16.mxu1 %v6176_v30  ;;  %v7388_v30 = vld [vmem:[#allocation72_spill] sm:$0xff] }
 0x668   : > { %3465 = vmatpush1.bf16.msra.mxu1 %v6185_v24  ;;  %v7389_v24 = vld [vmem:[#allocation73_spill] sm:$0xff] }
 0x669   : > { %3466 = vmatprep.subr.bf16.mxu1 %v6188_v58  ;;  %v7390_v58 = vld [vmem:[#allocation74_spill] sm:$0xff] }
 0x66c   : > { %3467 = vmatpush1.bf16.msra.mxu1 %v6193_v13  ;;  %v7391_v13 = vld [vmem:[#allocation75_spill] sm:$0xff] }
 0x66d   : > { %3468 = vmatprep.subr.bf16.mxu1 %v6198_v29  ;;  %v7392_v29 = vld [vmem:[#allocation76_spill] sm:$0xff] }
 0x670   : > { %3469 = vmatpush1.bf16.msra.mxu1 %v6203_v47  ;;  %v7393_v47 = vld [vmem:[#allocation77_spill] sm:$0xff] }
 0x671   : > { %3470 = vmatprep.subr.bf16.mxu1 %v6207_v49  ;;  %v7394_v49 = vld [vmem:[#allocation78_spill] sm:$0xff] }
 0x674   : > { %3471 = vmatpush1.bf16.msra.mxu1 %v6210_v19  ;;  %v7395_v19 = vld [vmem:[#allocation79_spill] sm:$0xff] }
 0x675   : > { %3472 = vmatprep.subr.bf16.mxu1 %v6213_v1  ;;  %v7396_v1 = vld [vmem:[#allocation17_spill] sm:$0xff] }
 0x678   : > { %3473 = vmatpush1.bf16.msra.mxu1 %v6216_v40  ;;  %v7397_v40 = vld [vmem:[#allocation18_spill] sm:$0xff] }
 0x679   : > { %3474 = vmatprep.subr.bf16.mxu1 %v6219_v28  ;;  %v7398_v28 = vld [vmem:[#allocation19_spill] sm:$0xff] }
 0x67c   : > { %3475 = vmatpush1.bf16.msra.mxu1 %v6222_v56  ;;  %v7399_v56 = vld [vmem:[#allocation21_spill] sm:$0xff] }
 0x67d   : > { %3476 = vmatprep.subr.bf16.mxu1 %v6225_v35  ;;  %v7400_v35 = vld [vmem:[#allocation23_spill] sm:$0xff] }
 0x680   : > { %3477 = vmatpush1.bf16.msra.mxu1 %v6228_v31  ;;  %v7401_v31 = vld [vmem:[#allocation25_spill] sm:$0xff] }
 0x681   : > { %3478 = vmatprep.subr.bf16.mxu1 %v6231_v21  ;;  %v7402_v21 = vld [vmem:[#allocation27_spill] sm:$0xff] }
 0x684   : > { %3479 = vmatpush1.bf16.msra.mxu1 %v6234_v44  ;;  %v7403_v44 = vld [vmem:[#allocation29_spill] sm:$0xff] }
 0x685   : > { %3511 = vmatprep.subr.bf16.mxu1 %v6237_v26 }
 0x687   : > { %3481 = vmatmul.mubr.bf16.vlgmr.msra.gmra.mrb[72].mxu1 %v7253_v8 }
 0x688   : > { %3490 = vmatprep.mubr.bf16.mxu1 %v6645_v60  ;;  %3512 = vmatpush1.bf16.msra.mxu1 %v6242_v9  ;;  %v7418_v60 = vld [vmem:[#allocation38_spill] sm:$0xff] }
 0x689   : > { %3513 = vmatprep.subr.bf16.mxu1 %v6245_v61 }
 0x68c   : > { %3514 = vmatpush1.bf16.msra.mxu1 %v6248_v63 }
 0x68d   : > { %3515 = vmatprep.subr.bf16.mxu1 %v6251_v27 }
 0x68f   : > { %3491 = vmatmul.mubr.bf16.gmra.mrb[76].mxu1 %v6643_v7  ;;  %v7417_v7 = vld [vmem:[#allocation37_spill] sm:$0xff] }
 0x690   : > { %3500 = vmatprep.mubr.bf16.mxu1 %v6657_v25  ;;  %3516 = vmatpush1.bf16.msra.mxu1 %v6256_v33 }
 0x691   : > { %3517 = vmatprep.subr.bf16.mxu1 %v6521_v51 }
 0x694   : > { %3518 = vmatpush1.bf16.msra.mxu1 %v6524_v43 }
 0x695   : > { %3519 = vmatprep.subr.bf16.mxu1 %v6527_v3 }
 0x697   : > { %3501 = vmatmul.mubr.bf16.gmra.mrb[80].mxu1 %v6655_v34 }
 0x698   : > { %3520 = vmatpush1.bf16.msra.mxu1 %v6531_v53  ;;  %3543 = vmatprep.mubr.bf16.mxu1 %v6657_v25  ;;  %v7423_v25 = vld [vmem:[#allocation43_spill] sm:$0xff] }
 0x699   : > { %3521 = vmatprep.subr.bf16.mxu1 %v6535_v36 }
 0x69c   : > { %3522 = vmatpush1.bf16.msra.mxu1 %v6538_v12 }
 0x69d   : > { %3523 = vmatprep.subr.bf16.mxu1 %v6541_v54 }
 0x6a0   : > { %3524 = vmatpush1.bf16.msra.mxu1 %v7377_v37 }
 0x6a1   : > { %3525 = vmatprep.subr.bf16.mxu1 %v7378_v11 }
 0x6a4   : > { %3526 = vmatpush1.bf16.msra.mxu1 %v7379_v38 }
 0x6a5   : > { %3527 = vmatprep.subr.bf16.mxu1 %v7380_v6 }
 0x6a8   : > { %3528 = vmatpush1.bf16.msra.mxu1 %v7381_v46 }
 0x6a9   : > { %3529 = vmatprep.subr.bf16.mxu1 %v7382_v52 }
 0x6ac   : > { %3530 = vmatpush1.bf16.msra.mxu1 %v7383_v23 }
 0x6ad   : > { %3531 = vmatprep.subr.bf16.mxu1 %v7384_v32 }
 0x6b0   : > { %3532 = vmatpush1.bf16.msra.mxu1 %v7385_v41 }
 0x6b1   : > { %3533 = vmatprep.subr.bf16.mxu1 %v7386_v39 }
 0x6b4   : > { %3534 = vmatpush1.bf16.msra.mxu1 %v7387_v48 }
 0x6b5   : > { %3535 = vmatprep.subr.bf16.mxu1 %v7388_v30 }
 0x6b8   : > { %3536 = vmatpush1.bf16.msra.mxu1 %v7389_v24 }
 0x6b9   : > { %3537 = vmatprep.subr.bf16.mxu1 %v7390_v58 }
 0x6bc   : > { %3538 = vmatpush1.bf16.msra.mxu1 %v7391_v13 }
 0x6bd   : > { %3539 = vmatprep.subr.bf16.mxu1 %v7392_v29 }
 0x6c0   : > { %3540 = vmatpush1.bf16.msra.mxu1 %v7393_v47 }
 0x6c1   : > { %3541 = vmatprep.subr.bf16.mxu1 %v7394_v49 }
 0x6c4   : > { %3542 = vmatpush1.bf16.msra.mxu1 %v7395_v19 }
 0x6c5   : > { %3710 = vmatprep.subr.bf16.mxu1 %v6237_v26  ;;  %v7404_v26 = vld [vmem:[#allocation51_spill] sm:$0xff] }
 0x6c7   : > { %3544 = vmatmul.mubr.bf16.vlgmr.msra.gmra.mrb[72].mxu1 %v6655_v34  ;;  %v7422_v34 = vld [vmem:[#allocation42_spill] sm:$0xff] }
 0x6c8   : > { %3553 = vmatprep.mubr.bf16.mxu1 %v6671_v22  ;;  %3711 = vmatpush1.bf16.msra.mxu1 %v6242_v9  ;;  %v7405_v9 = vld [vmem:[#allocation20_spill] sm:$0xff] }
 0x6c9   : > { %3712 = vmatprep.subr.bf16.mxu1 %v6245_v61  ;;  %v7406_v61 = vld [vmem:[#allocation22_spill] sm:$0xff] }
 0x6cc   : > { %3713 = vmatpush1.bf16.msra.mxu1 %v6248_v63  ;;  %v7407_v63 = vld [vmem:[#allocation24_spill] sm:$0xff] }
 0x6cd   : > { %3714 = vmatprep.subr.bf16.mxu1 %v6251_v27  ;;  %v7408_v27 = vld [vmem:[#allocation26_spill] sm:$0xff] }
 0x6cf   : > { %3554 = vmatmul.mubr.bf16.gmra.mrb[76].mxu1 %v6669_v15 }
 0x6d0   : > { %3563 = vmatprep.mubr.bf16.mxu1 %v7253_v8  ;;  %3715 = vmatpush1.bf16.msra.mxu1 %v6256_v33  ;;  %v7409_v33 = vld [vmem:[#allocation28_spill] sm:$0xff] }
 0x6d1   : > { %3716 = vmatprep.subr.bf16.mxu1 %v6521_v51  ;;  %v7410_v51 = vld [vmem:[#allocation30_spill] sm:$0xff] }
 0x6d4   : > { %3717 = vmatpush1.bf16.msra.mxu1 %v6524_v43  ;;  %v7411_v43 = vld [vmem:[#allocation31_spill] sm:$0xff] }
 0x6d5   : > { %3718 = vmatprep.subr.bf16.mxu1 %v6527_v3  ;;  %v7412_v3 = vld [vmem:[#allocation32_spill] sm:$0xff] }
 0x6d7   : > { %3564 = vmatmul.mubr.bf16.gmra.mrb[80].mxu1 %v7253_v8 }
 0x6d8   : > { %3719 = vmatpush1.bf16.msra.mxu1 %v6531_v53  ;;  %3742 = vmatprep.mubr.bf16.mxu1 %v7253_v8  ;;  %v7413_v53 = vld [vmem:[#allocation33_spill] sm:$0xff] }
 0x6d9   : > { %3720 = vmatprep.subr.bf16.mxu1 %v6535_v36  ;;  %v7414_v36 = vld [vmem:[#allocation34_spill] sm:$0xff] }
 0x6dc   : > { %3721 = vmatpush1.bf16.msra.mxu1 %v6538_v12  ;;  %v7415_v12 = vld [vmem:[#allocation35_spill] sm:$0xff] }
 0x6dd   : > { %3722 = vmatprep.subr.bf16.mxu1 %v6541_v54  ;;  %v7416_v54 = vld [vmem:[#allocation36_spill] sm:$0xff] }
 0x6e0   : > { %3723 = vmatpush1.bf16.msra.mxu1 %v7377_v37 }
 0x6e1   : > { %3724 = vmatprep.subr.bf16.mxu1 %v7378_v11 }
 0x6e4   : > { %3725 = vmatpush1.bf16.msra.mxu1 %v7379_v38 }
 0x6e5   : > { %3726 = vmatprep.subr.bf16.mxu1 %v7380_v6 }
 0x6e8   : > { %3727 = vmatpush1.bf16.msra.mxu1 %v7381_v46  ;;  %v7428_v46 = vld [vmem:[#allocation48_spill] sm:$0xff] }
 0x6e9   : > { %3728 = vmatprep.subr.bf16.mxu1 %v7382_v52 }
 0x6ec   : > { %3729 = vmatpush1.bf16.msra.mxu1 %v7383_v23  ;;  %v7429_v23 = vld [vmem:[#allocation53_spill] sm:$0xff] }
 0x6ed   : > { %3730 = vmatprep.subr.bf16.mxu1 %v7384_v32 }
 0x6f0   : > { %3731 = vmatpush1.bf16.msra.mxu1 %v7385_v41 }
 0x6f1   : > { %3732 = vmatprep.subr.bf16.mxu1 %v7386_v39 }
 0x6f4   : > { %3733 = vmatpush1.bf16.msra.mxu1 %v7387_v48  ;;  %v7430_v48 = vld [vmem:[#allocation49_spill] sm:$0xff] }
 0x6f5   : > { %3734 = vmatprep.subr.bf16.mxu1 %v7388_v30 }
 0x6f8   : > { %3735 = vmatpush1.bf16.msra.mxu1 %v7389_v24  ;;  %v7431_v24 = vld [vmem:[#allocation54_spill] sm:$0xff] }
 0x6f9   : > { %3736 = vmatprep.subr.bf16.mxu1 %v7390_v58 }
 0x6fc   : > { %3737 = vmatpush1.bf16.msra.mxu1 %v7391_v13 }
 0x6fd   : > { %3738 = vmatprep.subr.bf16.mxu1 %v7392_v29  ;;  %v7432_v29 = vld [vmem:[#allocation50_spill] sm:$0xff] }
 0x700   : > { %3739 = vmatpush1.bf16.msra.mxu1 %v7393_v47 }
 0x701   : > { %3740 = vmatprep.subr.bf16.mxu1 %v7394_v49 }
 0x704   : > { %3741 = vmatpush1.bf16.msra.mxu1 %v7395_v19  ;;  %v7433_v19 = vld [vmem:[#allocation55_spill] sm:$0xff] }
 0x705   : > { %3767 = vmatprep.subr.bf16.mxu1 %v7396_v1 }
 0x707   : > { %3743 = vmatmul.mubr.bf16.vlgmr.msra.gmra.mrb[84].mxu1 %v7253_v8 }
 0x708   : > { %3768 = vmatpush1.bf16.msra.mxu1 %v7397_v40  ;;  %v7434_v40 = vld [vmem:[#allocation52_spill] sm:$0xff] }
 0x709   : > { %3769 = vmatprep.subr.bf16.mxu1 %v7398_v28 }
 0x70c   : > { %3770 = vmatpush1.bf16.msra.mxu1 %v7399_v56 }
 0x70d   : > { %3771 = vmatprep.subr.bf16.mxu1 %v7400_v35  ;;  %v7435_v35 = vld [vmem:[#allocation56_spill] sm:$0xff] }
 0x710   : > { %3772 = vmatpush1.bf16.msra.mxu1 %v7401_v31 }
 0x711   : > { %3773 = vmatprep.subr.bf16.mxu1 %v7402_v21 }
 0x714   : > { %3774 = vmatpush1.bf16.msra.mxu1 %v7403_v44 }
 0x715   : > { %3775 = vmatprep.subr.bf16.mxu1 %v7404_v26 }
 0x718   : > { %3776 = vmatpush1.bf16.msra.mxu1 %v7405_v9 }
 0x719   : > { %3777 = vmatprep.subr.bf16.mxu1 %v7406_v61 }
 0x71c   : > { %3778 = vmatpush1.bf16.msra.mxu1 %v7407_v63 }
 0x71d   : > { %3779 = vmatprep.subr.bf16.mxu1 %v7408_v27 }
 0x720   : > { %3780 = vmatpush1.bf16.msra.mxu1 %v7409_v33  ;;  %v7436_v33 = vld [vmem:[#allocation58_spill] sm:$0xff] }
 0x721   : > { %3781 = vmatprep.subr.bf16.mxu1 %v7410_v51 }
 0x724   : > { %3782 = vmatpush1.bf16.msra.mxu1 %v7411_v43 }
 0x725   : > { %3783 = vmatprep.subr.bf16.mxu1 %v7412_v3 }
 0x728   : > { %3784 = vmatpush1.bf16.msra.mxu1 %v7413_v53  ;;  %v7437_v53 = vld [vmem:[#allocation57_spill] sm:$0xff] }
 0x729   : > { %3785 = vmatprep.subr.bf16.mxu1 %v7414_v36 }
 0x72c   : > { %3786 = vmatpush1.bf16.msra.mxu1 %v7415_v12 }
 0x72d   : > { %3787 = vmatprep.subr.bf16.mxu1 %v7416_v54 }
 0x730   : > { %3788 = vmatpush1.bf16.msra.mxu1 %v7417_v7  ;;  %v7438_v7 = vld [vmem:[#allocation59_spill] sm:$0xff] }
 0x731   : > { %3789 = vmatprep.subr.bf16.mxu1 %v7418_v60 }
 0x734   : > { %3790 = vmatpush1.bf16.msra.mxu1 %v7419_v42 }
 0x735   : > { %3791 = vmatprep.subr.bf16.mxu1 %v7420_v0  ;;  %v7439_v0 = vld [vmem:[#allocation60_spill] sm:$0xff] }
 0x738   : > { %3792 = vmatpush1.bf16.msra.mxu1 %v7421_v50 }
 0x739   : > { %3793 = vmatprep.subr.bf16.mxu1 %v7422_v34 }
 0x73c   : > { %3794 = vmatpush1.bf16.msra.mxu1 %v7423_v25 }
 0x73d   : > { %3795 = vmatprep.subr.bf16.mxu1 %v7424_v45 }
 0x740   : > { %3796 = vmatpush1.bf16.msra.mxu1 %v7425_v16 }
 0x741   : > { %3797 = vmatprep.subr.bf16.mxu1 %v7426_v18 }
 0x744   : > { %3798 = vmatpush1.bf16.msra.mxu1 %v7427_v62 }
 0x745   : > { %3810 = vmatprep.subr.bf16.mxu1 %v5057_v2 }
 0x79a   : > { %v3545_v14 = vpop.f32.mrb[72].mxu1 }
 0x79b   : > { %v3547_v5 = vpop.f32.mrb[73].mxu1  ;;  %v3586_v10 = vadd.f32 %v3545_v14, %v6055_v59 }
 0x79c   : > { %v3549_v4 = vpop.f32.mrb[74].mxu1  ;;  %v3587_v20 = vadd.f32 %v3547_v5, %v6059_v57  ;;  %v6846_v5 = vld [vmem:[#allocation7] ss:$8 sps:$4 sm:$0xff]  }
 0x79d   : > { %v3551_v55 = vpop.f32.mrb[75].mxu1  ;;  %v3588_v15 = vadd.f32 %v3549_v4, %v6055_v59  ;;  %v3598_v52 = vadd.f32 %v3586_v10, %v7428_v46  ;;  %v6850_v4 = vld [vmem:[#allocation7 + $0x14] ss:$8 sps:$4 sm:$0xff]   ;;  %v6856_v10 = vld [vmem:[#allocation7 + $0x24] ss:$8 sps:$4 sm:$0xff]  }
 0x79e   : > { %v3589_v11 = vadd.f32 %v3551_v55, %v6059_v57  ;;  %v3599_v30 = vadd.f32 %v3587_v20, %v7430_v48  ;;  %v6853_v55 = vld [vmem:[#allocation7 + $0x10] ss:$8 sps:$4 sm:$0xff]   ;;  %v6859_v20 = vld [vmem:[#allocation7 + $0x20] ss:$8 sps:$4 sm:$0xff]   ;;  %v6900_v48 = vld [vmem:[#allocation7 + $0x94] ss:$8 sps:$4 sm:$0xff]  }
 0x79f   : > { %v3600_v47 = vadd.f32 %v3588_v15, %v7432_v29  ;;  %v6865_v15 = vld [vmem:[#allocation7 + $0x30] ss:$8 sps:$4 sm:$0xff]   ;;  %v6883_v46 = vld [vmem:[#allocation7 + $0x60] ss:$8 sps:$4 sm:$0xff]   ;;  %v6914_v29 = vld [vmem:[#allocation7 + $0xb4] ss:$8 sps:$4 sm:$0xff]  }
 0x7a0   : > { %v3601_v28 = vadd.f32 %v3589_v11, %v7434_v40  ;;  %v6874_v11 = vld [vmem:[#allocation7 + $0x54] ss:$8 sps:$4 sm:$0xff]   ;;  %v5084_v40 = vld [vmem:[#allocation7 + $0xd0] ss:$8 sps:$4 sm:$0xff]  }
 0x7a2   : > { %v3555_v17 = vpop.f32.mrb[76].mxu1 }
 0x7a3   : > { %v3590_v22 = vadd.f32 %v3555_v17, %v6055_v59  ;;  %v3557_v37 = vpop.f32.mrb[77].mxu1  ;;  %v6862_v17 = vld [vmem:[#allocation7 + $0x34] ss:$8 sps:$4 sm:$0xff]  }
 0x7a4   : > { %v3591_v38 = vadd.f32 %v3557_v37, %v6059_v57  ;;  %v3559_v6 = vpop.f32.mrb[78].mxu1  ;;  %v6871_v37 = vld [vmem:[#allocation7 + $0x40] ss:$8 sps:$4 sm:$0xff]  }
 0x7a5   : > { %v3602_v32 = vadd.f32 %v3590_v22, %v7429_v23  ;;  %v3592_v41 = vadd.f32 %v3559_v6, %v6055_v59  ;;  %v3561_v39 = vpop.f32.mrb[79].mxu1  ;;  %v6868_v22 = vld [vmem:[#allocation7 + $0x44] ss:$8 sps:$4 sm:$0xff]   ;;  %v6889_v23 = vld [vmem:[#allocation7 + $0x70] ss:$8 sps:$4 sm:$0xff]  }
 0x7a6   : > { %v3603_v58 = vadd.f32 %v3591_v38, %v7431_v24  ;;  %v3593_v13 = vadd.f32 %v3561_v39, %v6059_v57  ;;  %v6877_v38 = vld [vmem:[#allocation7 + $0x50] ss:$8 sps:$4 sm:$0xff]   ;;  %v6880_v6 = vld [vmem:[#allocation7 + $0x64] ss:$8 sps:$4 sm:$0xff]  }
 0x7a7   : > { %v3610_v49 = vmax.f32 %v3598_v52, %v3602_v32  ;;  %v3604_v1 = vadd.f32 %v3592_v41, %v7433_v19  ;;  %v6886_v52 = vld [vmem:[#allocation7 + $0x74] ss:$8 sps:$4 sm:$0xff]   ;;  %v6892_v32 = vld [vmem:[#allocation7 + $0x84] ss:$8 sps:$4 sm:$0xff]   ;;  %v6895_v41 = vld [vmem:[#allocation7 + $0x80] ss:$8 sps:$4 sm:$0xff]  }
 0x7a8   : > { %v3611_v56 = vmax.f32 %v3599_v30, %v3603_v58  ;;  %v3605_v31 = vadd.f32 %v3593_v13, %v7435_v35  ;;  %v6905_v24 = vld [vmem:[#allocation7 + $0x90] ss:$8 sps:$4 sm:$0xff]   ;;  %v6908_v58 = vld [vmem:[#allocation7 + $0xa4] ss:$8 sps:$4 sm:$0xff]   ;;  %v6911_v13 = vld [vmem:[#allocation7 + $0xa0] ss:$8 sps:$4 sm:$0xff]  }
 0x7a9   : > { %v3612_v21 = vmax.f32 %v3600_v47, %v3604_v1  ;;  %v6917_v47 = vld [vmem:[#allocation7 + $0xb0] ss:$8 sps:$4 sm:$0xff]   ;;  %v5082_v19 = vld [vmem:[#allocation7 + $0xc0] ss:$8 sps:$4 sm:$0xff]   ;;  %v5083_v1 = vld [vmem:[#allocation7 + $0xd4] ss:$8 sps:$4 sm:$0xff]  }
 0x7aa   : > { %v3613_v44 = vmax.f32 %v3601_v28, %v3605_v31  ;;  %v3565_v26 = vpop.f32.mrb[80].mxu1  ;;  %v5085_v28 = vld [vmem:[#allocation7 + $0xe4] ss:$8 sps:$4 sm:$0xff]   ;;  %v5087_v35 = vld [vmem:[#allocation7 + $0xf4] ss:$8 sps:$4 sm:$0xff]  }
 0x7ab   : > { %v3594_v9 = vadd.f32 %v3565_v26, %v6055_v59  ;;  %v3567_v61 = vpop.f32.mrb[81].mxu1  ;;  %v5088_v31 = vld [vmem:[#allocation7 + $0xf0] ss:$8 sps:$4 sm:$0xff]  }
 0x7ac   : > { %v3595_v63 = vadd.f32 %v3567_v61, %v6059_v57  ;;  %v3569_v27 = vpop.f32.mrb[82].mxu1 }
 0x7ad   : > { %v3606_v51 = vadd.f32 %v3594_v9, %v7436_v33  ;;  %v3596_v43 = vadd.f32 %v3569_v27, %v6055_v59  ;;  %v3571_v3 = vpop.f32.mrb[83].mxu1 }
 0x7ae   : > { %v3607_v36 = vadd.f32 %v3595_v63, %v7437_v53  ;;  %v3597_v12 = vadd.f32 %v3571_v3, %v6059_v57 }
 0x7af   : > { %v6832_v54 = vmax.f32 %v3610_v49, %v3606_v51  ;;  %v3608_v60 = vadd.f32 %v3596_v43, %v7438_v7  ;;  %v5081_v49 = vld [vmem:[#allocation7 + $0xc4] ss:$8 sps:$4 sm:$0xff]  }
 0x7b0   : > { %v6835_v42 = vmax.f32 %v3611_v56, %v3607_v36  ;;  %v3609_v50 = vadd.f32 %v3597_v12, %v7439_v0  ;;  %v5086_v56 = vld [vmem:[#allocation7 + $0xe0] ss:$8 sps:$4 sm:$0xff]  }
 0x7b1   : > { %v6838_v34 = vmax.f32 %v3612_v21, %v3608_v60  ;;  %v3618_v62 = vmax.f32 %v6832_v54, 0.0 }
 0x7b2   : > { %v6840_v25 = vmax.f32 %v3613_v44, %v3609_v50  ;;  %v3619_v16 = vmax.f32 %v6835_v42, 0.0 }
 0x7b3   : > { %v3620_v45 = vmax.f32 %v6838_v34, 0.0 }
 0x7b4   : > { %v3621_v18 = vmax.f32 %v6840_v25, 0.0 }
 0x7b5   : > { %v3622_v14 = vpack.c.bf16 %v3620_v45, %v3618_v62 }
 0x7b6   : > { %v3623_v2 = vpack.c.bf16 %v3621_v18, %v3619_v16 }
 0x7b8   : > { %3656 = vmatprep.mubr.bf16.mxu0 %v3623_v2 }
 0x7b9   : > { %3657 = vmatmul.mubr.bf16.vlgmr.msra.gmra.mrb[84].mxu0 %v3622_v14 }
 0x7ba   : > { %3668 = vmatpush1.bf16.msra.mxu0 %v6846_v5  ;;  %3699 = vmatprep.mubr.bf16.mxu0 %v7253_v8 }
 0x7bb   : > { %3669 = vmatprep.subr.bf16.mxu0 %v6850_v4 }
 0x7be   : > { %3670 = vmatpush1.bf16.msra.mxu0 %v6853_v55 }
 0x7bf   : > { %3671 = vmatprep.subr.bf16.mxu0 %v6856_v10 }
 0x7c2   : > { %3672 = vmatpush1.bf16.msra.mxu0 %v6859_v20 }
 0x7c3   : > { %3673 = vmatprep.subr.bf16.mxu0 %v6862_v17 }
 0x7c6   : > { %3674 = vmatpush1.bf16.msra.mxu0 %v6865_v15 }
 0x7c7   : > { %3675 = vmatprep.subr.bf16.mxu0 %v6868_v22 }
 0x7ca   : > { %3676 = vmatpush1.bf16.msra.mxu0 %v6871_v37 }
 0x7cb   : > { %3677 = vmatprep.subr.bf16.mxu0 %v6874_v11 }
 0x7ce   : > { %3678 = vmatpush1.bf16.msra.mxu0 %v6877_v38 }
 0x7cf   : > { %3679 = vmatprep.subr.bf16.mxu0 %v6880_v6 }
 0x7d2   : > { %3680 = vmatpush1.bf16.msra.mxu0 %v6883_v46 }
 0x7d3   : > { %3681 = vmatprep.subr.bf16.mxu0 %v6886_v52 }
 0x7d6   : > { %3682 = vmatpush1.bf16.msra.mxu0 %v6889_v23 }
 0x7d7   : > { %3683 = vmatprep.subr.bf16.mxu0 %v6892_v32 }
 0x7da   : > { %3684 = vmatpush1.bf16.msra.mxu0 %v6895_v41  ;;  %v6898_v39 = vpop.f32.mrb[84].mxu1 }
 0x7db   : > { %3685 = vmatprep.subr.bf16.mxu0 %v6900_v48  ;;  %v6903_v30 = vpop.f32.mrb[85].mxu1 }
 0x7dc   : > { %v6921_v21 = vpop.f32.mrb[86].mxu1 }
 0x7dd   : > { %v6923_v44 = vpop.f32.mrb[87].mxu1 }
 0x7de   : > { %3686 = vmatpush1.bf16.msra.mxu0 %v6905_v24 }
 0x7df   : > { %3687 = vmatprep.subr.bf16.mxu0 %v6908_v58 }
 0x7e2   : > { %3688 = vmatpush1.bf16.msra.mxu0 %v6911_v13 }
 0x7e3   : > { %3689 = vmatprep.subr.bf16.mxu0 %v6914_v29 }
 0x7e6   : > { %3690 = vmatpush1.bf16.msra.mxu0 %v6917_v47 }
 0x7e7   : > { %3691 = vmatprep.subr.bf16.mxu0 %v5081_v49 }
 0x7ea   : > { %3692 = vmatpush1.bf16.msra.mxu0 %v5082_v19 }
 0x7eb   : > { %3693 = vmatprep.subr.bf16.mxu0 %v5083_v1 }
 0x7ee   : > { %3694 = vmatpush1.bf16.msra.mxu0 %v5084_v40 }
 0x7ef   : > { %3695 = vmatprep.subr.bf16.mxu0 %v5085_v28 }
 0x7f2   : > { %3696 = vmatpush1.bf16.msra.mxu0 %v5086_v56 }
 0x7f3   : > { %3697 = vmatprep.subr.bf16.mxu0 %v5087_v35 }
 0x7f6   : > { %3698 = vmatpush1.bf16.msra.mxu0 %v5088_v31 }
 0x7f9   : > { %3700 = vmatmul.mubr.bf16.vlgmr.msra.gmra.mrb[84].mxu0 %v7253_v8 }
 0x8cc   : > { %v3701_v26 = vpop.f32.mrb[84].mxu0 }
 0x8cd   : > { %v3753_v9 = vadd.f32 %v6898_v39, %v3701_v26  ;;  %v3703_v61 = vpop.f32.mrb[85].mxu0 }
 0x8ce   : > { %v3754_v63 = vadd.f32 %v6903_v30, %v3703_v61  ;;  %v3705_v27 = vpop.f32.mrb[86].mxu0 }
 0x8cf   : > { %v3757_v33 = vadd.f32 %v3753_v9, %v6055_v59  ;;  %v3755_v51 = vadd.f32 %v6921_v21, %v3705_v27  ;;  %v3707_v43 = vpop.f32.mrb[87].mxu0 }
 0x8d0   : > { %v3758_v3 = vadd.f32 %v3754_v63, %v6059_v57  ;;  %v3756_v53 = vadd.f32 %v6923_v44, %v3707_v43 }
 0x8d1   : > { %v3759_v36 = vadd.f32 %v3755_v51, %v6055_v59  ;;  %v3761_v7 = vmax.f32 %v3757_v33, 0.0 }
 0x8d2   : > { %v3760_v12 = vadd.f32 %v3756_v53, %v6059_v57  ;;  %v3762_v0 = vmax.f32 %v3758_v3, 0.0 }
 0x8d3   : > { %v3763_v60 = vmax.f32 %v3759_v36, 0.0 }
 0x8d4   : > { %v3764_v50 = vmax.f32 %v3760_v12, 0.0 }
 0x8d5   : > { %v3765_v45 = vpack.c.bf16 %v3763_v60, %v3761_v7 }
 0x8d6   : > { %v3766_v16 = vpack.c.bf16 %v3764_v50, %v3762_v0 }
 0x8d8   : > { %3799 = vmatprep.mubr.bf16.mxu1 %v3766_v16 }
 0x8d9   : > { %3800 = vmatmul.mubr.bf16.vlgmr.msra.gmra.mrb[88].mxu1 %v3765_v45 }
 0x8da   : > { %3811 = vmatpush1.bf16.msra.mxu1 %v6846_v5  ;;  %3842 = vmatprep.mubr.bf16.mxu1 %v7253_v8 }
 0x8db   : > { %3812 = vmatprep.subr.bf16.mxu1 %v6850_v4 }
 0x8de   : > { %3813 = vmatpush1.bf16.msra.mxu1 %v6853_v55 }
 0x8df   : > { %3814 = vmatprep.subr.bf16.mxu1 %v6856_v10 }
 0x8e2   : > { %3815 = vmatpush1.bf16.msra.mxu1 %v6859_v20 }
 0x8e3   : > { %3816 = vmatprep.subr.bf16.mxu1 %v6862_v17 }
 0x8e6   : > { %3817 = vmatpush1.bf16.msra.mxu1 %v6865_v15 }
 0x8e7   : > { %3818 = vmatprep.subr.bf16.mxu1 %v6868_v22 }
 0x8ea   : > { %3819 = vmatpush1.bf16.msra.mxu1 %v6871_v37 }
 0x8eb   : > { %3820 = vmatprep.subr.bf16.mxu1 %v6874_v11 }
 0x8ee   : > { %3821 = vmatpush1.bf16.msra.mxu1 %v6877_v38 }
 0x8ef   : > { %3822 = vmatprep.subr.bf16.mxu1 %v6880_v6 }
 0x8f2   : > { %3823 = vmatpush1.bf16.msra.mxu1 %v6883_v46 }
 0x8f3   : > { %3824 = vmatprep.subr.bf16.mxu1 %v6886_v52 }
 0x8f6   : > { %3825 = vmatpush1.bf16.msra.mxu1 %v6889_v23 }
 0x8f7   : > { %3826 = vmatprep.subr.bf16.mxu1 %v6892_v32 }
 0x8fa   : > { %3827 = vmatpush1.bf16.msra.mxu1 %v6895_v41 }
 0x8fb   : > { %3828 = vmatprep.subr.bf16.mxu1 %v6900_v48 }
 0x8fe   : > { %3829 = vmatpush1.bf16.msra.mxu1 %v6905_v24 }
 0x8ff   : > { %3830 = vmatprep.subr.bf16.mxu1 %v6908_v58 }
 0x902   : > { %3831 = vmatpush1.bf16.msra.mxu1 %v6911_v13 }
 0x903   : > { %3832 = vmatprep.subr.bf16.mxu1 %v6914_v29 }
 0x906   : > { %3833 = vmatpush1.bf16.msra.mxu1 %v6917_v47 }
 0x907   : > { %3834 = vmatprep.subr.bf16.mxu1 %v5081_v49 }
 0x90a   : > { %3835 = vmatpush1.bf16.msra.mxu1 %v5082_v19 }
 0x90b   : > { %3836 = vmatprep.subr.bf16.mxu1 %v5083_v1 }
 0x90e   : > { %3837 = vmatpush1.bf16.msra.mxu1 %v5084_v40 }
 0x90f   : > { %3838 = vmatprep.subr.bf16.mxu1 %v5085_v28 }
 0x912   : > { %3839 = vmatpush1.bf16.msra.mxu1 %v5086_v56 }
 0x913   : > { %3840 = vmatprep.subr.bf16.mxu1 %v5087_v35 }
 0x916   : > { %3841 = vmatpush1.bf16.msra.mxu1 %v5088_v31 }
 0x919   : > { %3843 = vmatmul.mubr.bf16.vlgmr.msra.gmra.mrb[88].mxu1 %v7253_v8 }
 0x9ec   : > { %v3844_v18 = vpop.f32.mrb[88].mxu1 }
 0x9ed   : > { %v3853_v62 = vadd.f32 %v3844_v18, %v6898_v39  ;;  %v3846_v2 = vpop.f32.mrb[89].mxu1 }
 0x9ee   : > { %v3854_v14 = vadd.f32 %v3846_v2, %v6903_v30  ;;  %v3848_v5 = vpop.f32.mrb[90].mxu1 }
 0x9ef   : > { %v3857_v4 = vadd.f32 %v3853_v62, %v6055_v59  ;;  %v3855_v55 = vadd.f32 %v3848_v5, %v6921_v21  ;;  %v3850_v10 = vpop.f32.mrb[91].mxu1 }
 0x9f0   : > { %v3858_v20 = vadd.f32 %v3854_v14, %v6059_v57  ;;  %v3856_v8 = vadd.f32 %v3850_v10, %v6923_v44 }
 0x9f1   : > { %v3861_v17 = vadd.f32 %v3857_v4, %v6832_v54  ;;  %v3859_v15 = vadd.f32 %v3855_v55, %v6055_v59 }
 0x9f2   : > { %v3862_v22 = vadd.f32 %v3858_v20, %v6835_v42  ;;  %v3860_v37 = vadd.f32 %v3856_v8, %v6059_v57 }
 0x9f3   : > { %3865 = vst [vmem:[%s297_s23] sm:$0xff] %v3861_v17  ;;  %v3863_v11 = vadd.f32 %v3859_v15, %v6838_v34 }
 0x9f4   : > { %3866 = vst [vmem:[%s297_s23 + $0x8] sm:$0xff] %v3862_v22  ;;  %v3864_v59 = vadd.f32 %v3860_v37, %v6840_v25 }
 0x9f5   : > { %3867 = vst [vmem:[%s297_s23 + $0x10] sm:$0xff] %v3863_v11 }
 0x9f6   : > { %3868 = vst [vmem:[%s297_s23 + $0x18] sm:$0xff] %v3864_v59 }
 0x9f7   : > { %5158 = shalt.err (!%p5155_p1)
}
 0x9f8   : > { %s5159_s27 = scalar_lea.hbm %s6976_s22, 512  ;;  %s5163_s7 = scalar_lea.hbm %s7026_s5, 1024 }
 0x9f9   : > { %p5160_p3 = scmp.ne.s32.totalorder %s6976_s22, %s5159_s27  ;;  %p5164_p6 = scmp.lt.u32.totalorder %s6976_s22, %s7026_s5 }
 0x9fa   : > { %p5165_p11 = scmp.lt.u32.totalorder %s5163_s7, %s5159_s27  ;;  %p5167_p0 = scmp.lt.u32.totalorder %s5159_s27, %s6976_s22 }
 0x9fb   : > { %p5161_p2 = pnand %p5160_p3, %p7440_p13 }
 0x9fc   : > { %p5166_p12 = por %p5165_p11, %p5164_p6 }
 0x9fd   : > { %p5162_p5 = pneg %p5161_p2 }
 0x9fe   : > { %p5168_p7 = por %p5167_p0, %p5166_p12 }
 0xa00   : > { %p5169_p8 = pnand %p5168_p7, %p5162_p5 }
 0xa02   : > { %5172 = shalt.err (!%p5169_p8)
}
 0xa03   : > { %s5230_s23 = smov 256   ;;  %s5231_s13 = smov 16  }
 0xa04   : > { %4545 = dma.vmem_to_hbm [thread:$0]  (%p7440_p13), %s6968_s26, 512, %s6976_s22, %s3870_s12, %s5230_s23, %s5230_s23, %s5231_s13  }
 0xa05 PF: > { %s3899_s16 = sand.u32 1, %s5203_s18   ;;  %p7441_p9 = scmp.ne.s32.totalorder %s7199_s6, 0 }
 0xa06   : > { %s3900_s15 = scalar_lea.sflag [#allocation4], %s3899_s16 }
 0xa07   : > { %p4555_p10 = pnand %p3980_p4, %p7441_p9 }
 0xa09   : > { %5198 = dma.done.wait (!%p4555_p10), %s3900_s15, 512  }
 0xa0a   : > { %5200 = vsyncadd (!%p4555_p10), %s3900_s15, 4294966784  ;;  %s7442_s10 = sld [smem:[#allocation15_spill]]  ;;  %p19_p1 = scmp.ge.s32.totalorder %s5287_s24, 4  }
 0xa0b   : > { %s7443_s18 = smov %s5207_s19  ;;  %s7444_s19 = smov %s5211_s20 }
 0xa0c   : > { %s7446_s21 = smov %s5287_s24  ;;  %21 = sbr.rel (!%p19_p1) target bundleno = 6 (0x6), region = 102 }
 0xa10   : > { %s7445_s20 = smov %s7442_s10 }
 0xa13   :  { %3905 = vsyncpa [#allocation3], 1 }
 0xa14   :  { %3907 = vsyncpa [#allocation3 + $0x1], 1 }
 0xa15   :  { %3908 = vsyncpa [#allocation6], 1 }
 0xa16   :  { %3909 = vsyncpa [#allocation4], 1 }
 0xa17   :  { %3911 = vsyncpa [#allocation4 + $0x1], 1 }

</bundles_post_ra>
